<compile_context>
chip_gen: v5e
topology: v5e:2x2
jax: 0.10.0
libtpu: 0.0.40
codegen_flags: <defaults>
</compile_context>

<pallas_src>
import functools
import numpy as np

import jax
import jax.numpy as jnp
from jax.experimental import pallas as pl
from jax.experimental.pallas import tpu as pltpu


# ----------------------------------------------------------------------------
# In-kernel helpers (all float32: shapes are tiny, so no bf16 MXU path)
# ----------------------------------------------------------------------------

def _dot(a, b):
    return jnp.dot(a, b, preferred_element_type=jnp.float32)


def _dot_t(a, b):
    # a @ b.T without materializing a transpose (contract last dims of both).
    return jax.lax.dot_general(a, b, dimension_numbers=(((1,), (1,)), ((), ())),
                               preferred_element_type=jnp.float32)


def _gelu(y):
    # TODO(synk): nn.GELU defaults to the exact erf form; tanh approximation is
    # used here (erf has no guaranteed Mosaic lowering).
    c = 0.7978845608028654  # sqrt(2/pi)
    return 0.5 * y * (1.0 + jnp.tanh(c * (y + 0.044715 * y * y * y)))


def _ln(x, g, b, eps):
    mu = jnp.mean(x, axis=-1, keepdims=True)
    xc = x - mu
    var = jnp.mean(xc * xc, axis=-1, keepdims=True)
    return xc * jax.lax.rsqrt(var + eps) * g + b


def _full_spec(shape):
    zeros = (0,) * len(shape)
    return pl.BlockSpec(shape, lambda *_: zeros)


# ----------------------------------------------------------------------------
# Kernel 1: fused token(conv-as-matmul) + temporal embedding + positional enc.
# ----------------------------------------------------------------------------

def _embed_kernel(feat_ref, w_ref, pos_ref, o_ref):
    # feat_ref: (1, T, K) per-batch block; pos broadcast-added in-kernel.
    o_ref[0] = (_dot(feat_ref[0], w_ref[...]) + pos_ref[...]).astype(o_ref.dtype)


def data_embedding(p, x, x_mark, cfg):
    # TODO(synk): DataEmbedding source unavailable; TSLib-style TokenEmbedding
    # (circular Conv1d k=3, no bias, unrolled as a matmul) + timeF linear + PE.
    B, T, _ = x.shape
    D = cfg["c_dim"]
    xm1 = jnp.roll(x, 1, axis=1)      # x[t-1] (circular)
    xp1 = jnp.roll(x, -1, axis=1)     # x[t+1] (circular)
    feat = jnp.concatenate([xm1, x, xp1, x_mark], axis=-1).astype(jnp.float32)
    K = feat.shape[-1]
    return pl.pallas_call(
        _embed_kernel,
        grid=(B,),
        in_specs=[pl.BlockSpec((1, T, K), lambda b: (b, 0, 0)),
                  _full_spec((K, D)),
                  _full_spec((T, D))],
        out_specs=pl.BlockSpec((1, T, D), lambda b: (b, 0, 0)),
        out_shape=jax.ShapeDtypeStruct((B, T, D), jnp.float32),
        compiler_params=pltpu.CompilerParams(dimension_semantics=("parallel",)),
    )(feat, p["w_emb"], p["pos"][:T].astype(jnp.float32))


# ----------------------------------------------------------------------------
# Kernel 2: one fused GrapherBlock layer (optionally + output head)
# ----------------------------------------------------------------------------

def _grapher_layer_kernel(x_ref, sw_ref, bias_ref, e1_ref, e2_ref, mixw_ref,
                          mixb_ref, wqkv_ref, bqkv_ref, wo_ref, bo_ref,
                          w1_ref, b1_ref, w2_ref, b2_ref, ln_ref, mln_ref,
                          *rest, k, depth, alpha, n_heads, sm_scale, seq_len,
                          l_pad, eps, with_head):
    if with_head:
        (pw_ref, pb_ref, s2pw_ref, s2pb_ref, std_ref, mean_ref,
         enc_ref, dec_ref) = rest
    else:
        (enc_ref,) = rest

    x = x_ref[0]                       # (T, N) float32; reassigned like torch
    N = x.shape[-1]
    D = N
    dh = D // n_heads
    sw = sw_ref[0]                     # (1, k) softmax(scale_weight), this batch
    ln = ln_ref[...]                   # (6, D)
    acc = jnp.zeros_like(x)            # weighted sum over scales
    n_pad = l_pad - seq_len

    for i in range(k):                 # static unroll over the top-k scales
        # ---- GNNBlock ------------------------------------------------------
        # TODO(synk): GNNBlock source unavailable; learned-adjacency mixprop
        # over the c_dim feature graph.
        adj = _dot_t(e1_ref[i], e2_ref[i])                 # E1 @ E2.T  (N, N)
        adj = jnp.maximum(jnp.tanh(3.0 * adj), 0.0)
        adj = adj - jnp.max(adj, axis=-1, keepdims=True)   # row softmax (exact)
        adj = jnp.exp(adj)
        adj = adj / jnp.sum(adj, axis=-1, keepdims=True)

        mw = mixw_ref[i]                                   # ((depth+1)*N, N)
        h = x
        gout = _dot(x, mw[0:N, :])                         # accumulate mix matmul
        for d in range(depth):                             # static unroll
            h = alpha * x + (1.0 - alpha) * _dot_t(h, adj) # h @ adj.T
            gout = gout + _dot(h, mw[(d + 1) * N:(d + 2) * N, :])
        x = gout + mixb_ref[i]                             # gconv output (T, N)

        # ---- per-scale segment attention as block-diagonal masked attention
        # TODO(synk): Attention_Block source unavailable; post-LN encoder layer
        # (MHSA + residual + LN + GELU-FFN + residual + LN), fused with the
        # GrapherBlock trailing LayerNorm + GELU.
        y = jnp.concatenate([x, jnp.zeros((n_pad, N), jnp.float32)], axis=0)
        bias = bias_ref[i]                                 # (l_pad, l_pad)
        qkv = _dot(y, wqkv_ref[...]) + bqkv_ref[...]       # fused QKV (l_pad, 3D)

        attn = jnp.zeros((l_pad, D), jnp.float32)
        for hh in range(n_heads):                          # static unroll
            lo = hh * dh
            q = qkv[:, lo:lo + dh] * sm_scale              # scale folded into q
            kk = qkv[:, D + lo:D + lo + dh]
            vv = qkv[:, 2 * D + lo:2 * D + lo + dh]
            s = _dot_t(q, kk) + bias                       # (l_pad, l_pad)
            s = s - jnp.max(s, axis=-1, keepdims=True)
            p = jnp.exp(s)
            p = p / jnp.sum(p, axis=-1, keepdims=True)
            ctx = _dot(p, vv)                              # (l_pad, dh)
            # fold this head directly into its slice of the output projection
            attn = attn + _dot(ctx, wo_ref[lo:lo + dh, :])
        attn = attn + bo_ref[...]

        h1 = _ln(y + attn, ln[0:1, :], ln[1:2, :], eps)
        ff = _gelu(_dot(h1, w1_ref[...]) + b1_ref[...])
        ff = _dot(ff, w2_ref[...]) + b2_ref[...]
        h2 = _ln(h1 + ff, ln[2:3, :], ln[3:4, :], eps)
        out_i = _gelu(_ln(h2, ln[4:5, :], ln[5:6, :], eps))  # grapher norm+gelu

        acc = acc + sw[:, i:i + 1] * out_i[0:seq_len, :]     # weighted sum

    res = acc + x                                            # + x after last gconv
    enc = _ln(res, mln_ref[0:1, :], mln_ref[1:2, :], eps)    # Model-level LayerNorm
    enc_ref[0] = enc.astype(enc_ref.dtype)

    if with_head:
        # projection(c_dim->c_out) + seq2pred Linear(seq_len->pred_len) + de-norm
        # TODO(synk): Predict source unavailable; shared Linear(seq_len->pred_len).
        proj = _dot(enc, pw_ref[...]) + pb_ref[...]          # (T, C)
        dec = _dot(s2pw_ref[...], proj) + s2pb_ref[...]      # (P, T)@(T, C)->(P, C)
        dec = dec * std_ref[0] + mean_ref[0]                 # per-channel de-norm
        dec_ref[0] = dec.astype(dec_ref.dtype)


def grapher_layer_call(blk, params, x, sw_soft, bias_masks, cfg, *,
                       with_head=False, stdev=None, means=None):
    B, T, N = x.shape
    D = N
    k = cfg["top_k"]
    depth = cfg["gcn_depth"]
    nd = cfg["node_dim"]
    dff = cfg["d_ff"]
    H = cfg["n_heads"]
    C = cfg["c_out"]
    P = cfg["pred_len"]
    L_pad = 2 * T
    att = blk["att"]

    kernel = functools.partial(
        _grapher_layer_kernel, k=k, depth=depth, alpha=float(cfg["propalpha"]),
        n_heads=H, sm_scale=1.0 / float(np.sqrt(D // H)), seq_len=T,
        l_pad=L_pad, eps=1e-5, with_head=with_head)

    in_specs = [
        pl.BlockSpec((1, T, N), lambda b: (b, 0, 0)),        # x (per batch)
        pl.BlockSpec((1, 1, k), lambda b: (b, 0, 0)),        # softmax(scale_weight)
        _full_spec((k, L_pad, L_pad)),                       # block-diag attn bias
        _full_spec((k, N, nd)), _full_spec((k, N, nd)),      # E1, E2
        _full_spec((k, (depth + 1) * N, N)),                 # mix_w
        _full_spec((k, 1, N)),                               # mix_b
        _full_spec((D, 3 * D)), _full_spec((1, 3 * D)),      # wqkv, bqkv
        _full_spec((D, D)), _full_spec((1, D)),              # wo, bo
        _full_spec((D, dff)), _full_spec((1, dff)),          # w1, b1
        _full_spec((dff, D)), _full_spec((1, D)),            # w2, b2
        _full_spec((6, D)),                                  # attention/grapher LN
        _full_spec((2, D)),                                  # model LayerNorm
    ]
    args = [x.astype(jnp.float32), sw_soft.astype(jnp.float32), bias_masks,
            blk["E1"], blk["E2"], blk["mix_w"], blk["mix_b"],
            att["wqkv"], att["bqkv"], att["wo"], att["bo"],
            att["w1"], att["b1"], att["w2"], att["b2"],
            blk["ln_pack"], params["mln_pack"]]

    if with_head:
        in_specs += [
            _full_spec((D, C)), _full_spec((1, C)),
            _full_spec((P, T)), _full_spec((P, 1)),
            pl.BlockSpec((1, 1, C), lambda b: (b, 0, 0)),
            pl.BlockSpec((1, 1, C), lambda b: (b, 0, 0)),
        ]
        args += [params["proj_w"], params["proj_b"],
                 params["s2p_wT"], params["s2p_b"],
                 stdev.astype(jnp.float32), means.astype(jnp.float32)]
        out_specs = (pl.BlockSpec((1, T, N), lambda b: (b, 0, 0)),
                     pl.BlockSpec((1, P, C), lambda b: (b, 0, 0)))
        out_shape = (jax.ShapeDtypeStruct((B, T, N), jnp.float32),
                     jax.ShapeDtypeStruct((B, P, C), jnp.float32))
    else:
        out_specs = pl.BlockSpec((1, T, N), lambda b: (b, 0, 0))
        out_shape = jax.ShapeDtypeStruct((B, T, N), jnp.float32)

    return pl.pallas_call(
        kernel, grid=(B,), in_specs=in_specs, out_specs=out_specs,
        out_shape=out_shape,
        compiler_params=pltpu.CompilerParams(dimension_semantics=("parallel",)),
    )(*args)


# ----------------------------------------------------------------------------
# FFT_for_Period — fully on device (no host sync); periods become attention
# masks instead of data-dependent reshape shapes.
# ----------------------------------------------------------------------------

def fft_for_period(x, k):
    T = x.shape[1]
    xf = jnp.fft.rfft(x.astype(jnp.float32), axis=1)
    amp = jnp.abs(xf)                                    # (B, T//2+1, N)
    freq = amp.mean(axis=0).mean(axis=-1)                # (T//2+1,)
    freq = freq.at[0].set(0.0)
    _, top = jax.lax.top_k(freq, k)                      # (k,) int32, descending
    scale_weight = amp.mean(axis=-1)[:, top]             # (B, k)
    # The torch reference would crash on top==0 (host divide by zero); clamp.
    period = T // jnp.maximum(top, 1)
    return period.astype(jnp.int32), scale_weight


def segment_attn_bias(period, l_pad):
    # Additive mask equivalent to reshape(B, length//scale, scale, N): queries
    # and keys interact only inside the same length-`scale` segment.  Padding
    # rows beyond the per-scale `length` land in their own segments, so they
    # never influence the first seq_len rows (exactly like the torch reshape).
    pos = jnp.arange(l_pad, dtype=jnp.int32)
    seg = pos[None, :] // jnp.maximum(period[:, None], 1)    # (k, l_pad)
    same = seg[:, :, None] == seg[:, None, :]
    return jnp.where(same, 0.0, -1e9).astype(jnp.float32)


# ----------------------------------------------------------------------------
# Model forward
# ----------------------------------------------------------------------------

def model_forward(params, cfg, x_enc, x_mark_enc, x_dec, x_mark_dec, mask=None):
    # non-stationary normalization (matches the torch forward)
    means = jnp.mean(x_enc, axis=1, keepdims=True)
    xn = x_enc - means
    stdev = jnp.sqrt(jnp.var(xn, axis=1, keepdims=True) + 1e-5)  # unbiased=False
    xn = xn / stdev

    enc = data_embedding(params["emb"], xn, x_mark_enc, cfg)      # (B, T, D)

    n_layers = len(params["blocks"])
    dec = None
    for li, blk in enumerate(params["blocks"]):
        period, scale_weight = fft_for_period(enc, cfg["top_k"])
        bias = segment_attn_bias(period, 2 * cfg["seq_len"])
        sw_soft = jax.nn.softmax(scale_weight, axis=1)[:, None, :]   # (B, 1, k)
        if li == n_layers - 1:
            enc, dec = grapher_layer_call(blk, params, enc, sw_soft, bias, cfg,
                                          with_head=True, stdev=stdev, means=means)
        else:
            enc = grapher_layer_call(blk, params, enc, sw_soft, bias, cfg)

    return dec[:, -cfg["pred_len"]:, :]


# ----------------------------------------------------------------------------
# Parameter initialization (deterministic, synthetic)
# ----------------------------------------------------------------------------

class _KeyGen:
    def __init__(self, key):
        self._key = key

    def __call__(self):
        self._key, sub = jax.random.split(self._key)
        return sub


def _sinusoidal_pe(max_len, d_model):
    pe = np.zeros((max_len, d_model), dtype=np.float32)
    position = np.arange(max_len, dtype=np.float32)[:, None]
    div = np.exp(np.arange(0, d_model, 2, dtype=np.float32)
                 * -(np.log(10000.0) / d_model))
    pe[:, 0::2] = np.sin(position * div)
    pe[:, 1::2] = np.cos(position * div)
    return pe


def init_params(key, cfg):
    kg = _KeyGen(key)
    std = 0.02
    D = cfg["c_dim"]
    Cin = cfg["enc_in"]
    dff = cfg["d_ff"]
    mark = cfg["mark_dim"]
    nd = cfg["node_dim"]
    depth = cfg["gcn_depth"]
    k = cfg["top_k"]

    def nrm(shape):
        return std * jax.random.normal(kg(), shape, jnp.float32)

    ones_row = jnp.ones((1, D), jnp.float32)
    zeros_row = jnp.zeros((1, D), jnp.float32)
    # rows: [ln1_g, ln1_b, ln2_g, ln2_b, grapher_norm_g, grapher_norm_b]
    ln_pack = jnp.concatenate([ones_row, zeros_row] * 3, axis=0)
    mln_pack = jnp.concatenate([ones_row, zeros_row], axis=0)

    def att_params():
        return dict(
            wqkv=nrm((D, 3 * D)), bqkv=jnp.zeros((1, 3 * D), jnp.float32),
            wo=nrm((D, D)), bo=jnp.zeros((1, D), jnp.float32),
            w1=nrm((D, dff)), b1=jnp.zeros((1, dff), jnp.float32),
            w2=nrm((dff, D)), b2=jnp.zeros((1, D), jnp.float32),
        )

    def block_params():
        return dict(att=att_params(), ln_pack=ln_pack,
                    E1=nrm((k, D, nd)), E2=nrm((k, D, nd)),
                    mix_w=nrm((k, (depth + 1) * D, D)),
                    mix_b=jnp.zeros((k, 1, D), jnp.float32))

    params = {
        "emb": dict(
            w_emb=nrm((3 * Cin + mark, D)),   # [conv_w(k=3 circular, unrolled); time_w]
            pos=jnp.asarray(_sinusoidal_pe(max(cfg["seq_len"], 64), D)),
        ),
        "blocks": [block_params() for _ in range(cfg["e_layers"])],
        "mln_pack": mln_pack,
        "proj_w": nrm((D, cfg["c_out"])),
        "proj_b": jnp.zeros((1, cfg["c_out"]), jnp.float32),
        "s2p_wT": nrm((cfg["pred_len"], cfg["seq_len"])),   # Linear(seq->pred), transposed
        "s2p_b": jnp.zeros((cfg["pred_len"], 1), jnp.float32),
    }
    return params


# ----------------------------------------------------------------------------
# Main
# ----------------------------------------------------------------------------

if __name__ == "__main__":
    cfg = dict(
        task_name="long_term_forecast",
        seq_len=16, label_len=8, pred_len=8,
        enc_in=4, c_out=4, c_dim=16, d_ff=32,
        n_heads=2, top_k=2, e_layers=1, dropout=0.1,
        embed="timeF", freq="h", mark_dim=4,
        node_dim=8, gcn_depth=2, propalpha=0.05,
        conv_channel=8, skip_channel=8, causal_ratio=0.5, in_channel=1,
    )

    key = jax.random.PRNGKey(0)
    k1, k2, k3, k4, kp = jax.random.split(key, 5)
    B = 2
    x_enc = jax.random.normal(k1, (B, cfg["seq_len"], cfg["enc_in"]), jnp.float32)
    x_mark_enc = jax.random.normal(k2, (B, cfg["seq_len"], cfg["mark_dim"]), jnp.float32)
    x_dec = jax.random.normal(k3, (B, cfg["label_len"] + cfg["pred_len"], cfg["enc_in"]),
                              jnp.float32)
    x_mark_dec = jax.random.normal(k4, (B, cfg["label_len"] + cfg["pred_len"],
                                        cfg["mark_dim"]), jnp.float32)

    params = init_params(kp, cfg)

    @jax.jit
    def forward(p, xe, xme, xd, xmd):
        return model_forward(p, cfg, xe, xme, xd, xmd)

    out = forward(params, x_enc, x_mark_enc, x_dec, x_mark_dec)
    out = jax.block_until_ready(out)
    assert out.shape == (B, cfg["pred_len"], cfg["c_out"]), out.shape
    assert bool(jnp.all(jnp.isfinite(out)))
    print("KERNEL_OK")
</pallas_src>

<mosaic_0001>
module attributes {stable_mosaic.version = 11 : i64} {
  func.func @_embed_kernel(%arg0: i32, %arg1: memref<1x16x16xf32, #tpu.memory_space<vmem>>, %arg2: memref<16x16xf32, #tpu.memory_space<vmem>>, %arg3: memref<16x16xf32, #tpu.memory_space<vmem>>, %arg4: memref<1x16x16xf32, #tpu.memory_space<vmem>>) attributes {dimension_semantics = [#tpu.dimension_semantics<parallel>], iteration_bounds = array<i64: 2>, scalar_prefetch = 0 : i64, scratch_operands = 0 : i64, tpu.core_type = #tpu.core_type<tc>, window_params = [{transform_indices = @transform_0, window_bounds = array<i64: 1, 16, 16>}, {pipeline_mode = #tpu.pipeline_mode<synchronous>, transform_indices = @transform_1, window_bounds = array<i64: 16, 16>}, {pipeline_mode = #tpu.pipeline_mode<synchronous>, transform_indices = @transform_2, window_bounds = array<i64: 16, 16>}, {transform_indices = @transform_3, window_bounds = array<i64: 1, 16, 16>}]} {
    %c0 = arith.constant 0 : index
    %c0_0 = arith.constant 0 : index
    %c0_1 = arith.constant 0 : index
    %0 = vector.load %arg1[%c0, %c0_0, %c0_1] : memref<1x16x16xf32, #tpu.memory_space<vmem>>, vector<1x16x16xf32>
    %1 = vector.shape_cast %0 : vector<1x16x16xf32> to vector<16x16xf32>
    %c0_2 = arith.constant 0 : index
    %c0_3 = arith.constant 0 : index
    %2 = vector.load %arg2[%c0_2, %c0_3] : memref<16x16xf32, #tpu.memory_space<vmem>>, vector<16x16xf32>
    %cst = arith.constant dense<0.000000e+00> : vector<16x16xf32>
    %3 = tpu.matmul %1, %2, %cst {dimension_numbers = #tpu.dot_dimension_numbers<[1], [0], [0], [1], [0, 0, 1, 1], [], []>} : vector<16x16xf32>, vector<16x16xf32>, vector<16x16xf32> -> vector<16x16xf32>
    %c0_4 = arith.constant 0 : index
    %c0_5 = arith.constant 0 : index
    %4 = vector.load %arg3[%c0_4, %c0_5] : memref<16x16xf32, #tpu.memory_space<vmem>>, vector<16x16xf32>
    %5 = arith.addf %3, %4 : vector<16x16xf32>
    %c0_6 = arith.constant 0 : index
    %c0_7 = arith.constant 0 : index
    %c0_8 = arith.constant 0 : index
    %6 = vector.load %arg4[%c0_6, %c0_7, %c0_8] : memref<1x16x16xf32, #tpu.memory_space<vmem>>, vector<1x16x16xf32>
    %7 = vector.shape_cast %6 : vector<1x16x16xf32> to vector<16x16xf32>
    %8 = vector.shape_cast %5 : vector<16x16xf32> to vector<1x16x16xf32>
    tpu.vector_store %arg4[%c0_6, %c0_7, %c0_8], %8 {strides = array<i32>} : memref<1x16x16xf32, #tpu.memory_space<vmem>>, vector<1x16x16xf32>,
    return
  }
  func.func @transform_0(%arg0: i32) -> (i32, i32, i32) {
    %c0_i32 = arith.constant 0 : i32
    %c0_i32_0 = arith.constant 0 : i32
    %c0_i32_1 = arith.constant 0 : i32
    return %arg0, %c0_i32, %c0_i32_0 : i32, i32, i32
  }
  func.func @transform_1(%arg0: i32) -> (i32, i32) {
    %c0_i32 = arith.constant 0 : i32
    %c0_i32_0 = arith.constant 0 : i32
    %c0_i32_1 = arith.constant 0 : i32
    return %c0_i32, %c0_i32_0 : i32, i32
  }
  func.func @transform_2(%arg0: i32) -> (i32, i32) {
    %c0_i32 = arith.constant 0 : i32
    %c0_i32_0 = arith.constant 0 : i32
    %c0_i32_1 = arith.constant 0 : i32
    return %c0_i32, %c0_i32_0 : i32, i32
  }
  func.func @transform_3(%arg0: i32) -> (i32, i32, i32) {
    %c0_i32 = arith.constant 0 : i32
    %c0_i32_0 = arith.constant 0 : i32
    %c0_i32_1 = arith.constant 0 : i32
    return %arg0, %c0_i32, %c0_i32_0 : i32, i32, i32
  }
}

module attributes {stable_mosaic.version = 11 : i64} {
  func.func @_grapher_layer_kernel(%arg0: i32, %arg1: memref<1x16x16xf32, #tpu.memory_space<vmem>>, %arg2: memref<1x1x2xf32, #tpu.memory_space<vmem>>, %arg3: memref<2x32x32xf32, #tpu.memory_space<vmem>>, %arg4: memref<2x16x8xf32, #tpu.memory_space<vmem>>, %arg5: memref<2x16x8xf32, #tpu.memory_space<vmem>>, %arg6: memref<2x48x16xf32, #tpu.memory_space<vmem>>, %arg7: memref<2x1x16xf32, #tpu.memory_space<vmem>>, %arg8: memref<16x48xf32, #tpu.memory_space<vmem>>, %arg9: memref<1x48xf32, #tpu.memory_space<vmem>>, %arg10: memref<16x16xf32, #tpu.memory_space<vmem>>, %arg11: memref<1x16xf32, #tpu.memory_space<vmem>>, %arg12: memref<16x32xf32, #tpu.memory_space<vmem>>, %arg13: memref<1x32xf32, #tpu.memory_space<vmem>>, %arg14: memref<32x16xf32, #tpu.memory_space<vmem>>, %arg15: memref<1x16xf32, #tpu.memory_space<vmem>>, %arg16: memref<6x16xf32, #tpu.memory_space<vmem>>, %arg17: memref<2x16xf32, #tpu.memory_space<vmem>>, %arg18: memref<16x4xf32, #tpu.memory_space<vmem>>, %arg19: memref<1x4xf32, #tpu.memory_space<vmem>>, %arg20: memref<8x16xf32, #tpu.memory_space<vmem>>, %arg21: memref<8x1xf32, #tpu.memory_space<vmem>>, %arg22: memref<1x1x4xf32, #tpu.memory_space<vmem>>, %arg23: memref<1x1x4xf32, #tpu.memory_space<vmem>>, %arg24: memref<1x16x16xf32, #tpu.memory_space<vmem>>, %arg25: memref<1x8x4xf32, #tpu.memory_space<vmem>>) attributes {dimension_semantics = [#tpu.dimension_semantics<parallel>], iteration_bounds = array<i64: 2>, scalar_prefetch = 0 : i64, scratch_operands = 0 : i64, tpu.core_type = #tpu.core_type<tc>, window_params = [{transform_indices = @transform_0, window_bounds = array<i64: 1, 16, 16>}, {transform_indices = @transform_1, window_bounds = array<i64: 1, 1, 2>}, {pipeline_mode = #tpu.pipeline_mode<synchronous>, transform_indices = @transform_2, window_bounds = array<i64: 2, 32, 32>}, {pipeline_mode = #tpu.pipeline_mode<synchronous>, transform_indices = @transform_3, window_bounds = array<i64: 2, 16, 8>}, {pipeline_mode = #tpu.pipeline_mode<synchronous>, transform_indices = @transform_4, window_bounds = array<i64: 2, 16, 8>}, {pipeline_mode = #tpu.pipeline_mode<synchronous>, transform_indices = @transform_5, window_bounds = array<i64: 2, 48, 16>}, {pipeline_mode = #tpu.pipeline_mode<synchronous>, transform_indices = @transform_6, window_bounds = array<i64: 2, 1, 16>}, {pipeline_mode = #tpu.pipeline_mode<synchronous>, transform_indices = @transform_7, window_bounds = array<i64: 16, 48>}, {pipeline_mode = #tpu.pipeline_mode<synchronous>, transform_indices = @transform_8, window_bounds = array<i64: 1, 48>}, {pipeline_mode = #tpu.pipeline_mode<synchronous>, transform_indices = @transform_9, window_bounds = array<i64: 16, 16>}, {pipeline_mode = #tpu.pipeline_mode<synchronous>, transform_indices = @transform_10, window_bounds = array<i64: 1, 16>}, {pipeline_mode = #tpu.pipeline_mode<synchronous>, transform_indices = @transform_11, window_bounds = array<i64: 16, 32>}, {pipeline_mode = #tpu.pipeline_mode<synchronous>, transform_indices = @transform_12, window_bounds = array<i64: 1, 32>}, {pipeline_mode = #tpu.pipeline_mode<synchronous>, transform_indices = @transform_13, window_bounds = array<i64: 32, 16>}, {pipeline_mode = #tpu.pipeline_mode<synchronous>, transform_indices = @transform_14, window_bounds = array<i64: 1, 16>}, {pipeline_mode = #tpu.pipeline_mode<synchronous>, transform_indices = @transform_15, window_bounds = array<i64: 6, 16>}, {pipeline_mode = #tpu.pipeline_mode<synchronous>, transform_indices = @transform_16, window_bounds = array<i64: 2, 16>}, {pipeline_mode = #tpu.pipeline_mode<synchronous>, transform_indices = @transform_17, window_bounds = array<i64: 16, 4>}, {pipeline_mode = #tpu.pipeline_mode<synchronous>, transform_indices = @transform_18, window_bounds = array<i64: 1, 4>}, {pipeline_mode = #tpu.pipeline_mode<synchronous>, transform_indices = @transform_19, window_bounds = array<i64: 8, 16>}, {pipeline_mode = #tpu.pipeline_mode<synchronous>, transform_indices = @transform_20, window_bounds = array<i64: 8, 1>}, {transform_indices = @transform_21, window_bounds = array<i64: 1, 1, 4>}, {transform_indices = @transform_22, window_bounds = array<i64: 1, 1, 4>}, {transform_indices = @transform_23, window_bounds = array<i64: 1, 16, 16>}, {transform_indices = @transform_24, window_bounds = array<i64: 1, 8, 4>}]} {
    %c0 = arith.constant 0 : index
    %c0_0 = arith.constant 0 : index
    %c0_1 = arith.constant 0 : index
    %0 = vector.load %arg1[%c0, %c0_0, %c0_1] : memref<1x16x16xf32, #tpu.memory_space<vmem>>, vector<1x16x16xf32>
    %1 = vector.shape_cast %0 : vector<1x16x16xf32> to vector<16x16xf32>
    %c0_2 = arith.constant 0 : index
    %c0_3 = arith.constant 0 : index
    %c0_4 = arith.constant 0 : index
    %2 = vector.load %arg2[%c0_2, %c0_3, %c0_4] : memref<1x1x2xf32, #tpu.memory_space<vmem>>, vector<1x1x2xf32>
    %3 = vector.shape_cast %2 : vector<1x1x2xf32> to vector<1x2xf32>
    %c0_5 = arith.constant 0 : index
    %c0_6 = arith.constant 0 : index
    %4 = vector.load %arg16[%c0_5, %c0_6] : memref<6x16xf32, #tpu.memory_space<vmem>>, vector<6x16xf32>
    %cst = arith.constant 0.000000e+00 : f32
    %5 = vector.broadcast %cst : f32 to vector<16x16xf32>
    %c0_7 = arith.constant 0 : index
    %c0_8 = arith.constant 0 : index
    %c0_9 = arith.constant 0 : index
    %6 = vector.load %arg4[%c0_7, %c0_8, %c0_9] : memref<2x16x8xf32, #tpu.memory_space<vmem>>, vector<1x16x8xf32>
    %7 = vector.shape_cast %6 : vector<1x16x8xf32> to vector<16x8xf32>
    %c0_10 = arith.constant 0 : index
    %c0_11 = arith.constant 0 : index
    %c0_12 = arith.constant 0 : index
    %8 = vector.load %arg5[%c0_10, %c0_11, %c0_12] : memref<2x16x8xf32, #tpu.memory_space<vmem>>, vector<1x16x8xf32>
    %9 = vector.shape_cast %8 : vector<1x16x8xf32> to vector<16x8xf32>
    %cst_13 = arith.constant dense<0.000000e+00> : vector<16x16xf32>
    %10 = tpu.matmul %7, %9, %cst_13 {dimension_numbers = #tpu.dot_dimension_numbers<[1], [1], [0], [0], [0, 0, 1, 0], [], []>} : vector<16x8xf32>, vector<16x8xf32>, vector<16x16xf32> -> vector<16x16xf32>
    %cst_14 = arith.constant 3.000000e+00 : f32
    %11 = vector.broadcast %cst_14 : f32 to vector<16x16xf32>
    %12 = arith.mulf %11, %10 : vector<16x16xf32>
    %13 = math.tanh %12 : vector<16x16xf32>
    %cst_15 = arith.constant 0.000000e+00 : f32
    %14 = vector.broadcast %cst_15 : f32 to vector<16x16xf32>
    %15 = arith.maximumf %13, %14 : vector<16x16xf32>
    %cst_16 = arith.constant dense<0xFF800000> : vector<16xf32>
    %16 = vector.multi_reduction <maximumf>, %15, %cst_16 [1] : vector<16x16xf32> to vector<16xf32>
    %17 = vector.shape_cast %16 : vector<16xf32> to vector<16x1xf32>
    %18 = vector.broadcast %17 : vector<16x1xf32> to vector<16x16xf32>
    %19 = arith.subf %15, %18 : vector<16x16xf32>
    %20 = math.exp %19 : vector<16x16xf32>
    %cst_17 = arith.constant dense<0.000000e+00> : vector<16xf32>
    %21 = vector.multi_reduction <add>, %20, %cst_17 [1] : vector<16x16xf32> to vector<16xf32>
    %22 = vector.shape_cast %21 : vector<16xf32> to vector<16x1xf32>
    %23 = vector.broadcast %22 : vector<16x1xf32> to vector<16x16xf32>
    %24 = arith.divf %20, %23 : vector<16x16xf32>
    %c0_18 = arith.constant 0 : index
    %c0_19 = arith.constant 0 : index
    %c0_20 = arith.constant 0 : index
    %25 = vector.load %arg6[%c0_18, %c0_19, %c0_20] : memref<2x48x16xf32, #tpu.memory_space<vmem>>, vector<1x48x16xf32>
    %26 = vector.shape_cast %25 : vector<1x48x16xf32> to vector<48x16xf32>
    %27 = vector.extract_strided_slice %26 {offsets = [0, 0], sizes = [16, 16], strides = [1, 1]} : vector<48x16xf32> to vector<16x16xf32>
    %cst_21 = arith.constant dense<0.000000e+00> : vector<16x16xf32>
    %28 = tpu.matmul %1, %27, %cst_21 {dimension_numbers = #tpu.dot_dimension_numbers<[1], [0], [0], [1], [0, 0, 1, 1], [], []>} : vector<16x16xf32>, vector<16x16xf32>, vector<16x16xf32> -> vector<16x16xf32>
    %cst_22 = arith.constant 5.000000e-02 : f32
    %29 = vector.broadcast %cst_22 : f32 to vector<16x16xf32>
    %30 = arith.mulf %29, %1 : vector<16x16xf32>
    %cst_23 = arith.constant dense<0.000000e+00> : vector<16x16xf32>
    %31 = tpu.matmul %1, %24, %cst_23 {dimension_numbers = #tpu.dot_dimension_numbers<[1], [1], [0], [0], [0, 0, 1, 0], [], []>} : vector<16x16xf32>, vector<16x16xf32>, vector<16x16xf32> -> vector<16x16xf32>
    %cst_24 = arith.constant 0.949999988 : f32
    %32 = vector.broadcast %cst_24 : f32 to vector<16x16xf32>
    %33 = arith.mulf %32, %31 : vector<16x16xf32>
    %34 = arith.addf %30, %33 : vector<16x16xf32>
    %35 = vector.extract_strided_slice %26 {offsets = [16, 0], sizes = [16, 16], strides = [1, 1]} : vector<48x16xf32> to vector<16x16xf32>
    %cst_25 = arith.constant dense<0.000000e+00> : vector<16x16xf32>
    %36 = tpu.matmul %34, %35, %cst_25 {dimension_numbers = #tpu.dot_dimension_numbers<[1], [0], [0], [1], [0, 0, 1, 1], [], []>} : vector<16x16xf32>, vector<16x16xf32>, vector<16x16xf32> -> vector<16x16xf32>
    %37 = arith.addf %28, %36 : vector<16x16xf32>
    %cst_26 = arith.constant 5.000000e-02 : f32
    %38 = vector.broadcast %cst_26 : f32 to vector<16x16xf32>
    %39 = arith.mulf %38, %1 : vector<16x16xf32>
    %cst_27 = arith.constant dense<0.000000e+00> : vector<16x16xf32>
    %40 = tpu.matmul %34, %24, %cst_27 {dimension_numbers = #tpu.dot_dimension_numbers<[1], [1], [0], [0], [0, 0, 1, 0], [], []>} : vector<16x16xf32>, vector<16x16xf32>, vector<16x16xf32> -> vector<16x16xf32>
    %cst_28 = arith.constant 0.949999988 : f32
    %41 = vector.broadcast %cst_28 : f32 to vector<16x16xf32>
    %42 = arith.mulf %41, %40 : vector<16x16xf32>
    %43 = arith.addf %39, %42 : vector<16x16xf32>
    %44 = vector.extract_strided_slice %26 {offsets = [32, 0], sizes = [16, 16], strides = [1, 1]} : vector<48x16xf32> to vector<16x16xf32>
    %cst_29 = arith.constant dense<0.000000e+00> : vector<16x16xf32>
    %45 = tpu.matmul %43, %44, %cst_29 {dimension_numbers = #tpu.dot_dimension_numbers<[1], [0], [0], [1], [0, 0, 1, 1], [], []>} : vector<16x16xf32>, vector<16x16xf32>, vector<16x16xf32> -> vector<16x16xf32>
    %46 = arith.addf %37, %45 : vector<16x16xf32>
    %c0_30 = arith.constant 0 : index
    %c0_31 = arith.constant 0 : index
    %c0_32 = arith.constant 0 : index
    %47 = vector.load %arg7[%c0_30, %c0_31, %c0_32] : memref<2x1x16xf32, #tpu.memory_space<vmem>>, vector<1x1x16xf32>
    %48 = vector.shape_cast %47 : vector<1x1x16xf32> to vector<1x16xf32>
    %49 = vector.broadcast %48 : vector<1x16xf32> to vector<16x16xf32>
    %50 = arith.addf %46, %49 : vector<16x16xf32>
    %cst_33 = arith.constant 0.000000e+00 : f32
    %51 = vector.broadcast %cst_33 : f32 to vector<16x16xf32>
    %52 = tpu.concatenate %50, %51 in 0 : vector<16x16xf32>, vector<16x16xf32> -> vector<32x16xf32>
    %c0_34 = arith.constant 0 : index
    %c0_35 = arith.constant 0 : index
    %c0_36 = arith.constant 0 : index
    %53 = vector.load %arg3[%c0_34, %c0_35, %c0_36] : memref<2x32x32xf32, #tpu.memory_space<vmem>>, vector<1x32x32xf32>
    %54 = vector.shape_cast %53 : vector<1x32x32xf32> to vector<32x32xf32>
    %c0_37 = arith.constant 0 : index
    %c0_38 = arith.constant 0 : index
    %55 = vector.load %arg8[%c0_37, %c0_38] : memref<16x48xf32, #tpu.memory_space<vmem>>, vector<16x48xf32>
    %cst_39 = arith.constant dense<0.000000e+00> : vector<32x48xf32>
    %56 = tpu.matmul %52, %55, %cst_39 {dimension_numbers = #tpu.dot_dimension_numbers<[1], [0], [0], [1], [0, 0, 1, 1], [], []>} : vector<32x16xf32>, vector<16x48xf32>, vector<32x48xf32> -> vector<32x48xf32>
    %c0_40 = arith.constant 0 : index
    %c0_41 = arith.constant 0 : index
    %57 = vector.load %arg9[%c0_40, %c0_41] : memref<1x48xf32, #tpu.memory_space<vmem>>, vector<1x48xf32>
    %58 = vector.broadcast %57 : vector<1x48xf32> to vector<32x48xf32>
    %59 = arith.addf %56, %58 : vector<32x48xf32>
    %cst_42 = arith.constant 0.000000e+00 : f32
    %60 = vector.broadcast %cst_42 : f32 to vector<32x16xf32>
    %61 = vector.extract_strided_slice %59 {offsets = [0, 0], sizes = [32, 8], strides = [1, 1]} : vector<32x48xf32> to vector<32x8xf32>
    %cst_43 = arith.constant 0.353553385 : f32
    %62 = vector.broadcast %cst_43 : f32 to vector<32x8xf32>
    %63 = arith.mulf %61, %62 : vector<32x8xf32>
    %64 = vector.extract_strided_slice %59 {offsets = [0, 16], sizes = [32, 8], strides = [1, 1]} : vector<32x48xf32> to vector<32x8xf32>
    %65 = vector.extract_strided_slice %59 {offsets = [0, 32], sizes = [32, 8], strides = [1, 1]} : vector<32x48xf32> to vector<32x8xf32>
    %cst_44 = arith.constant dense<0.000000e+00> : vector<32x32xf32>
    %66 = tpu.matmul %63, %64, %cst_44 {dimension_numbers = #tpu.dot_dimension_numbers<[1], [1], [0], [0], [0, 0, 1, 0], [], []>} : vector<32x8xf32>, vector<32x8xf32>, vector<32x32xf32> -> vector<32x32xf32>
    %67 = arith.addf %66, %54 : vector<32x32xf32>
    %cst_45 = arith.constant dense<0xFF800000> : vector<32xf32>
    %68 = vector.multi_reduction <maximumf>, %67, %cst_45 [1] : vector<32x32xf32> to vector<32xf32>
    %69 = vector.shape_cast %68 : vector<32xf32> to vector<32x1xf32>
    %70 = vector.broadcast %69 : vector<32x1xf32> to vector<32x32xf32>
    %71 = arith.subf %67, %70 : vector<32x32xf32>
    %72 = math.exp %71 : vector<32x32xf32>
    %cst_46 = arith.constant dense<0.000000e+00> : vector<32xf32>
    %73 = vector.multi_reduction <add>, %72, %cst_46 [1] : vector<32x32xf32> to vector<32xf32>
    %74 = vector.shape_cast %73 : vector<32xf32> to vector<32x1xf32>
    %75 = vector.broadcast %74 : vector<32x1xf32> to vector<32x32xf32>
    %76 = arith.divf %72, %75 : vector<32x32xf32>
    %cst_47 = arith.constant dense<0.000000e+00> : vector<32x8xf32>
    %77 = tpu.matmul %76, %65, %cst_47 {dimension_numbers = #tpu.dot_dimension_numbers<[1], [0], [0], [1], [0, 0, 1, 1], [], []>} : vector<32x32xf32>, vector<32x8xf32>, vector<32x8xf32> -> vector<32x8xf32>
    %c0_48 = arith.constant 0 : index
    %c0_49 = arith.constant 0 : index
    %78 = vector.load %arg10[%c0_48, %c0_49] : memref<16x16xf32, #tpu.memory_space<vmem>>, vector<8x16xf32>
    %cst_50 = arith.constant dense<0.000000e+00> : vector<32x16xf32>
    %79 = tpu.matmul %77, %78, %cst_50 {dimension_numbers = #tpu.dot_dimension_numbers<[1], [0], [0], [1], [0, 0, 1, 1], [], []>} : vector<32x8xf32>, vector<8x16xf32>, vector<32x16xf32> -> vector<32x16xf32>
    %80 = arith.addf %60, %79 : vector<32x16xf32>
    %81 = vector.extract_strided_slice %59 {offsets = [0, 8], sizes = [32, 8], strides = [1, 1]} : vector<32x48xf32> to vector<32x8xf32>
    %cst_51 = arith.constant 0.353553385 : f32
    %82 = vector.broadcast %cst_51 : f32 to vector<32x8xf32>
    %83 = arith.mulf %81, %82 : vector<32x8xf32>
    %84 = vector.extract_strided_slice %59 {offsets = [0, 24], sizes = [32, 8], strides = [1, 1]} : vector<32x48xf32> to vector<32x8xf32>
    %85 = vector.extract_strided_slice %59 {offsets = [0, 40], sizes = [32, 8], strides = [1, 1]} : vector<32x48xf32> to vector<32x8xf32>
    %cst_52 = arith.constant dense<0.000000e+00> : vector<32x32xf32>
    %86 = tpu.matmul %83, %84, %cst_52 {dimension_numbers = #tpu.dot_dimension_numbers<[1], [1], [0], [0], [0, 0, 1, 0], [], []>} : vector<32x8xf32>, vector<32x8xf32>, vector<32x32xf32> -> vector<32x32xf32>
    %87 = arith.addf %86, %54 : vector<32x32xf32>
    %cst_53 = arith.constant dense<0xFF800000> : vector<32xf32>
    %88 = vector.multi_reduction <maximumf>, %87, %cst_53 [1] : vector<32x32xf32> to vector<32xf32>
    %89 = vector.shape_cast %88 : vector<32xf32> to vector<32x1xf32>
    %90 = vector.broadcast %89 : vector<32x1xf32> to vector<32x32xf32>
    %91 = arith.subf %87, %90 : vector<32x32xf32>
    %92 = math.exp %91 : vector<32x32xf32>
    %cst_54 = arith.constant dense<0.000000e+00> : vector<32xf32>
    %93 = vector.multi_reduction <add>, %92, %cst_54 [1] : vector<32x32xf32> to vector<32xf32>
    %94 = vector.shape_cast %93 : vector<32xf32> to vector<32x1xf32>
    %95 = vector.broadcast %94 : vector<32x1xf32> to vector<32x32xf32>
    %96 = arith.divf %92, %95 : vector<32x32xf32>
    %cst_55 = arith.constant dense<0.000000e+00> : vector<32x8xf32>
    %97 = tpu.matmul %96, %85, %cst_55 {dimension_numbers = #tpu.dot_dimension_numbers<[1], [0], [0], [1], [0, 0, 1, 1], [], []>} : vector<32x32xf32>, vector<32x8xf32>, vector<32x8xf32> -> vector<32x8xf32>
    %c8 = arith.constant 8 : index
    %c0_56 = arith.constant 0 : index
    %98 = vector.load %arg10[%c8, %c0_56] : memref<16x16xf32, #tpu.memory_space<vmem>>, vector<8x16xf32>
    %cst_57 = arith.constant dense<0.000000e+00> : vector<32x16xf32>
    %99 = tpu.matmul %97, %98, %cst_57 {dimension_numbers = #tpu.dot_dimension_numbers<[1], [0], [0], [1], [0, 0, 1, 1], [], []>} : vector<32x8xf32>, vector<8x16xf32>, vector<32x16xf32> -> vector<32x16xf32>
    %100 = arith.addf %80, %99 : vector<32x16xf32>
    %c0_58 = arith.constant 0 : index
    %c0_59 = arith.constant 0 : index
    %101 = vector.load %arg11[%c0_58, %c0_59] : memref<1x16xf32, #tpu.memory_space<vmem>>, vector<1x16xf32>
    %102 = vector.broadcast %101 : vector<1x16xf32> to vector<32x16xf32>
    %103 = arith.addf %100, %102 : vector<32x16xf32>
    %104 = arith.addf %52, %103 : vector<32x16xf32>
    %105 = vector.extract_strided_slice %4 {offsets = [0, 0], sizes = [1, 16], strides = [1, 1]} : vector<6x16xf32> to vector<1x16xf32>
    %106 = vector.extract_strided_slice %4 {offsets = [1, 0], sizes = [1, 16], strides = [1, 1]} : vector<6x16xf32> to vector<1x16xf32>
    %cst_60 = arith.constant dense<0.000000e+00> : vector<32xf32>
    %107 = vector.multi_reduction <add>, %104, %cst_60 [1] : vector<32x16xf32> to vector<32xf32>
    %108 = vector.shape_cast %107 : vector<32xf32> to vector<32x1xf32>
    %cst_61 = arith.constant 1.600000e+01 : f32
    %109 = vector.broadcast %cst_61 : f32 to vector<32x1xf32>
    %110 = arith.divf %108, %109 : vector<32x1xf32>
    %111 = vector.broadcast %110 : vector<32x1xf32> to vector<32x16xf32>
    %112 = arith.subf %104, %111 : vector<32x16xf32>
    %113 = arith.mulf %112, %112 : vector<32x16xf32>
    %cst_62 = arith.constant dense<0.000000e+00> : vector<32xf32>
    %114 = vector.multi_reduction <add>, %113, %cst_62 [1] : vector<32x16xf32> to vector<32xf32>
    %115 = vector.shape_cast %114 : vector<32xf32> to vector<32x1xf32>
    %cst_63 = arith.constant 1.600000e+01 : f32
    %116 = vector.broadcast %cst_63 : f32 to vector<32x1xf32>
    %117 = arith.divf %115, %116 : vector<32x1xf32>
    %cst_64 = arith.constant 9.99999974E-6 : f32
    %118 = vector.broadcast %cst_64 : f32 to vector<32x1xf32>
    %119 = arith.addf %117, %118 : vector<32x1xf32>
    %120 = math.rsqrt %119 : vector<32x1xf32>
    %121 = vector.broadcast %120 : vector<32x1xf32> to vector<32x16xf32>
    %122 = arith.mulf %112, %121 : vector<32x16xf32>
    %123 = vector.broadcast %105 : vector<1x16xf32> to vector<32x16xf32>
    %124 = arith.mulf %122, %123 : vector<32x16xf32>
    %125 = vector.broadcast %106 : vector<1x16xf32> to vector<32x16xf32>
    %126 = arith.addf %124, %125 : vector<32x16xf32>
    %c0_65 = arith.constant 0 : index
    %c0_66 = arith.constant 0 : index
    %127 = vector.load %arg12[%c0_65, %c0_66] : memref<16x32xf32, #tpu.memory_space<vmem>>, vector<16x32xf32>
    %cst_67 = arith.constant dense<0.000000e+00> : vector<32x32xf32>
    %128 = tpu.matmul %126, %127, %cst_67 {dimension_numbers = #tpu.dot_dimension_numbers<[1], [0], [0], [1], [0, 0, 1, 1], [], []>} : vector<32x16xf32>, vector<16x32xf32>, vector<32x32xf32> -> vector<32x32xf32>
    %c0_68 = arith.constant 0 : index
    %c0_69 = arith.constant 0 : index
    %129 = vector.load %arg13[%c0_68, %c0_69] : memref<1x32xf32, #tpu.memory_space<vmem>>, vector<1x32xf32>
    %130 = vector.broadcast %129 : vector<1x32xf32> to vector<32x32xf32>
    %131 = arith.addf %128, %130 : vector<32x32xf32>
    %cst_70 = arith.constant 5.000000e-01 : f32
    %132 = vector.broadcast %cst_70 : f32 to vector<32x32xf32>
    %133 = arith.mulf %132, %131 : vector<32x32xf32>
    %cst_71 = arith.constant 4.471500e-02 : f32
    %134 = vector.broadcast %cst_71 : f32 to vector<32x32xf32>
    %135 = arith.mulf %134, %131 : vector<32x32xf32>
    %136 = arith.mulf %135, %131 : vector<32x32xf32>
    %137 = arith.mulf %136, %131 : vector<32x32xf32>
    %138 = arith.addf %131, %137 : vector<32x32xf32>
    %cst_72 = arith.constant 0.797884583 : f32
    %139 = vector.broadcast %cst_72 : f32 to vector<32x32xf32>
    %140 = arith.mulf %139, %138 : vector<32x32xf32>
    %141 = math.tanh %140 : vector<32x32xf32>
    %cst_73 = arith.constant 1.000000e+00 : f32
    %142 = vector.broadcast %cst_73 : f32 to vector<32x32xf32>
    %143 = arith.addf %142, %141 : vector<32x32xf32>
    %144 = arith.mulf %133, %143 : vector<32x32xf32>
    %c0_74 = arith.constant 0 : index
    %c0_75 = arith.constant 0 : index
    %145 = vector.load %arg14[%c0_74, %c0_75] : memref<32x16xf32, #tpu.memory_space<vmem>>, vector<32x16xf32>
    %cst_76 = arith.constant dense<0.000000e+00> : vector<32x16xf32>
    %146 = tpu.matmul %144, %145, %cst_76 {dimension_numbers = #tpu.dot_dimension_numbers<[1], [0], [0], [1], [0, 0, 1, 1], [], []>} : vector<32x32xf32>, vector<32x16xf32>, vector<32x16xf32> -> vector<32x16xf32>
    %c0_77 = arith.constant 0 : index
    %c0_78 = arith.constant 0 : index
    %147 = vector.load %arg15[%c0_77, %c0_78] : memref<1x16xf32, #tpu.memory_space<vmem>>, vector<1x16xf32>
    %148 = vector.broadcast %147 : vector<1x16xf32> to vector<32x16xf32>
    %149 = arith.addf %146, %148 : vector<32x16xf32>
    %150 = arith.addf %126, %149 : vector<32x16xf32>
    %151 = vector.extract_strided_slice %4 {offsets = [2, 0], sizes = [1, 16], strides = [1, 1]} : vector<6x16xf32> to vector<1x16xf32>
    %152 = vector.extract_strided_slice %4 {offsets = [3, 0], sizes = [1, 16], strides = [1, 1]} : vector<6x16xf32> to vector<1x16xf32>
    %cst_79 = arith.constant dense<0.000000e+00> : vector<32xf32>
    %153 = vector.multi_reduction <add>, %150, %cst_79 [1] : vector<32x16xf32> to vector<32xf32>
    %154 = vector.shape_cast %153 : vector<32xf32> to vector<32x1xf32>
    %cst_80 = arith.constant 1.600000e+01 : f32
    %155 = vector.broadcast %cst_80 : f32 to vector<32x1xf32>
    %156 = arith.divf %154, %155 : vector<32x1xf32>
    %157 = vector.broadcast %156 : vector<32x1xf32> to vector<32x16xf32>
    %158 = arith.subf %150, %157 : vector<32x16xf32>
    %159 = arith.mulf %158, %158 : vector<32x16xf32>
    %cst_81 = arith.constant dense<0.000000e+00> : vector<32xf32>
    %160 = vector.multi_reduction <add>, %159, %cst_81 [1] : vector<32x16xf32> to vector<32xf32>
    %161 = vector.shape_cast %160 : vector<32xf32> to vector<32x1xf32>
    %cst_82 = arith.constant 1.600000e+01 : f32
    %162 = vector.broadcast %cst_82 : f32 to vector<32x1xf32>
    %163 = arith.divf %161, %162 : vector<32x1xf32>
    %cst_83 = arith.constant 9.99999974E-6 : f32
    %164 = vector.broadcast %cst_83 : f32 to vector<32x1xf32>
    %165 = arith.addf %163, %164 : vector<32x1xf32>
    %166 = math.rsqrt %165 : vector<32x1xf32>
    %167 = vector.broadcast %166 : vector<32x1xf32> to vector<32x16xf32>
    %168 = arith.mulf %158, %167 : vector<32x16xf32>
    %169 = vector.broadcast %151 : vector<1x16xf32> to vector<32x16xf32>
    %170 = arith.mulf %168, %169 : vector<32x16xf32>
    %171 = vector.broadcast %152 : vector<1x16xf32> to vector<32x16xf32>
    %172 = arith.addf %170, %171 : vector<32x16xf32>
    %173 = vector.extract_strided_slice %4 {offsets = [4, 0], sizes = [1, 16], strides = [1, 1]} : vector<6x16xf32> to vector<1x16xf32>
    %174 = vector.extract_strided_slice %4 {offsets = [5, 0], sizes = [1, 16], strides = [1, 1]} : vector<6x16xf32> to vector<1x16xf32>
    %cst_84 = arith.constant dense<0.000000e+00> : vector<32xf32>
    %175 = vector.multi_reduction <add>, %172, %cst_84 [1] : vector<32x16xf32> to vector<32xf32>
    %176 = vector.shape_cast %175 : vector<32xf32> to vector<32x1xf32>
    %cst_85 = arith.constant 1.600000e+01 : f32
    %177 = vector.broadcast %cst_85 : f32 to vector<32x1xf32>
    %178 = arith.divf %176, %177 : vector<32x1xf32>
    %179 = vector.broadcast %178 : vector<32x1xf32> to vector<32x16xf32>
    %180 = arith.subf %172, %179 : vector<32x16xf32>
    %181 = arith.mulf %180, %180 : vector<32x16xf32>
    %cst_86 = arith.constant dense<0.000000e+00> : vector<32xf32>
    %182 = vector.multi_reduction <add>, %181, %cst_86 [1] : vector<32x16xf32> to vector<32xf32>
    %183 = vector.shape_cast %182 : vector<32xf32> to vector<32x1xf32>
    %cst_87 = arith.constant 1.600000e+01 : f32
    %184 = vector.broadcast %cst_87 : f32 to vector<32x1xf32>
    %185 = arith.divf %183, %184 : vector<32x1xf32>
    %cst_88 = arith.constant 9.99999974E-6 : f32
    %186 = vector.broadcast %cst_88 : f32 to vector<32x1xf32>
    %187 = arith.addf %185, %186 : vector<32x1xf32>
    %188 = math.rsqrt %187 : vector<32x1xf32>
    %189 = vector.broadcast %188 : vector<32x1xf32> to vector<32x16xf32>
    %190 = arith.mulf %180, %189 : vector<32x16xf32>
    %191 = vector.broadcast %173 : vector<1x16xf32> to vector<32x16xf32>
    %192 = arith.mulf %190, %191 : vector<32x16xf32>
    %193 = vector.broadcast %174 : vector<1x16xf32> to vector<32x16xf32>
    %194 = arith.addf %192, %193 : vector<32x16xf32>
    %cst_89 = arith.constant 5.000000e-01 : f32
    %195 = vector.broadcast %cst_89 : f32 to vector<32x16xf32>
    %196 = arith.mulf %195, %194 : vector<32x16xf32>
    %cst_90 = arith.constant 4.471500e-02 : f32
    %197 = vector.broadcast %cst_90 : f32 to vector<32x16xf32>
    %198 = arith.mulf %197, %194 : vector<32x16xf32>
    %199 = arith.mulf %198, %194 : vector<32x16xf32>
    %200 = arith.mulf %199, %194 : vector<32x16xf32>
    %201 = arith.addf %194, %200 : vector<32x16xf32>
    %cst_91 = arith.constant 0.797884583 : f32
    %202 = vector.broadcast %cst_91 : f32 to vector<32x16xf32>
    %203 = arith.mulf %202, %201 : vector<32x16xf32>
    %204 = math.tanh %203 : vector<32x16xf32>
    %cst_92 = arith.constant 1.000000e+00 : f32
    %205 = vector.broadcast %cst_92 : f32 to vector<32x16xf32>
    %206 = arith.addf %205, %204 : vector<32x16xf32>
    %207 = arith.mulf %196, %206 : vector<32x16xf32>
    %208 = vector.extract_strided_slice %3 {offsets = [0, 0], sizes = [1, 1], strides = [1, 1]} : vector<1x2xf32> to vector<1x1xf32>
    %209 = vector.extract_strided_slice %207 {offsets = [0, 0], sizes = [16, 16], strides = [1, 1]} : vector<32x16xf32> to vector<16x16xf32>
    %210 = vector.broadcast %208 : vector<1x1xf32> to vector<16x16xf32>
    %211 = arith.mulf %210, %209 : vector<16x16xf32>
    %212 = arith.addf %5, %211 : vector<16x16xf32>
    %c1 = arith.constant 1 : index
    %c0_93 = arith.constant 0 : index
    %c0_94 = arith.constant 0 : index
    %213 = vector.load %arg4[%c1, %c0_93, %c0_94] : memref<2x16x8xf32, #tpu.memory_space<vmem>>, vector<1x16x8xf32>
    %214 = vector.shape_cast %213 : vector<1x16x8xf32> to vector<16x8xf32>
    %c1_95 = arith.constant 1 : index
    %c0_96 = arith.constant 0 : index
    %c0_97 = arith.constant 0 : index
    %215 = vector.load %arg5[%c1_95, %c0_96, %c0_97] : memref<2x16x8xf32, #tpu.memory_space<vmem>>, vector<1x16x8xf32>
    %216 = vector.shape_cast %215 : vector<1x16x8xf32> to vector<16x8xf32>
    %cst_98 = arith.constant dense<0.000000e+00> : vector<16x16xf32>
    %217 = tpu.matmul %214, %216, %cst_98 {dimension_numbers = #tpu.dot_dimension_numbers<[1], [1], [0], [0], [0, 0, 1, 0], [], []>} : vector<16x8xf32>, vector<16x8xf32>, vector<16x16xf32> -> vector<16x16xf32>
    %cst_99 = arith.constant 3.000000e+00 : f32
    %218 = vector.broadcast %cst_99 : f32 to vector<16x16xf32>
    %219 = arith.mulf %218, %217 : vector<16x16xf32>
    %220 = math.tanh %219 : vector<16x16xf32>
    %cst_100 = arith.constant 0.000000e+00 : f32
    %221 = vector.broadcast %cst_100 : f32 to vector<16x16xf32>
    %222 = arith.maximumf %220, %221 : vector<16x16xf32>
    %cst_101 = arith.constant dense<0xFF800000> : vector<16xf32>
    %223 = vector.multi_reduction <maximumf>, %222, %cst_101 [1] : vector<16x16xf32> to vector<16xf32>
    %224 = vector.shape_cast %223 : vector<16xf32> to vector<16x1xf32>
    %225 = vector.broadcast %224 : vector<16x1xf32> to vector<16x16xf32>
    %226 = arith.subf %222, %225 : vector<16x16xf32>
    %227 = math.exp %226 : vector<16x16xf32>
    %cst_102 = arith.constant dense<0.000000e+00> : vector<16xf32>
    %228 = vector.multi_reduction <add>, %227, %cst_102 [1] : vector<16x16xf32> to vector<16xf32>
    %229 = vector.shape_cast %228 : vector<16xf32> to vector<16x1xf32>
    %230 = vector.broadcast %229 : vector<16x1xf32> to vector<16x16xf32>
    %231 = arith.divf %227, %230 : vector<16x16xf32>
    %c1_103 = arith.constant 1 : index
    %c0_104 = arith.constant 0 : index
    %c0_105 = arith.constant 0 : index
    %232 = vector.load %arg6[%c1_103, %c0_104, %c0_105] : memref<2x48x16xf32, #tpu.memory_space<vmem>>, vector<1x48x16xf32>
    %233 = vector.shape_cast %232 : vector<1x48x16xf32> to vector<48x16xf32>
    %234 = vector.extract_strided_slice %233 {offsets = [0, 0], sizes = [16, 16], strides = [1, 1]} : vector<48x16xf32> to vector<16x16xf32>
    %cst_106 = arith.constant dense<0.000000e+00> : vector<16x16xf32>
    %235 = tpu.matmul %50, %234, %cst_106 {dimension_numbers = #tpu.dot_dimension_numbers<[1], [0], [0], [1], [0, 0, 1, 1], [], []>} : vector<16x16xf32>, vector<16x16xf32>, vector<16x16xf32> -> vector<16x16xf32>
    %cst_107 = arith.constant 5.000000e-02 : f32
    %236 = vector.broadcast %cst_107 : f32 to vector<16x16xf32>
    %237 = arith.mulf %236, %50 : vector<16x16xf32>
    %cst_108 = arith.constant dense<0.000000e+00> : vector<16x16xf32>
    %238 = tpu.matmul %50, %231, %cst_108 {dimension_numbers = #tpu.dot_dimension_numbers<[1], [1], [0], [0], [0, 0, 1, 0], [], []>} : vector<16x16xf32>, vector<16x16xf32>, vector<16x16xf32> -> vector<16x16xf32>
    %cst_109 = arith.constant 0.949999988 : f32
    %239 = vector.broadcast %cst_109 : f32 to vector<16x16xf32>
    %240 = arith.mulf %239, %238 : vector<16x16xf32>
    %241 = arith.addf %237, %240 : vector<16x16xf32>
    %242 = vector.extract_strided_slice %233 {offsets = [16, 0], sizes = [16, 16], strides = [1, 1]} : vector<48x16xf32> to vector<16x16xf32>
    %cst_110 = arith.constant dense<0.000000e+00> : vector<16x16xf32>
    %243 = tpu.matmul %241, %242, %cst_110 {dimension_numbers = #tpu.dot_dimension_numbers<[1], [0], [0], [1], [0, 0, 1, 1], [], []>} : vector<16x16xf32>, vector<16x16xf32>, vector<16x16xf32> -> vector<16x16xf32>
    %244 = arith.addf %235, %243 : vector<16x16xf32>
    %cst_111 = arith.constant 5.000000e-02 : f32
    %245 = vector.broadcast %cst_111 : f32 to vector<16x16xf32>
    %246 = arith.mulf %245, %50 : vector<16x16xf32>
    %cst_112 = arith.constant dense<0.000000e+00> : vector<16x16xf32>
    %247 = tpu.matmul %241, %231, %cst_112 {dimension_numbers = #tpu.dot_dimension_numbers<[1], [1], [0], [0], [0, 0, 1, 0], [], []>} : vector<16x16xf32>, vector<16x16xf32>, vector<16x16xf32> -> vector<16x16xf32>
    %cst_113 = arith.constant 0.949999988 : f32
    %248 = vector.broadcast %cst_113 : f32 to vector<16x16xf32>
    %249 = arith.mulf %248, %247 : vector<16x16xf32>
    %250 = arith.addf %246, %249 : vector<16x16xf32>
    %251 = vector.extract_strided_slice %233 {offsets = [32, 0], sizes = [16, 16], strides = [1, 1]} : vector<48x16xf32> to vector<16x16xf32>
    %cst_114 = arith.constant dense<0.000000e+00> : vector<16x16xf32>
    %252 = tpu.matmul %250, %251, %cst_114 {dimension_numbers = #tpu.dot_dimension_numbers<[1], [0], [0], [1], [0, 0, 1, 1], [], []>} : vector<16x16xf32>, vector<16x16xf32>, vector<16x16xf32> -> vector<16x16xf32>
    %253 = arith.addf %244, %252 : vector<16x16xf32>
    %c1_115 = arith.constant 1 : index
    %c0_116 = arith.constant 0 : index
    %c0_117 = arith.constant 0 : index
    %254 = vector.load %arg7[%c1_115, %c0_116, %c0_117] : memref<2x1x16xf32, #tpu.memory_space<vmem>>, vector<1x1x16xf32>
    %255 = vector.shape_cast %254 : vector<1x1x16xf32> to vector<1x16xf32>
    %256 = vector.broadcast %255 : vector<1x16xf32> to vector<16x16xf32>
    %257 = arith.addf %253, %256 : vector<16x16xf32>
    %cst_118 = arith.constant 0.000000e+00 : f32
    %258 = vector.broadcast %cst_118 : f32 to vector<16x16xf32>
    %259 = tpu.concatenate %257, %258 in 0 : vector<16x16xf32>, vector<16x16xf32> -> vector<32x16xf32>
    %c1_119 = arith.constant 1 : index
    %c0_120 = arith.constant 0 : index
    %c0_121 = arith.constant 0 : index
    %260 = vector.load %arg3[%c1_119, %c0_120, %c0_121] : memref<2x32x32xf32, #tpu.memory_space<vmem>>, vector<1x32x32xf32>
    %261 = vector.shape_cast %260 : vector<1x32x32xf32> to vector<32x32xf32>
    %c0_122 = arith.constant 0 : index
    %c0_123 = arith.constant 0 : index
    %262 = vector.load %arg8[%c0_122, %c0_123] : memref<16x48xf32, #tpu.memory_space<vmem>>, vector<16x48xf32>
    %cst_124 = arith.constant dense<0.000000e+00> : vector<32x48xf32>
    %263 = tpu.matmul %259, %262, %cst_124 {dimension_numbers = #tpu.dot_dimension_numbers<[1], [0], [0], [1], [0, 0, 1, 1], [], []>} : vector<32x16xf32>, vector<16x48xf32>, vector<32x48xf32> -> vector<32x48xf32>
    %c0_125 = arith.constant 0 : index
    %c0_126 = arith.constant 0 : index
    %264 = vector.load %arg9[%c0_125, %c0_126] : memref<1x48xf32, #tpu.memory_space<vmem>>, vector<1x48xf32>
    %265 = vector.broadcast %264 : vector<1x48xf32> to vector<32x48xf32>
    %266 = arith.addf %263, %265 : vector<32x48xf32>
    %cst_127 = arith.constant 0.000000e+00 : f32
    %267 = vector.broadcast %cst_127 : f32 to vector<32x16xf32>
    %268 = vector.extract_strided_slice %266 {offsets = [0, 0], sizes = [32, 8], strides = [1, 1]} : vector<32x48xf32> to vector<32x8xf32>
    %cst_128 = arith.constant 0.353553385 : f32
    %269 = vector.broadcast %cst_128 : f32 to vector<32x8xf32>
    %270 = arith.mulf %268, %269 : vector<32x8xf32>
    %271 = vector.extract_strided_slice %266 {offsets = [0, 16], sizes = [32, 8], strides = [1, 1]} : vector<32x48xf32> to vector<32x8xf32>
    %272 = vector.extract_strided_slice %266 {offsets = [0, 32], sizes = [32, 8], strides = [1, 1]} : vector<32x48xf32> to vector<32x8xf32>
    %cst_129 = arith.constant dense<0.000000e+00> : vector<32x32xf32>
    %273 = tpu.matmul %270, %271, %cst_129 {dimension_numbers = #tpu.dot_dimension_numbers<[1], [1], [0], [0], [0, 0, 1, 0], [], []>} : vector<32x8xf32>, vector<32x8xf32>, vector<32x32xf32> -> vector<32x32xf32>
    %274 = arith.addf %273, %261 : vector<32x32xf32>
    %cst_130 = arith.constant dense<0xFF800000> : vector<32xf32>
    %275 = vector.multi_reduction <maximumf>, %274, %cst_130 [1] : vector<32x32xf32> to vector<32xf32>
    %276 = vector.shape_cast %275 : vector<32xf32> to vector<32x1xf32>
    %277 = vector.broadcast %276 : vector<32x1xf32> to vector<32x32xf32>
    %278 = arith.subf %274, %277 : vector<32x32xf32>
    %279 = math.exp %278 : vector<32x32xf32>
    %cst_131 = arith.constant dense<0.000000e+00> : vector<32xf32>
    %280 = vector.multi_reduction <add>, %279, %cst_131 [1] : vector<32x32xf32> to vector<32xf32>
    %281 = vector.shape_cast %280 : vector<32xf32> to vector<32x1xf32>
    %282 = vector.broadcast %281 : vector<32x1xf32> to vector<32x32xf32>
    %283 = arith.divf %279, %282 : vector<32x32xf32>
    %cst_132 = arith.constant dense<0.000000e+00> : vector<32x8xf32>
    %284 = tpu.matmul %283, %272, %cst_132 {dimension_numbers = #tpu.dot_dimension_numbers<[1], [0], [0], [1], [0, 0, 1, 1], [], []>} : vector<32x32xf32>, vector<32x8xf32>, vector<32x8xf32> -> vector<32x8xf32>
    %c0_133 = arith.constant 0 : index
    %c0_134 = arith.constant 0 : index
    %285 = vector.load %arg10[%c0_133, %c0_134] : memref<16x16xf32, #tpu.memory_space<vmem>>, vector<8x16xf32>
    %cst_135 = arith.constant dense<0.000000e+00> : vector<32x16xf32>
    %286 = tpu.matmul %284, %285, %cst_135 {dimension_numbers = #tpu.dot_dimension_numbers<[1], [0], [0], [1], [0, 0, 1, 1], [], []>} : vector<32x8xf32>, vector<8x16xf32>, vector<32x16xf32> -> vector<32x16xf32>
    %287 = arith.addf %267, %286 : vector<32x16xf32>
    %288 = vector.extract_strided_slice %266 {offsets = [0, 8], sizes = [32, 8], strides = [1, 1]} : vector<32x48xf32> to vector<32x8xf32>
    %cst_136 = arith.constant 0.353553385 : f32
    %289 = vector.broadcast %cst_136 : f32 to vector<32x8xf32>
    %290 = arith.mulf %288, %289 : vector<32x8xf32>
    %291 = vector.extract_strided_slice %266 {offsets = [0, 24], sizes = [32, 8], strides = [1, 1]} : vector<32x48xf32> to vector<32x8xf32>
    %292 = vector.extract_strided_slice %266 {offsets = [0, 40], sizes = [32, 8], strides = [1, 1]} : vector<32x48xf32> to vector<32x8xf32>
    %cst_137 = arith.constant dense<0.000000e+00> : vector<32x32xf32>
    %293 = tpu.matmul %290, %291, %cst_137 {dimension_numbers = #tpu.dot_dimension_numbers<[1], [1], [0], [0], [0, 0, 1, 0], [], []>} : vector<32x8xf32>, vector<32x8xf32>, vector<32x32xf32> -> vector<32x32xf32>
    %294 = arith.addf %293, %261 : vector<32x32xf32>
    %cst_138 = arith.constant dense<0xFF800000> : vector<32xf32>
    %295 = vector.multi_reduction <maximumf>, %294, %cst_138 [1] : vector<32x32xf32> to vector<32xf32>
    %296 = vector.shape_cast %295 : vector<32xf32> to vector<32x1xf32>
    %297 = vector.broadcast %296 : vector<32x1xf32> to vector<32x32xf32>
    %298 = arith.subf %294, %297 : vector<32x32xf32>
    %299 = math.exp %298 : vector<32x32xf32>
    %cst_139 = arith.constant dense<0.000000e+00> : vector<32xf32>
    %300 = vector.multi_reduction <add>, %299, %cst_139 [1] : vector<32x32xf32> to vector<32xf32>
    %301 = vector.shape_cast %300 : vector<32xf32> to vector<32x1xf32>
    %302 = vector.broadcast %301 : vector<32x1xf32> to vector<32x32xf32>
    %303 = arith.divf %299, %302 : vector<32x32xf32>
    %cst_140 = arith.constant dense<0.000000e+00> : vector<32x8xf32>
    %304 = tpu.matmul %303, %292, %cst_140 {dimension_numbers = #tpu.dot_dimension_numbers<[1], [0], [0], [1], [0, 0, 1, 1], [], []>} : vector<32x32xf32>, vector<32x8xf32>, vector<32x8xf32> -> vector<32x8xf32>
    %c8_141 = arith.constant 8 : index
    %c0_142 = arith.constant 0 : index
    %305 = vector.load %arg10[%c8_141, %c0_142] : memref<16x16xf32, #tpu.memory_space<vmem>>, vector<8x16xf32>
    %cst_143 = arith.constant dense<0.000000e+00> : vector<32x16xf32>
    %306 = tpu.matmul %304, %305, %cst_143 {dimension_numbers = #tpu.dot_dimension_numbers<[1], [0], [0], [1], [0, 0, 1, 1], [], []>} : vector<32x8xf32>, vector<8x16xf32>, vector<32x16xf32> -> vector<32x16xf32>
    %307 = arith.addf %287, %306 : vector<32x16xf32>
    %c0_144 = arith.constant 0 : index
    %c0_145 = arith.constant 0 : index
    %308 = vector.load %arg11[%c0_144, %c0_145] : memref<1x16xf32, #tpu.memory_space<vmem>>, vector<1x16xf32>
    %309 = vector.broadcast %308 : vector<1x16xf32> to vector<32x16xf32>
    %310 = arith.addf %307, %309 : vector<32x16xf32>
    %311 = arith.addf %259, %310 : vector<32x16xf32>
    %312 = vector.extract_strided_slice %4 {offsets = [0, 0], sizes = [1, 16], strides = [1, 1]} : vector<6x16xf32> to vector<1x16xf32>
    %313 = vector.extract_strided_slice %4 {offsets = [1, 0], sizes = [1, 16], strides = [1, 1]} : vector<6x16xf32> to vector<1x16xf32>
    %cst_146 = arith.constant dense<0.000000e+00> : vector<32xf32>
    %314 = vector.multi_reduction <add>, %311, %cst_146 [1] : vector<32x16xf32> to vector<32xf32>
    %315 = vector.shape_cast %314 : vector<32xf32> to vector<32x1xf32>
    %cst_147 = arith.constant 1.600000e+01 : f32
    %316 = vector.broadcast %cst_147 : f32 to vector<32x1xf32>
    %317 = arith.divf %315, %316 : vector<32x1xf32>
    %318 = vector.broadcast %317 : vector<32x1xf32> to vector<32x16xf32>
    %319 = arith.subf %311, %318 : vector<32x16xf32>
    %320 = arith.mulf %319, %319 : vector<32x16xf32>
    %cst_148 = arith.constant dense<0.000000e+00> : vector<32xf32>
    %321 = vector.multi_reduction <add>, %320, %cst_148 [1] : vector<32x16xf32> to vector<32xf32>
    %322 = vector.shape_cast %321 : vector<32xf32> to vector<32x1xf32>
    %cst_149 = arith.constant 1.600000e+01 : f32
    %323 = vector.broadcast %cst_149 : f32 to vector<32x1xf32>
    %324 = arith.divf %322, %323 : vector<32x1xf32>
    %cst_150 = arith.constant 9.99999974E-6 : f32
    %325 = vector.broadcast %cst_150 : f32 to vector<32x1xf32>
    %326 = arith.addf %324, %325 : vector<32x1xf32>
    %327 = math.rsqrt %326 : vector<32x1xf32>
    %328 = vector.broadcast %327 : vector<32x1xf32> to vector<32x16xf32>
    %329 = arith.mulf %319, %328 : vector<32x16xf32>
    %330 = vector.broadcast %312 : vector<1x16xf32> to vector<32x16xf32>
    %331 = arith.mulf %329, %330 : vector<32x16xf32>
    %332 = vector.broadcast %313 : vector<1x16xf32> to vector<32x16xf32>
    %333 = arith.addf %331, %332 : vector<32x16xf32>
    %c0_151 = arith.constant 0 : index
    %c0_152 = arith.constant 0 : index
    %334 = vector.load %arg12[%c0_151, %c0_152] : memref<16x32xf32, #tpu.memory_space<vmem>>, vector<16x32xf32>
    %cst_153 = arith.constant dense<0.000000e+00> : vector<32x32xf32>
    %335 = tpu.matmul %333, %334, %cst_153 {dimension_numbers = #tpu.dot_dimension_numbers<[1], [0], [0], [1], [0, 0, 1, 1], [], []>} : vector<32x16xf32>, vector<16x32xf32>, vector<32x32xf32> -> vector<32x32xf32>
    %c0_154 = arith.constant 0 : index
    %c0_155 = arith.constant 0 : index
    %336 = vector.load %arg13[%c0_154, %c0_155] : memref<1x32xf32, #tpu.memory_space<vmem>>, vector<1x32xf32>
    %337 = vector.broadcast %336 : vector<1x32xf32> to vector<32x32xf32>
    %338 = arith.addf %335, %337 : vector<32x32xf32>
    %cst_156 = arith.constant 5.000000e-01 : f32
    %339 = vector.broadcast %cst_156 : f32 to vector<32x32xf32>
    %340 = arith.mulf %339, %338 : vector<32x32xf32>
    %cst_157 = arith.constant 4.471500e-02 : f32
    %341 = vector.broadcast %cst_157 : f32 to vector<32x32xf32>
    %342 = arith.mulf %341, %338 : vector<32x32xf32>
    %343 = arith.mulf %342, %338 : vector<32x32xf32>
    %344 = arith.mulf %343, %338 : vector<32x32xf32>
    %345 = arith.addf %338, %344 : vector<32x32xf32>
    %cst_158 = arith.constant 0.797884583 : f32
    %346 = vector.broadcast %cst_158 : f32 to vector<32x32xf32>
    %347 = arith.mulf %346, %345 : vector<32x32xf32>
    %348 = math.tanh %347 : vector<32x32xf32>
    %cst_159 = arith.constant 1.000000e+00 : f32
    %349 = vector.broadcast %cst_159 : f32 to vector<32x32xf32>
    %350 = arith.addf %349, %348 : vector<32x32xf32>
    %351 = arith.mulf %340, %350 : vector<32x32xf32>
    %c0_160 = arith.constant 0 : index
    %c0_161 = arith.constant 0 : index
    %352 = vector.load %arg14[%c0_160, %c0_161] : memref<32x16xf32, #tpu.memory_space<vmem>>, vector<32x16xf32>
    %cst_162 = arith.constant dense<0.000000e+00> : vector<32x16xf32>
    %353 = tpu.matmul %351, %352, %cst_162 {dimension_numbers = #tpu.dot_dimension_numbers<[1], [0], [0], [1], [0, 0, 1, 1], [], []>} : vector<32x32xf32>, vector<32x16xf32>, vector<32x16xf32> -> vector<32x16xf32>
    %c0_163 = arith.constant 0 : index
    %c0_164 = arith.constant 0 : index
    %354 = vector.load %arg15[%c0_163, %c0_164] : memref<1x16xf32, #tpu.memory_space<vmem>>, vector<1x16xf32>
    %355 = vector.broadcast %354 : vector<1x16xf32> to vector<32x16xf32>
    %356 = arith.addf %353, %355 : vector<32x16xf32>
    %357 = arith.addf %333, %356 : vector<32x16xf32>
    %358 = vector.extract_strided_slice %4 {offsets = [2, 0], sizes = [1, 16], strides = [1, 1]} : vector<6x16xf32> to vector<1x16xf32>
    %359 = vector.extract_strided_slice %4 {offsets = [3, 0], sizes = [1, 16], strides = [1, 1]} : vector<6x16xf32> to vector<1x16xf32>
    %cst_165 = arith.constant dense<0.000000e+00> : vector<32xf32>
    %360 = vector.multi_reduction <add>, %357, %cst_165 [1] : vector<32x16xf32> to vector<32xf32>
    %361 = vector.shape_cast %360 : vector<32xf32> to vector<32x1xf32>
    %cst_166 = arith.constant 1.600000e+01 : f32
    %362 = vector.broadcast %cst_166 : f32 to vector<32x1xf32>
    %363 = arith.divf %361, %362 : vector<32x1xf32>
    %364 = vector.broadcast %363 : vector<32x1xf32> to vector<32x16xf32>
    %365 = arith.subf %357, %364 : vector<32x16xf32>
    %366 = arith.mulf %365, %365 : vector<32x16xf32>
    %cst_167 = arith.constant dense<0.000000e+00> : vector<32xf32>
    %367 = vector.multi_reduction <add>, %366, %cst_167 [1] : vector<32x16xf32> to vector<32xf32>
    %368 = vector.shape_cast %367 : vector<32xf32> to vector<32x1xf32>
    %cst_168 = arith.constant 1.600000e+01 : f32
    %369 = vector.broadcast %cst_168 : f32 to vector<32x1xf32>
    %370 = arith.divf %368, %369 : vector<32x1xf32>
    %cst_169 = arith.constant 9.99999974E-6 : f32
    %371 = vector.broadcast %cst_169 : f32 to vector<32x1xf32>
    %372 = arith.addf %370, %371 : vector<32x1xf32>
    %373 = math.rsqrt %372 : vector<32x1xf32>
    %374 = vector.broadcast %373 : vector<32x1xf32> to vector<32x16xf32>
    %375 = arith.mulf %365, %374 : vector<32x16xf32>
    %376 = vector.broadcast %358 : vector<1x16xf32> to vector<32x16xf32>
    %377 = arith.mulf %375, %376 : vector<32x16xf32>
    %378 = vector.broadcast %359 : vector<1x16xf32> to vector<32x16xf32>
    %379 = arith.addf %377, %378 : vector<32x16xf32>
    %380 = vector.extract_strided_slice %4 {offsets = [4, 0], sizes = [1, 16], strides = [1, 1]} : vector<6x16xf32> to vector<1x16xf32>
    %381 = vector.extract_strided_slice %4 {offsets = [5, 0], sizes = [1, 16], strides = [1, 1]} : vector<6x16xf32> to vector<1x16xf32>
    %cst_170 = arith.constant dense<0.000000e+00> : vector<32xf32>
    %382 = vector.multi_reduction <add>, %379, %cst_170 [1] : vector<32x16xf32> to vector<32xf32>
    %383 = vector.shape_cast %382 : vector<32xf32> to vector<32x1xf32>
    %cst_171 = arith.constant 1.600000e+01 : f32
    %384 = vector.broadcast %cst_171 : f32 to vector<32x1xf32>
    %385 = arith.divf %383, %384 : vector<32x1xf32>
    %386 = vector.broadcast %385 : vector<32x1xf32> to vector<32x16xf32>
    %387 = arith.subf %379, %386 : vector<32x16xf32>
    %388 = arith.mulf %387, %387 : vector<32x16xf32>
    %cst_172 = arith.constant dense<0.000000e+00> : vector<32xf32>
    %389 = vector.multi_reduction <add>, %388, %cst_172 [1] : vector<32x16xf32> to vector<32xf32>
    %390 = vector.shape_cast %389 : vector<32xf32> to vector<32x1xf32>
    %cst_173 = arith.constant 1.600000e+01 : f32
    %391 = vector.broadcast %cst_173 : f32 to vector<32x1xf32>
    %392 = arith.divf %390, %391 : vector<32x1xf32>
    %cst_174 = arith.constant 9.99999974E-6 : f32
    %393 = vector.broadcast %cst_174 : f32 to vector<32x1xf32>
    %394 = arith.addf %392, %393 : vector<32x1xf32>
    %395 = math.rsqrt %394 : vector<32x1xf32>
    %396 = vector.broadcast %395 : vector<32x1xf32> to vector<32x16xf32>
    %397 = arith.mulf %387, %396 : vector<32x16xf32>
    %398 = vector.broadcast %380 : vector<1x16xf32> to vector<32x16xf32>
    %399 = arith.mulf %397, %398 : vector<32x16xf32>
    %400 = vector.broadcast %381 : vector<1x16xf32> to vector<32x16xf32>
    %401 = arith.addf %399, %400 : vector<32x16xf32>
    %cst_175 = arith.constant 5.000000e-01 : f32
    %402 = vector.broadcast %cst_175 : f32 to vector<32x16xf32>
    %403 = arith.mulf %402, %401 : vector<32x16xf32>
    %cst_176 = arith.constant 4.471500e-02 : f32
    %404 = vector.broadcast %cst_176 : f32 to vector<32x16xf32>
    %405 = arith.mulf %404, %401 : vector<32x16xf32>
    %406 = arith.mulf %405, %401 : vector<32x16xf32>
    %407 = arith.mulf %406, %401 : vector<32x16xf32>
    %408 = arith.addf %401, %407 : vector<32x16xf32>
    %cst_177 = arith.constant 0.797884583 : f32
    %409 = vector.broadcast %cst_177 : f32 to vector<32x16xf32>
    %410 = arith.mulf %409, %408 : vector<32x16xf32>
    %411 = math.tanh %410 : vector<32x16xf32>
    %cst_178 = arith.constant 1.000000e+00 : f32
    %412 = vector.broadcast %cst_178 : f32 to vector<32x16xf32>
    %413 = arith.addf %412, %411 : vector<32x16xf32>
    %414 = arith.mulf %403, %413 : vector<32x16xf32>
    %415 = vector.extract_strided_slice %3 {offsets = [0, 1], sizes = [1, 1], strides = [1, 1]} : vector<1x2xf32> to vector<1x1xf32>
    %416 = vector.extract_strided_slice %414 {offsets = [0, 0], sizes = [16, 16], strides = [1, 1]} : vector<32x16xf32> to vector<16x16xf32>
    %417 = vector.broadcast %415 : vector<1x1xf32> to vector<16x16xf32>
    %418 = arith.mulf %417, %416 : vector<16x16xf32>
    %419 = arith.addf %212, %418 : vector<16x16xf32>
    %420 = arith.addf %419, %257 : vector<16x16xf32>
    %c0_179 = arith.constant 0 : index
    %c0_180 = arith.constant 0 : index
    %421 = vector.load %arg17[%c0_179, %c0_180] : memref<2x16xf32, #tpu.memory_space<vmem>>, vector<1x16xf32>
    %c1_181 = arith.constant 1 : index
    %c0_182 = arith.constant 0 : index
    %422 = vector.load %arg17[%c1_181, %c0_182] : memref<2x16xf32, #tpu.memory_space<vmem>>, vector<1x16xf32>
    %cst_183 = arith.constant dense<0.000000e+00> : vector<16xf32>
    %423 = vector.multi_reduction <add>, %420, %cst_183 [1] : vector<16x16xf32> to vector<16xf32>
    %424 = vector.shape_cast %423 : vector<16xf32> to vector<16x1xf32>
    %cst_184 = arith.constant 1.600000e+01 : f32
    %425 = vector.broadcast %cst_184 : f32 to vector<16x1xf32>
    %426 = arith.divf %424, %425 : vector<16x1xf32>
    %427 = vector.broadcast %426 : vector<16x1xf32> to vector<16x16xf32>
    %428 = arith.subf %420, %427 : vector<16x16xf32>
    %429 = arith.mulf %428, %428 : vector<16x16xf32>
    %cst_185 = arith.constant dense<0.000000e+00> : vector<16xf32>
    %430 = vector.multi_reduction <add>, %429, %cst_185 [1] : vector<16x16xf32> to vector<16xf32>
    %431 = vector.shape_cast %430 : vector<16xf32> to vector<16x1xf32>
    %cst_186 = arith.constant 1.600000e+01 : f32
    %432 = vector.broadcast %cst_186 : f32 to vector<16x1xf32>
    %433 = arith.divf %431, %432 : vector<16x1xf32>
    %cst_187 = arith.constant 9.99999974E-6 : f32
    %434 = vector.broadcast %cst_187 : f32 to vector<16x1xf32>
    %435 = arith.addf %433, %434 : vector<16x1xf32>
    %436 = math.rsqrt %435 : vector<16x1xf32>
    %437 = vector.broadcast %436 : vector<16x1xf32> to vector<16x16xf32>
    %438 = arith.mulf %428, %437 : vector<16x16xf32>
    %439 = vector.broadcast %421 : vector<1x16xf32> to vector<16x16xf32>
    %440 = arith.mulf %438, %439 : vector<16x16xf32>
    %441 = vector.broadcast %422 : vector<1x16xf32> to vector<16x16xf32>
    %442 = arith.addf %440, %441 : vector<16x16xf32>
    %c0_188 = arith.constant 0 : index
    %c0_189 = arith.constant 0 : index
    %c0_190 = arith.constant 0 : index
    %443 = vector.load %arg24[%c0_188, %c0_189, %c0_190] : memref<1x16x16xf32, #tpu.memory_space<vmem>>, vector<1x16x16xf32>
    %444 = vector.shape_cast %443 : vector<1x16x16xf32> to vector<16x16xf32>
    %445 = vector.shape_cast %442 : vector<16x16xf32> to vector<1x16x16xf32>
    tpu.vector_store %arg24[%c0_188, %c0_189, %c0_190], %445 {strides = array<i32>} : memref<1x16x16xf32, #tpu.memory_space<vmem>>, vector<1x16x16xf32>,
    %c0_191 = arith.constant 0 : index
    %c0_192 = arith.constant 0 : index
    %446 = vector.load %arg18[%c0_191, %c0_192] : memref<16x4xf32, #tpu.memory_space<vmem>>, vector<16x4xf32>
    %cst_193 = arith.constant dense<0.000000e+00> : vector<16x4xf32>
    %447 = tpu.matmul %442, %446, %cst_193 {dimension_numbers = #tpu.dot_dimension_numbers<[1], [0], [0], [1], [0, 0, 1, 1], [], []>} : vector<16x16xf32>, vector<16x4xf32>, vector<16x4xf32> -> vector<16x4xf32>
    %c0_194 = arith.constant 0 : index
    %c0_195 = arith.constant 0 : index
    %448 = vector.load %arg19[%c0_194, %c0_195] : memref<1x4xf32, #tpu.memory_space<vmem>>, vector<1x4xf32>
    %449 = vector.broadcast %448 : vector<1x4xf32> to vector<16x4xf32>
    %450 = arith.addf %447, %449 : vector<16x4xf32>
    %c0_196 = arith.constant 0 : index
    %c0_197 = arith.constant 0 : index
    %451 = vector.load %arg20[%c0_196, %c0_197] : memref<8x16xf32, #tpu.memory_space<vmem>>, vector<8x16xf32>
    %cst_198 = arith.constant dense<0.000000e+00> : vector<8x4xf32>
    %452 = tpu.matmul %451, %450, %cst_198 {dimension_numbers = #tpu.dot_dimension_numbers<[1], [0], [0], [1], [0, 0, 1, 1], [], []>} : vector<8x16xf32>, vector<16x4xf32>, vector<8x4xf32> -> vector<8x4xf32>
    %c0_199 = arith.constant 0 : index
    %c0_200 = arith.constant 0 : index
    %453 = vector.load %arg21[%c0_199, %c0_200] : memref<8x1xf32, #tpu.memory_space<vmem>>, vector<8x1xf32>
    %454 = vector.broadcast %453 : vector<8x1xf32> to vector<8x4xf32>
    %455 = arith.addf %452, %454 : vector<8x4xf32>
    %c0_201 = arith.constant 0 : index
    %c0_202 = arith.constant 0 : index
    %c0_203 = arith.constant 0 : index
    %456 = vector.load %arg22[%c0_201, %c0_202, %c0_203] : memref<1x1x4xf32, #tpu.memory_space<vmem>>, vector<1x1x4xf32>
    %457 = vector.shape_cast %456 : vector<1x1x4xf32> to vector<1x4xf32>
    %458 = vector.broadcast %457 : vector<1x4xf32> to vector<8x4xf32>
    %459 = arith.mulf %455, %458 : vector<8x4xf32>
    %c0_204 = arith.constant 0 : index
    %c0_205 = arith.constant 0 : index
    %c0_206 = arith.constant 0 : index
    %460 = vector.load %arg23[%c0_204, %c0_205, %c0_206] : memref<1x1x4xf32, #tpu.memory_space<vmem>>, vector<1x1x4xf32>
    %461 = vector.shape_cast %460 : vector<1x1x4xf32> to vector<1x4xf32>
    %462 = vector.broadcast %461 : vector<1x4xf32> to vector<8x4xf32>
    %463 = arith.addf %459, %462 : vector<8x4xf32>
    %c0_207 = arith.constant 0 : index
    %c0_208 = arith.constant 0 : index
    %c0_209 = arith.constant 0 : index
    %464 = vector.load %arg25[%c0_207, %c0_208, %c0_209] : memref<1x8x4xf32, #tpu.memory_space<vmem>>, vector<1x8x4xf32>
    %465 = vector.shape_cast %464 : vector<1x8x4xf32> to vector<8x4xf32>
    %466 = vector.shape_cast %463 : vector<8x4xf32> to vector<1x8x4xf32>
    tpu.vector_store %arg25[%c0_207, %c0_208, %c0_209], %466 {strides = array<i32>} : memref<1x8x4xf32, #tpu.memory_space<vmem>>, vector<1x8x4xf32>,
    return
  }
  func.func @transform_0(%arg0: i32) -> (i32, i32, i32) {
    %c0_i32 = arith.constant 0 : i32
    %c0_i32_0 = arith.constant 0 : i32
    %c0_i32_1 = arith.constant 0 : i32
    return %arg0, %c0_i32, %c0_i32_0 : i32, i32, i32
  }
  func.func @transform_1(%arg0: i32) -> (i32, i32, i32) {
    %c0_i32 = arith.constant 0 : i32
    %c0_i32_0 = arith.constant 0 : i32
    %c0_i32_1 = arith.constant 0 : i32
    return %arg0, %c0_i32, %c0_i32_0 : i32, i32, i32
  }
  func.func @transform_2(%arg0: i32) -> (i32, i32, i32) {
    %c0_i32 = arith.constant 0 : i32
    %c0_i32_0 = arith.constant 0 : i32
    %c0_i32_1 = arith.constant 0 : i32
    %c0_i32_2 = arith.constant 0 : i32
    return %c0_i32, %c0_i32_0, %c0_i32_1 : i32, i32, i32
  }
  func.func @transform_3(%arg0: i32) -> (i32, i32, i32) {
    %c0_i32 = arith.constant 0 : i32
    %c0_i32_0 = arith.constant 0 : i32
    %c0_i32_1 = arith.constant 0 : i32
    %c0_i32_2 = arith.constant 0 : i32
    return %c0_i32, %c0_i32_0, %c0_i32_1 : i32, i32, i32
  }
  func.func @transform_4(%arg0: i32) -> (i32, i32, i32) {
    %c0_i32 = arith.constant 0 : i32
    %c0_i32_0 = arith.constant 0 : i32
    %c0_i32_1 = arith.constant 0 : i32
    %c0_i32_2 = arith.constant 0 : i32
    return %c0_i32, %c0_i32_0, %c0_i32_1 : i32, i32, i32
  }
  func.func @transform_5(%arg0: i32) -> (i32, i32, i32) {
    %c0_i32 = arith.constant 0 : i32
    %c0_i32_0 = arith.constant 0 : i32
    %c0_i32_1 = arith.constant 0 : i32
    %c0_i32_2 = arith.constant 0 : i32
    return %c0_i32, %c0_i32_0, %c0_i32_1 : i32, i32, i32
  }
  func.func @transform_6(%arg0: i32) -> (i32, i32, i32) {
    %c0_i32 = arith.constant 0 : i32
    %c0_i32_0 = arith.constant 0 : i32
    %c0_i32_1 = arith.constant 0 : i32
    %c0_i32_2 = arith.constant 0 : i32
    return %c0_i32, %c0_i32_0, %c0_i32_1 : i32, i32, i32
  }
  func.func @transform_7(%arg0: i32) -> (i32, i32) {
    %c0_i32 = arith.constant 0 : i32
    %c0_i32_0 = arith.constant 0 : i32
    %c0_i32_1 = arith.constant 0 : i32
    return %c0_i32, %c0_i32_0 : i32, i32
  }
  func.func @transform_8(%arg0: i32) -> (i32, i32) {
    %c0_i32 = arith.constant 0 : i32
    %c0_i32_0 = arith.constant 0 : i32
    %c0_i32_1 = arith.constant 0 : i32
    return %c0_i32, %c0_i32_0 : i32, i32
  }
  func.func @transform_9(%arg0: i32) -> (i32, i32) {
    %c0_i32 = arith.constant 0 : i32
    %c0_i32_0 = arith.constant 0 : i32
    %c0_i32_1 = arith.constant 0 : i32
    return %c0_i32, %c0_i32_0 : i32, i32
  }
  func.func @transform_10(%arg0: i32) -> (i32, i32) {
    %c0_i32 = arith.constant 0 : i32
    %c0_i32_0 = arith.constant 0 : i32
    %c0_i32_1 = arith.constant 0 : i32
    return %c0_i32, %c0_i32_0 : i32, i32
  }
  func.func @transform_11(%arg0: i32) -> (i32, i32) {
    %c0_i32 = arith.constant 0 : i32
    %c0_i32_0 = arith.constant 0 : i32
    %c0_i32_1 = arith.constant 0 : i32
    return %c0_i32, %c0_i32_0 : i32, i32
  }
  func.func @transform_12(%arg0: i32) -> (i32, i32) {
    %c0_i32 = arith.constant 0 : i32
    %c0_i32_0 = arith.constant 0 : i32
    %c0_i32_1 = arith.constant 0 : i32
    return %c0_i32, %c0_i32_0 : i32, i32
  }
  func.func @transform_13(%arg0: i32) -> (i32, i32) {
    %c0_i32 = arith.constant 0 : i32
    %c0_i32_0 = arith.constant 0 : i32
    %c0_i32_1 = arith.constant 0 : i32
    return %c0_i32, %c0_i32_0 : i32, i32
  }
  func.func @transform_14(%arg0: i32) -> (i32, i32) {
    %c0_i32 = arith.constant 0 : i32
    %c0_i32_0 = arith.constant 0 : i32
    %c0_i32_1 = arith.constant 0 : i32
    return %c0_i32, %c0_i32_0 : i32, i32
  }
  func.func @transform_15(%arg0: i32) -> (i32, i32) {
    %c0_i32 = arith.constant 0 : i32
    %c0_i32_0 = arith.constant 0 : i32
    %c0_i32_1 = arith.constant 0 : i32
    return %c0_i32, %c0_i32_0 : i32, i32
  }
  func.func @transform_16(%arg0: i32) -> (i32, i32) {
    %c0_i32 = arith.constant 0 : i32
    %c0_i32_0 = arith.constant 0 : i32
    %c0_i32_1 = arith.constant 0 : i32
    return %c0_i32, %c0_i32_0 : i32, i32
  }
  func.func @transform_17(%arg0: i32) -> (i32, i32) {
    %c0_i32 = arith.constant 0 : i32
    %c0_i32_0 = arith.constant 0 : i32
    %c0_i32_1 = arith.constant 0 : i32
    return %c0_i32, %c0_i32_0 : i32, i32
  }
  func.func @transform_18(%arg0: i32) -> (i32, i32) {
    %c0_i32 = arith.constant 0 : i32
    %c0_i32_0 = arith.constant 0 : i32
    %c0_i32_1 = arith.constant 0 : i32
    return %c0_i32, %c0_i32_0 : i32, i32
  }
  func.func @transform_19(%arg0: i32) -> (i32, i32) {
    %c0_i32 = arith.constant 0 : i32
    %c0_i32_0 = arith.constant 0 : i32
    %c0_i32_1 = arith.constant 0 : i32
    return %c0_i32, %c0_i32_0 : i32, i32
  }
  func.func @transform_20(%arg0: i32) -> (i32, i32) {
    %c0_i32 = arith.constant 0 : i32
    %c0_i32_0 = arith.constant 0 : i32
    %c0_i32_1 = arith.constant 0 : i32
    return %c0_i32, %c0_i32_0 : i32, i32
  }
  func.func @transform_21(%arg0: i32) -> (i32, i32, i32) {
    %c0_i32 = arith.constant 0 : i32
    %c0_i32_0 = arith.constant 0 : i32
    %c0_i32_1 = arith.constant 0 : i32
    return %arg0, %c0_i32, %c0_i32_0 : i32, i32, i32
  }
  func.func @transform_22(%arg0: i32) -> (i32, i32, i32) {
    %c0_i32 = arith.constant 0 : i32
    %c0_i32_0 = arith.constant 0 : i32
    %c0_i32_1 = arith.constant 0 : i32
    return %arg0, %c0_i32, %c0_i32_0 : i32, i32, i32
  }
  func.func @transform_23(%arg0: i32) -> (i32, i32, i32) {
    %c0_i32 = arith.constant 0 : i32
    %c0_i32_0 = arith.constant 0 : i32
    %c0_i32_1 = arith.constant 0 : i32
    return %arg0, %c0_i32, %c0_i32_0 : i32, i32, i32
  }
  func.func @transform_24(%arg0: i32) -> (i32, i32, i32) {
    %c0_i32 = arith.constant 0 : i32
    %c0_i32_0 = arith.constant 0 : i32
    %c0_i32_1 = arith.constant 0 : i32
    return %arg0, %c0_i32, %c0_i32_0 : i32, i32, i32
  }
}

</mosaic_0001>

<bundles_post_ra>
// kernel: forward.2
= control target key start
LH: loop header
LB: loop body
LE: loop exit
PB: predicated region body
PF: predicated region fallthrough
CT: control target
= control target key end

     0   :  { %s317_s12 = smov 0   ;;  %s346_s0 = inlined_call_operand.vmem [shape: f32[2,16,16], index: 0, kind: input, shape index: {}]   ;;  %s347_s1 = inlined_call_operand.vmem [shape: f32[16,16], index: 1, kind: input, shape index: {}]   ;;  %s348_s2 = inlined_call_operand.vmem [shape: f32[16,16], index: 2, kind: input, shape index: {}]   ;;  %s349_s3 = inlined_call_operand.vmem [shape: f32[2,16,16], index: 3, kind: output, shape index: {}]  }
   0x1 LB: > { %s264_s13 = sadd.s32 4294967295, %s295_s12   ;;  %p268_p0 = scmp.ge.s32.totalorder %s295_s12, 1  ;;  %s295_s12 = sphi %s317_s12, %s13_s12  }
   0x2   : > { %p137_p1 = scmp.lt.s32.totalorder %s295_s12, 3 }
   0x4   : > { %p138_p2 = pnand %p268_p0, %p137_p1 }
   0x5   : > { %p161_p3 = scmp.lt.s32.totalorder (!%p138_p2), %s264_s13, 1 }
   0x6   : > { %141 = sbr.rel (%p138_p2) target bundleno = 145 (0x91), region = 32 }
   0xb   : > { %v174_v0 = vld [vmem:[%s347_s1 + $0x8] sm:$0xff]  ;;  %v173_v1 = vld [vmem:[%s347_s1] sm:$0xff]  ;;  %s351_s13 = smov (!%p161_p3, %s264_s13), 1  ;;  %vm177_vm0 = vcmask 130048  }
   0xc   : > { %198 = vmatpush.msra.mxu0 %v174_v0  ;;  %279 = vmatpush.msra.mxu1 %v174_v0  ;;  %s277_s18 = sshll.u32 %s351_s13, 4  ;;  %v175_v4 = vld [vmem:[%s348_s2] sm:$0xff]  ;;  %v176_v5 = vld [vmem:[%s348_s2 + $0x8] sm:$0xff] }
   0xd   : > { %s165_s21 = scalar_lea.vmem %s346_s0, %s277_s18  ;;  %s170_s28 = scalar_lea.vmem %s349_s3, %s277_s18 }
   0xe   : > { %199 = vmatpush.msra.mxu0 %v173_v1  ;;  %280 = vmatpush.msra.mxu1 %v173_v1  ;;  %v171_v2 = vld [vmem:[%s165_s21] sm:$0xff]  ;;  %v172_v3 = vld [vmem:[%s165_s21 + $0x8] sm:$0xff] }
   0xf   : > { %273 = vmatmul.msk.f32.vlgmr.msra.gmra.mxu0 %vm177_vm0, %v171_v2  ;;  %274 = vmatmul.msk.f32.vlgmr.msra.gmra.mxu1 %vm177_vm0, %v172_v3 }
  0x8c   : > { %v201_v6 = vpop.f32.mrf.mxu0  ;;  %v204_v7 = vpop.f32.mrf.mxu1 }
  0x8d   : > { %v202_v8 = vadd.f32 %v201_v6, %v175_v4  ;;  %v205_v9 = vadd.f32 %v204_v7, %v176_v5 }
  0x8f   : > { %207 = vst.msk [vmem:[%s170_s28] sm:$0xff] %vm177_vm0, %v202_v8 }
  0x90   : > { %208 = vst.msk [vmem:[%s170_s28 + $0x8] sm:$0xff] %vm177_vm0, %v205_v9 }
  0x91 PF: > { %s13_s12 = sadd.s32 1, %s295_s12  }
  0x92   : > { %p10_p4 = scmp.ge.s32.totalorder %s13_s12, 4  }
  0x94   :  { %12 = sbr.rel (!%p10_p4) target bundleno = 1 (0x1), region = 62 }

// kernel: forward.3
= control target key start
LH: loop header
LB: loop body
LE: loop exit
PB: predicated region body
PF: predicated region fallthrough
CT: control target
= control target key end

     0   :  { %s4986_s0 = inlined_call_operand.vmem [shape: f32[2,16,16], index: 0, kind: input, shape index: {}]   ;;  %s4987_s1 = inlined_call_operand.vmem [shape: f32[2,1,2], index: 1, kind: input, shape index: {}]   ;;  %s4988_s2 = inlined_call_operand.vmem [shape: f32[2,32,32], index: 2, kind: input, shape index: {}]   ;;  %s4989_s3 = inlined_call_operand.vmem [shape: f32[2,16,8], index: 3, kind: input, shape index: {}]   ;;  %s4990_s4 = inlined_call_operand.vmem [shape: f32[2,16,8], index: 4, kind: input, shape index: {}]   ;;  %s4991_s5 = inlined_call_operand.vmem [shape: f32[2,48,16], index: 5, kind: input, shape index: {}]   ;;  %s4992_s6 = inlined_call_operand.vmem [shape: f32[2,1,16], index: 6, kind: input, shape index: {}]   ;;  %s4993_s7 = inlined_call_operand.vmem [shape: f32[16,48], index: 7, kind: input, shape index: {}]   ;;  %s4994_s8 = inlined_call_operand.vmem [shape: f32[1,48], index: 8, kind: input, shape index: {}]   ;;  %s4995_s9 = inlined_call_operand.vmem [shape: f32[16,16], index: 9, kind: input, shape index: {}]   ;;  %s4996_s10 = inlined_call_operand.vmem [shape: f32[1,16], index: 10, kind: input, shape index: {}]   ;;  %s4997_s11 = inlined_call_operand.vmem [shape: f32[16,32], index: 11, kind: input, shape index: {}]   ;;  %s4998_s12 = inlined_call_operand.vmem [shape: f32[1,32], index: 12, kind: input, shape index: {}]   ;;  %s4999_s13 = inlined_call_operand.vmem [shape: f32[32,16], index: 13, kind: input, shape index: {}]   ;;  %s5000_s14 = inlined_call_operand.vmem [shape: f32[1,16], index: 14, kind: input, shape index: {}]   ;;  %s5001_s15 = inlined_call_operand.vmem [shape: f32[6,16], index: 15, kind: input, shape index: {}]   ;;  %s5002_s16 = inlined_call_operand.vmem [shape: f32[2,16], index: 16, kind: input, shape index: {}]   ;;  %s5003_s17 = inlined_call_operand.vmem [shape: f32[16,4], index: 17, kind: input, shape index: {}]   ;;  %s5004_s18 = inlined_call_operand.vmem [shape: f32[1,4], index: 18, kind: input, shape index: {}]   ;;  %s5005_s19 = inlined_call_operand.vmem [shape: f32[8,16], index: 19, kind: input, shape index: {}]   ;;  %s5006_s20 = inlined_call_operand.vmem [shape: f32[8,1], index: 20, kind: input, shape index: {}]   ;;  %s5007_s21 = inlined_call_operand.vmem [shape: f32[2,1,4], index: 21, kind: input, shape index: {}]   ;;  %s5008_s22 = inlined_call_operand.vmem [shape: f32[2,1,4], index: 22, kind: input, shape index: {}]   ;;  %s5009_s23 = inlined_call_operand.hbm [shape: f32[2,16,16], index: 23, kind: output, shape index: {0}]   ;;  %s5010_s24 = inlined_call_operand.vmem [shape: f32[2,8,4], index: 24, kind: output, shape index: {1}]  }
   0x1   :  { %5040 = sst [smem:[#allocation11_spill]] %s4986_s0 }
   0x2   :  { %5041 = sst [smem:[#allocation12_spill]] %s4987_s1 }
   0x3   :  { %5042 = sst [smem:[#allocation13_spill]] %s4988_s2 }
   0x4   :  { %5043 = sst [smem:[#allocation14_spill]] %s4989_s3 }
   0x5   :  { %5044 = sst [smem:[#allocation15_spill]] %s4990_s4 }
   0x6   :  { %5045 = sst [smem:[#allocation16_spill]] %s4991_s5 }
   0x7   :  { %5046 = sst [smem:[#allocation17_spill]] %s4992_s6 }
   0x8   :  { %5047 = sst [smem:[#allocation18_spill]] %s4993_s7 }
   0x9   :  { %5048 = sst [smem:[#allocation19_spill]] %s4994_s8 }
   0xa   :  { %5049 = sst [smem:[#allocation20_spill]] %s4995_s9 }
   0xb   :  { %5050 = sst [smem:[#allocation21_spill]] %s4996_s10 }
   0xc   :  { %5051 = sst [smem:[#allocation22_spill]] %s4997_s11 }
   0xd   :  { %5052 = sst [smem:[#allocation23_spill]] %s4998_s12 }
   0xe   :  { %5053 = sst [smem:[#allocation24_spill]] %s4999_s13 }
   0xf   :  { %5054 = sst [smem:[#allocation25_spill]] %s5000_s14 }
  0x10   :  { %5055 = sst [smem:[#allocation26_spill]] %s5001_s15 }
  0x11   :  { %5056 = sst [smem:[#allocation27_spill]] %s5002_s16 }
  0x12   :  { %5057 = sst [smem:[#allocation28_spill]] %s5009_s23 }
  0x13   :  { %5058 = sst [smem:[#allocation29_spill]] %s5010_s24 }
  0x14   :  { %30 = vsyncpa [#allocation3], 0 }
  0x15   :  { %32 = vsyncpa [#allocation3 + $0x1], 0  ;;  %s4015_s5 = smov 0   ;;  %s4017_s26 = smov 0  }
  0x16   :  { %s4019_s27 = smov 0   ;;  %s4021_s28 = smov 0  }
  0x17 LB: > { %5059 = sst [smem:[#allocation5_spill]] %s3865_s5  ;;  %s4036_s6 = sadd.s32 4294967295, %s3877_s28   ;;  %s3877_s28 = sphi %s4021_s28, %s5099_s28   ;;  %s3873_s27 = sphi %s4019_s27, %s5101_s27   ;;  %s3869_s26 = sphi %s4017_s26, %s5103_s26   ;;  %s3865_s5 = sphi %s4015_s5, %s5102_s5  }
  0x18   : > { %5060 = sst [smem:[#allocation6_spill]] %s3873_s27  ;;  %s3398_s2 = sadd.s32 4294967294, %s3877_s28  }
  0x19   : > { %5061 = sst [smem:[#allocation7_spill]] %s3877_s28  ;;  %s4040_s29 = sadd.s32 1, %s3877_s28  }
  0x1a   : > { %5062 = sst [smem:[#allocation8_spill]] %s4040_s29  ;;  %s548_s0 = sadd.s32 1, %s3873_s27 }
  0x1b   : > { %s545_s7 = ssub.s32 %s3877_s28, %s4040_s29  ;;  %p558_p0 = scmp.ne.s32.totalorder %s3873_s27, %s3869_s26 }
  0x1c   : > { %p546_p1 = scmp.eq.s32.totalorder %s545_s7, 0  ;;  %p559_p2 = scmp.eq.s32.totalorder %s4036_s6, 1 }
  0x1d   : > { %p564_p3 = scmp.ne.s32.totalorder %s3869_s26, %s3865_s5  ;;  %p565_p4 = scmp.eq.s32.totalorder %s3398_s2, 1 }
  0x1e   : > { %s4051_s30 = scalar_select %p546_p1, %s3873_s27, %s548_s0  }
  0x1f   : > { %p4053_p5 = por %p559_p2, %p558_p0  ;;  %p4057_p6 = por %p565_p4, %p564_p3 }
  0x20   : > { %5063 = sst [smem:[#allocation9_spill]] %s4051_s30  ;;  %p3401_p7 = scmp.ge.s32.totalorder %s3877_s28, 1 }
  0x21   : > { %s5065_s25 = scalar_select %p4057_p6, 1, 0 }
  0x22   : > { %p692_p8 = scmp.lt.s32.totalorder %s3877_s28, 3 }
  0x23   : > { %5066 = sst [smem:[#allocation10_spill]] %s5065_s25 }
  0x24   : > { %p693_p9 = pnand %p3401_p7, %p692_p8 }
  0x25   : > { %s5067_s1 = sld [smem:[#allocation15_spill]] (!%p693_p9)  ;;  %p771_p10 = scmp.lt.s32.totalorder (!%p693_p9), %s4036_s6, 1 }
  0x26   : > { %696 = sbr.rel (%p693_p9) target bundleno = 5396 (0x1514), region = 112  ;;  %s5068_s27 = sld [smem:[#allocation14_spill]] (!%p693_p9) }
  0x27   : > { %s5070_s25 = sld [smem:[#allocation16_spill]] (!%p693_p9)  ;;  %s5028_s2 = smov (!%p693_p9), 104  }
  0x28   : > { %s5071_s30 = sld [smem:[#allocation11_spill]] (!%p693_p9)  ;;  %s5024_s24 = smov (!%p693_p9), 120  }
  0x29   : > { %s5073_s28 = sld [smem:[#allocation17_spill]] (!%p693_p9)  ;;  %s5030_s5 = smov (!%p693_p9), 112  }
  0x2a   : > { %s5076_s8 = sld [smem:[#allocation13_spill]] (!%p693_p9) }
  0x2b   : > { %v796_v0 = vld [vmem:[%s5067_s1 + $0x8] sm:$0xff]  ;;  %vm797_vm0 = vcmask 64512   ;;  %v795_v1 = vld [vmem:[%s5067_s1] sm:$0xff]  ;;  %vm839_vm1 = vcmask 130048   ;;  %s4093_s0 = scalar_select %p771_p10, %s4036_s6, 1  ;;  %vm1164_vm10 = vcmask 261120  }
  0x2c   : > { %3551 = vmatpush.xpose.msk.msra.mxu3 %vm797_vm0, %v796_v0  ;;  %3406 = vmatpush.xpose.msk.msra.mxu0 %vm797_vm0, %v796_v0  ;;  %s5069_s29 = smov %s5068_s27  ;;  %v794_v2 = vld [vmem:[%s5068_s27 + $0x8] sm:$0xff]  ;;  %s5077_s9 = sld [smem:[#allocation20_spill]] }
  0x2d   : > { %v793_v3 = vld [vmem:[%s5069_s29] sm:$0xff]  ;;  %v891_v24 = vld [vmem:[%s5070_s25 + $0x18] sm:$0xff]  ;;  %v890_v25 = vld [vmem:[%s5070_s25 + $0x10] sm:$0xff]  ;;  %s3549_s7 = sshll.u32 %s4093_s0, 4  ;;  %s5080_s10 = sld [smem:[#allocation21_spill]] }
  0x2e   : > { %955 = vmatpush.msra.mxu2 %v891_v24  ;;  %s775_s4 = scalar_lea.vmem %s5071_s30, %s3549_s7  ;;  %v889_v52 = vld [vmem:[%s5070_s25 + $0x8] sm:$0xff]  ;;  %v888_v53 = vld [vmem:[%s5070_s25] sm:$0xff]  ;;  %s5072_s30 = sld [smem:[#allocation18_spill]] }
  0x2f   : > { %v789_v50 = vld [vmem:[%s775_s4] sm:$0xff]  ;;  %v790_v51 = vld [vmem:[%s775_s4 + $0x8] sm:$0xff]  ;;  %s5074_s7 = smov %s5073_s28  ;;  %s5075_s4 = sld [smem:[#allocation19_spill]] }
  0x30   : > { %3552 = vmatpush.xpose.msk.msra.mxu3 %vm797_vm0, %v795_v1  ;;  %3407 = vmatpush.xpose.msk.msra.mxu0 %vm797_vm0, %v795_v1  ;;  %v894_v54 = vmul.f32 0.05, %v789_v50  ;;  %v895_v58 = vmul.f32 0.05, %v790_v51  ;;  %v893_v62 = vld [vmem:[%s5070_s25 + $0x28] sm:$0xff]  ;;  %v892_v63 = vld [vmem:[%s5070_s25 + $0x20] sm:$0xff] }
  0x31   : > { %956 = vmatpush.msra.mxu2 %v890_v25  ;;  %s5081_s11 = sld [smem:[#allocation22_spill]]  ;;  %s5087_s27 = smov 120  }
  0x32   : > { %s5082_s15 = sld [smem:[#allocation26_spill]] }
  0x33   : > { %3409 = vmatmul.msk.f32.vlgmr.msra.gmra.mxu3 %vm797_vm0, %v794_v2  ;;  %3408 = vmatmul.msk.f32.vlgmr.msra.gmra.mxu0 %vm797_vm0, %v793_v3  ;;  %s5083_s13 = sld [smem:[#allocation24_spill]] }
  0x34   : > { %978 = vmatpush.msrb.mxu3 %v889_v52  ;;  %s5084_s12 = sld [smem:[#allocation23_spill]] }
  0x35   : > { %s5090_s14 = sld [smem:[#allocation25_spill]] }
  0x36   : > { %979 = vmatpush.msrb.mxu3 %v888_v53  ;;  %s5092_s16 = sld [smem:[#allocation27_spill]] }
  0x38   : > { %1034 = vmatpush.msra.mxu3 %v893_v62 }
  0x3a   : > { %1035 = vmatpush.msra.mxu3 %v892_v63 }
  0x3b   : > { %3416 = vmatmul.msk.f32.vlgmr.msrb.gmra.mxu3 %vm839_vm1, %v789_v50 }
  0x43   : > { %3417 = vmatmul.msk.f32.gmra.mxu3 %vm839_vm1, %v790_v51 }
  0xb0   : > { %v827_v4 = vpop.f32.mrf.mxu0 }
  0xb1   : > { %v833_v7 = vmul.f32 3.0, %v827_v4 }
  0xb6   : > { %v830_v5 = vpop.f32.mrf.mxu3 }
  0xb7   : > { %v834_v6 = vmul.f32 3.0, %v830_v5 }
  0xb9   : > { %3658 = vtanh.f32 %v834_v6 }
  0xba   : > { %3660 = vtanh.f32 %v833_v7 }
  0xbf   : > { %v3659_v8 = vpop.eup %3658 }
  0xc0   : > { %v838_v9 = vmax.f32 %v3659_v8, 0.0  ;;  %v3661_v10 = vpop.eup %3660  ;;  %v1056_v8 = vld [vmem:[%s5072_s30 + $0x8] sm:$0xff] }
  0xc1   : > { %v837_v12 = vmax.f32 %v3661_v10, 0.0  ;;  %1084 = vmatpush.msrb.mxu0 %v1056_v8  ;;  %v981_v10 = vpop.f32.mrf.mxu3 }
  0xc2   : > { %v843_v11 = vsel %vm839_vm1, %v838_v9, -inf }
  0xc3   : > { %844 = vmax.xlane.f32.xlu0 %v843_v11  ;;  %v840_v13 = vsel %vm839_vm1, %v837_v12, -inf }
  0xc9   : > { %v984_v11 = vpop.f32.mrf.mxu3 }
  0xcb   : > { %841 = vmax.xlane.f32.xlu0 %v840_v13  ;;  %v3646_v13 = vld [vmem:[%s5073_s28] ss:$0 sm:$0xff]  ;;  %s5026_s28 = smov 88  }
 0x136   : > { %v845_v14 = vpop.xlane.xlu0 %844 }
 0x137   : > { %v847_v15 = vsub.f32 %v838_v9, %v845_v14  ;;  %v1055_v9 = vld [vmem:[%s5072_s30] sm:$0xff] }
 0x138   : > { %1085 = vmatpush.msrb.mxu0 %v1055_v9 }
 0x139   : > { %v850_v16 = vmul.f32 1.442695, %v847_v15 }
 0x13b   : > { %3662 = vpow2.f32 %v850_v16 }
 0x13e   : > { %v842_v17 = vpop.xlane.xlu0 %841 }
 0x13f   : > { %v846_v18 = vsub.f32 %v837_v12, %v842_v17 }
 0x141   : > { %v3663_v19 = vpop.eup %3662  ;;  %v848_v20 = vmul.f32 1.442695, %v846_v18 }
 0x142   : > { %v855_v21 = vsel %vm839_vm1, %v3663_v19, 0.0 }
 0x143   : > { %3664 = vpow2.f32 %v848_v20  ;;  %856 = vadd.xlane.f32.xlu1 %v855_v21  ;;  %v3879_v21 = vmov 0.0  }
 0x149   : > { %v3665_v22 = vpop.eup %3664 }
 0x14a   : > { %v852_v23 = vsel %vm839_vm1, %v3665_v22, 0.0 }
 0x14b   : > { %853 = vadd.xlane.f32.xlu1 %v852_v23 }
 0x1b6   : > { %v857_v26 = vpop.xlane.xlu1 %856 }
 0x1b7   : > { %3666 = vrcp.f32 %v857_v26  ;;  %v884_v31 = vand.u32 2147483648, %v857_v26  ;;  %v882_v33 = vand.u32 2147483647, %v857_v26  ;;  %vm878_vm3 = vweird.f32 %v857_v26 }
 0x1b9   : > { %v885_v36 = vor.u32 1.1754944e-38, %v884_v31  ;;  %vm883_vm5 = vcmp.eq.f32.partialorder %v882_v33, 8.507059e+37 }
 0x1bd   : > { %v3667_v27 = vpop.eup %3666 }
 0x1be   : > { %v874_v28 = vmul.f32 %v3667_v27, %v857_v26  ;;  %v854_v29 = vpop.xlane.xlu1 %853  ;;  %vm879_vm2 = vweird.f32 %v3667_v27 }
 0x1bf   : > { %3668 = vrcp.f32 %v854_v29  ;;  %vm880_vm4 = vmor %vm878_vm3, %vm879_vm2  ;;  %v869_v42 = vand.u32 2147483648, %v854_v29  ;;  %v867_v44 = vand.u32 2147483647, %v854_v29  ;;  %vm863_vm7 = vweird.f32 %v854_v29 }
 0x1c0   : > { %v875_v30 = vsub.f32 1.0, %v874_v28 }
 0x1c1   : > { %v870_v46 = vor.u32 1.1754944e-38, %v869_v42  ;;  %vm868_vm9 = vcmp.eq.f32.partialorder %v867_v44, 8.507059e+37 }
 0x1c2   : > { %v876_v32 = vmul.f32 %v3667_v27, %v875_v30 }
 0x1c4   : > { %v877_v34 = vadd.f32 %v3667_v27, %v876_v32 }
 0x1c5   : > { %v3669_v35 = vpop.eup %3668 }
 0x1c6   : > { %v859_v37 = vmul.f32 %v3669_v35, %v854_v29  ;;  %v881_v38 = vsel %vm880_vm4, %v3667_v27, %v877_v34  ;;  %vm864_vm6 = vweird.f32 %v3669_v35 }
 0x1c7   : > { %v886_v39 = vsel %vm883_vm5, %v885_v36, %v881_v38  ;;  %vm865_vm8 = vmor %vm863_vm7, %vm864_vm6 }
 0x1c8   : > { %v860_v40 = vsub.f32 1.0, %v859_v37  ;;  %v887_v41 = vmul.f32 %v3663_v19, %v886_v39 }
 0x1ca   : > { %v861_v43 = vmul.f32 %v3669_v35, %v860_v40  ;;  %3410 = vmatpush.xpose.msk.msra.mxu1 %vm839_vm1, %v887_v41  ;;  %3418 = vmatpush.xpose.msk.msrb.mxu2 %vm839_vm1, %v887_v41 }
 0x1cc   : > { %v862_v45 = vadd.f32 %v3669_v35, %v861_v43  ;;  %v4190_v43 = vld [vmem:[%s5076_s8] sm:$0xff] }
 0x1ce   : > { %v866_v47 = vsel %vm865_vm8, %v3669_v35, %v862_v45 }
 0x1cf   : > { %v871_v48 = vsel %vm868_vm9, %v870_v46, %v866_v47  ;;  %v4197_v47 = vld [vmem:[%s5076_s8 + $0x8] sm:$0xff] }
 0x1d0   : > { %v872_v49 = vmul.f32 %v3665_v22, %v871_v48  ;;  %v3647_v22 = vld [vmem:[%s5075_s4] ss:$0 sm:$0xff] }
 0x1d2   : > { %3411 = vmatpush.xpose.msk.msra.mxu1 %vm839_vm1, %v872_v49  ;;  %3419 = vmatpush.xpose.msk.msrb.mxu2 %vm839_vm1, %v872_v49 }
 0x1d5   : > { %3412 = vmatmul.msk.f32.vlgmr.msra.gmra.mxu1 %vm839_vm1, %v789_v50 }
 0x1dd   : > { %3413 = vmatmul.msk.f32.gmra.mxu1 %vm839_vm1, %v790_v51  ;;  %v4204_v51 = vld [vmem:[%s5076_s8 + $0x10] sm:$0xff] }
 0x252   : > { %v925_v55 = vpop.f32.mrf.mxu1 }
 0x253   : > { %v931_v56 = vmul.f32 0.95, %v925_v55  ;;  %v4211_v55 = vld [vmem:[%s5076_s8 + $0x18] sm:$0xff] }
 0x255   : > { %v933_v57 = vadd.f32 %v931_v56, %v894_v54 }
 0x257   : > { %3414 = vmatmul.msk.f32.vlgmr.msra.gmra.mxu2 %vm839_vm1, %v933_v57 }
 0x25a   : > { %v928_v59 = vpop.f32.mrf.mxu1 }
 0x25b   : > { %v932_v60 = vmul.f32 0.95, %v928_v59 }
 0x25d   : > { %v934_v61 = vadd.f32 %v932_v60, %v895_v58 }
 0x25f   : > { %3415 = vmatmul.msk.f32.gmra.mxu2 %vm839_vm1, %v934_v61 }
 0x267   : > { %3420 = vmatmul.msk.f32.vlgmr.msrb.gmra.mxu2 %vm839_vm1, %v933_v57 }
 0x26f   : > { %3421 = vmatmul.msk.f32.gmra.mxu2 %vm839_vm1, %v934_v61 }
 0x2da   : > { %v958_v0 = vpop.f32.mrf.mxu2 }
 0x2db   : > { %v982_v12 = vadd.f32 %v981_v10, %v958_v0 }
 0x2e2   : > { %v961_v1 = vpop.f32.mrf.mxu2 }
 0x2e3   : > { %v985_v17 = vadd.f32 %v984_v11, %v961_v1 }
 0x2ea   : > { %v1004_v2 = vpop.f32.mrf.mxu2 }
 0x2eb   : > { %v1010_v3 = vmul.f32 0.95, %v1004_v2 }
 0x2ed   : > { %v1012_v4 = vadd.f32 %v1010_v3, %v894_v54 }
 0x2ef   : > { %3422 = vmatmul.msk.f32.vlgmr.msra.gmra.mxu3 %vm839_vm1, %v1012_v4 }
 0x2f2   : > { %v1007_v5 = vpop.f32.mrf.mxu2 }
 0x2f3   : > { %v1011_v6 = vmul.f32 0.95, %v1007_v5 }
 0x2f5   : > { %v1013_v7 = vadd.f32 %v1011_v6, %v895_v58 }
 0x2f7   : > { %3423 = vmatmul.msk.f32.gmra.mxu3 %vm839_vm1, %v1013_v7 }
 0x372   : > { %v1037_v14 = vpop.f32.mrf.mxu3 }
 0x373   : > { %v1043_v15 = vadd.f32 %v1037_v14, %v982_v12 }
 0x375   : > { %v4134_v16 = vadd.f32 %v3646_v13, %v1043_v15 }
 0x377   : > { %3424 = vmatmul.msk.f32.vlgmr.msrb.gmra.mxu0 %vm839_vm1, %v4134_v16 }
 0x37a   : > { %v1040_v18 = vpop.f32.mrf.mxu3 }
 0x37b   : > { %v1044_v19 = vadd.f32 %v1040_v18, %v985_v17 }
 0x37d   : > { %v4138_v20 = vadd.f32 %v3646_v13, %v1044_v19 }
 0x37f   : > { %3425 = vmatmul.msk.f32.gmra.mxu0 %vm839_vm1, %v4138_v20 }
 0x387   : > { %1092 = vmatmul.f32.gmra.mxu0 %v3879_v21 }
 0x38f   : > { %1095 = vmatmul.f32.gmra.mxu0 %v3879_v21 }
 0x3f4   : > { %v1087_v23 = vpop.f32.mrf.mxu0 }
 0x3f5   : > { %v4147_v24 = vadd.f32 %v3647_v22, %v1087_v23 }
 0x3f7   : > { %1323 = vrot.lane.b32.xlu1 %v4147_v24, %s5028_s2  ;;  %v4165_v32 = vmul.f32 0.35355338, %v4147_v24 }
 0x3fc   : > { %v1090_v25 = vpop.f32.mrf.mxu0 }
 0x3fd   : > { %v4151_v26 = vadd.f32 %v3647_v22, %v1090_v25 }
 0x3ff   : > { %1325 = vrot.lane.b32.xlu0 %v4151_v26, %s5028_s2  ;;  %v4170_v33 = vmul.f32 0.35355338, %v4151_v26  ;;  %v4218_v59 = vpack.i.bf16 %v4147_v24, %v4151_v26 }
 0x404   : > { %v1093_v27 = vpop.f32.mrf.mxu0 }
 0x405   : > { %v4160_v31 = vadd.f32 %v3647_v22, %v1093_v27 }
 0x407   : > { %v4175_v34 = vmul.f32 0.35355338, %v4160_v31 }
 0x40c   : > { %v1096_v28 = vpop.f32.mrf.mxu0 }
 0x40d   : > { %v1097_v29 = vadd.f32 %v3647_v22, %v1096_v28 }
 0x40f   : > { %1329 = vrot.lane.b32.xlu2 %v1097_v29, %s5028_s2  ;;  %v4156_v30 = vmul.f32 0.35355338, %v1097_v29  ;;  %v4223_v60 = vpack.i.bf16 %v4160_v31, %v1097_v29 }
 0x411   : > { %1321 = vrot.lane.b32.xlu0 %v4156_v30, %s5024_s24 }
 0x417   : > { %1327 = vrot.lane.b32.xlu2 %v4160_v31, %s5028_s2  ;;  %s5033_s2 = smov 96  }
 0x41f   : > { %1315 = vrot.lane.b32.xlu2 %v4165_v32, %s5024_s24 }
 0x427   : > { %1317 = vrot.lane.b32.xlu2 %v4170_v33, %s5024_s24 }
 0x42f   : > { %1319 = vrot.lane.b32.xlu2 %v4175_v34, %s5024_s24  ;;  %s5086_s24 = smov 104  }
 0x469   : > { %v1330_v35 = vpop.permute.xlu2 %1329  ;;  %v1324_v38 = vpop.permute.xlu1 %1323 }
 0x46a   : > { %3438 = vmatpush.xpose.msk.msrb.mxu3 %vm797_vm0, %v1330_v35 }
 0x471   : > { %v1328_v36 = vpop.permute.xlu2 %1327  ;;  %v1326_v37 = vpop.permute.xlu0 %1325 }
 0x472   : > { %3439 = vmatpush.xpose.msk.msrb.mxu3 %vm797_vm0, %v1328_v36 }
 0x476   : > { %3440 = vmatpush.xpose.msk.msrb.mxu3 %vm797_vm0, %v1326_v37 }
 0x479   : > { %v1316_v39 = vpop.permute.xlu2 %1315 }
 0x47a   : > { %3441 = vmatpush.xpose.msk.msrb.mxu3 %vm797_vm0, %v1324_v38 }
 0x47d   : > { %3442 = vmatmul.msk.f32.vlgmr.msrb.gmra.mxu3 %vm797_vm0, %v1316_v39 }
 0x481   : > { %v1318_v40 = vpop.permute.xlu2 %1317 }
 0x483   : > { %v1322_v42 = vpop.permute.xlu0 %1321 }
 0x485   : > { %3443 = vmatmul.msk.f32.gmra.mxu3 %vm797_vm0, %v1318_v40 }
 0x489   : > { %v1320_v41 = vpop.permute.xlu2 %1319 }
 0x48d   : > { %3444 = vmatmul.msk.f32.gmra.mxu3 %vm797_vm0, %v1320_v41 }
 0x495   : > { %3445 = vmatmul.msk.f32.gmra.mxu3 %vm797_vm0, %v1322_v42 }
 0x500   : > { %v1364_v44 = vpop.f32.mrf.mxu3 }
 0x501   : > { %v1365_v45 = vadd.f32 %v1364_v44, %v4190_v43 }
 0x503   : > { %v1376_v46 = vsel %vm1164_vm10, %v1365_v45, -inf }
 0x504   : > { %1377 = vmax.xlane.f32.xlu2 %v1376_v46 }
 0x508   : > { %v1367_v48 = vpop.f32.mrf.mxu3 }
 0x509   : > { %v1368_v49 = vadd.f32 %v1367_v48, %v4197_v47 }
 0x50b   : > { %v1379_v50 = vsel %vm1164_vm10, %v1368_v49, -inf }
 0x50c   : > { %1380 = vmax.xlane.f32.xlu1 %v1379_v50 }
 0x510   : > { %v1370_v52 = vpop.f32.mrf.mxu3 }
 0x511   : > { %v1371_v53 = vadd.f32 %v1370_v52, %v4204_v51 }
 0x513   : > { %v1382_v54 = vsel %vm1164_vm10, %v1371_v53, -inf }
 0x514   : > { %1383 = vmax.xlane.f32.xlu0 %v1382_v54 }
 0x518   : > { %v1373_v56 = vpop.f32.mrf.mxu3 }
 0x519   : > { %v1374_v57 = vadd.f32 %v1373_v56, %v4211_v55 }
 0x51b   : > { %v1385_v58 = vsel %vm1164_vm10, %v1374_v57, -inf }
 0x51c   : > { %1386 = vmax.xlane.f32.xlu2 %v1385_v58 }
 0x525   : > { %1113 = vrot.lane.b32.xlu1 %v1097_v29, %s5030_s5 }
 0x528   : > { %3609 = vrot.lane.b32.xlu0 %v4218_v59, %s5026_s28 }
 0x534   : > { %3604 = vrot.lane.b32.xlu2 %v4223_v60, %s5026_s28  ;;  %s5089_s28 = smov 88  }
 0x577   : > { %v1378_v61 = vpop.xlane.xlu2 %1377 }
 0x578   : > { %v1388_v62 = vsub.f32 %v1365_v45, %v1378_v61 }
 0x57a   : > { %v1392_v63 = vmul.f32 1.442695, %v1388_v62 }
 0x57c   : > { %3670 = vpow2.f32 %v1392_v63 }
 0x57f   : > { %v1381_v0 = vpop.xlane.xlu1 %1380 }
 0x580   : > { %v1389_v1 = vsub.f32 %v1368_v49, %v1381_v0 }
 0x582   : > { %v3671_v2 = vpop.eup %3670  ;;  %v1394_v3 = vmul.f32 1.442695, %v1389_v1 }
 0x583   : > { %v1400_v4 = vsel %vm1164_vm10, %v3671_v2, 0.0 }
 0x584   : > { %3672 = vpow2.f32 %v1394_v3  ;;  %1401 = vadd.xlane.f32.xlu1 %v1400_v4 }
 0x587   : > { %v1384_v5 = vpop.xlane.xlu0 %1383 }
 0x588   : > { %v1390_v6 = vsub.f32 %v1371_v53, %v1384_v5 }
 0x58a   : > { %v4228_v7 = vpop.eup %3672  ;;  %v1396_v8 = vmul.f32 1.442695, %v1390_v6 }
 0x58b   : > { %v1403_v9 = vsel %vm1164_vm10, %v4228_v7, 0.0 }
 0x58c   : > { %3674 = vpow2.f32 %v1396_v8  ;;  %1404 = vadd.xlane.f32.xlu0 %v1403_v9 }
 0x58f   : > { %v1387_v10 = vpop.xlane.xlu2 %1386 }
 0x590   : > { %v1391_v11 = vsub.f32 %v1374_v57, %v1387_v10 }
 0x592   : > { %v4232_v12 = vpop.eup %3674  ;;  %v1398_v13 = vmul.f32 1.442695, %v1391_v11 }
 0x593   : > { %v1406_v14 = vsel %vm1164_vm10, %v4232_v12, 0.0 }
 0x594   : > { %3676 = vpow2.f32 %v1398_v13  ;;  %1407 = vadd.xlane.f32.xlu1 %v1406_v14 }
 0x597   : > { %v1114_v15 = vpop.permute.xlu1 %1113  ;;  %v3605_v17 = vpop.permute.xlu2 %3604 }
 0x598   : > { %v3606_v18 = vunpack.i.l.bf16 %v3605_v17  ;;  %3426 = vmatpush.xpose.msk.msrb.mxu1 %vm797_vm0, %v1114_v15  ;;  %v3607_v22 = vunpack.i.h.bf16 %v3605_v17 }
 0x59a   : > { %v4237_v19 = vpop.eup %3676  ;;  %v3610_v23 = vpop.permute.xlu0 %3609  ;;  %1508 = vmatpush.msra.mxu0 %v3606_v18 }
 0x59b   : > { %v3611_v25 = vunpack.i.l.bf16 %v3610_v23  ;;  %v1409_v27 = vsel %vm1164_vm10, %v4237_v19, 0.0  ;;  %v3612_v28 = vunpack.i.h.bf16 %v3610_v23 }
 0x59c   : > { %1410 = vadd.xlane.f32.xlu2 %v1409_v27  ;;  %1509 = vmatpush.msra.mxu0 %v3607_v22 }
 0x59e   : > { %1510 = vmatpush.msra.mxu0 %v3611_v25 }
 0x5a0   : > { %1111 = vrot.lane.b32.xlu0 %v4160_v31, %s5030_s5  ;;  %1511 = vmatpush.msra.mxu0 %v3612_v28 }
 0x5a8   : > { %1109 = vrot.lane.b32.xlu0 %v4151_v26, %s5030_s5 }
 0x5ad   : > { %1107 = vrot.lane.b32.xlu1 %v4147_v24, %s5030_s5 }
 0x5f7   : > { %v1402_v29 = vpop.xlane.xlu1 %1401 }
 0x5f8   : > { %3678 = vrcp.f32 %v1402_v29  ;;  %v1423_v39 = vand.u32 2147483648, %v1402_v29  ;;  %v1421_v41 = vand.u32 2147483647, %v1402_v29  ;;  %vm1417_vm12 = vweird.f32 %v1402_v29 }
 0x5fa   : > { %v1424_v44 = vor.u32 1.1754944e-38, %v1423_v39  ;;  %vm1422_vm14 = vcmp.eq.f32.partialorder %v1421_v41, 8.507059e+37 }
 0x5fe   : > { %v3679_v35 = vpop.eup %3678 }
 0x5ff   : > { %v1413_v36 = vmul.f32 %v3679_v35, %v1402_v29  ;;  %v1405_v37 = vpop.xlane.xlu0 %1404  ;;  %vm1418_vm11 = vweird.f32 %v3679_v35 }
 0x600   : > { %3680 = vrcp.f32 %v1405_v37  ;;  %vm1419_vm13 = vmor %vm1417_vm12, %vm1418_vm11  ;;  %v1438_v50 = vand.u32 2147483648, %v1405_v37  ;;  %v1436_v53 = vand.u32 2147483647, %v1405_v37  ;;  %vm1432_vm2 = vweird.f32 %v1405_v37 }
 0x601   : > { %v1414_v38 = vsub.f32 1.0, %v1413_v36 }
 0x602   : > { %v1439_v57 = vor.u32 1.1754944e-38, %v1438_v50  ;;  %vm1437_vm4 = vcmp.eq.f32.partialorder %v1436_v53, 8.507059e+37 }
 0x603   : > { %v1415_v40 = vmul.f32 %v3679_v35, %v1414_v38 }
 0x605   : > { %v1416_v42 = vadd.f32 %v3679_v35, %v1415_v40 }
 0x606   : > { %v3681_v31 = vpop.eup %3680 }
 0x607   : > { %v1420_v26 = vsel %vm1419_vm13, %v3679_v35, %v1416_v42  ;;  %v1428_v45 = vmul.f32 %v3681_v31, %v1405_v37  ;;  %v1408_v24 = vpop.xlane.xlu1 %1407  ;;  %vm1433_vm15 = vweird.f32 %v3681_v31  ;;  %v1525_v35 = vld [vmem:[%s5077_s9 + $0x8] sm:$0xff]  ;;  %v3474_v37 = vld [vmem:[%s5070_s25 + $0x30] sm:$0xff] }
 0x608   : > { %v1425_v46 = vsel %vm1422_vm14, %v1424_v44, %v1420_v26  ;;  %3682 = vrcp.f32 %v1408_v24  ;;  %vm1434_vm3 = vmor %vm1432_vm2, %vm1433_vm15  ;;  %v1451_v5 = vand.u32 2147483647, %v1408_v24  ;;  %vm1447_vm6 = vweird.f32 %v1408_v24  ;;  %v3466_v42 = vld [vmem:[%s5069_s29 + $0x10] sm:$0xff] }
 0x609   : > { %v1429_v48 = vsub.f32 1.0, %v1428_v45  ;;  %v1426_v49 = vmul.f32 %v3671_v2, %v1425_v46  ;;  %v1453_v2 = vand.u32 2147483648, %v1408_v24 }
 0x60a   : > { %vm1452_vm8 = vcmp.eq.f32.partialorder %v1451_v5, 8.507059e+37 }
 0x60b   : > { %v1430_v52 = vmul.f32 %v3681_v31, %v1429_v48  ;;  %3446 = vmatmul.msk.f32.vlgmr.msra.gmra.mxu0 %vm1164_vm10, %v1426_v49  ;;  %v1454_v9 = vor.u32 1.1754944e-38, %v1453_v2 }
 0x60d   : > { %v1431_v54 = vadd.f32 %v3681_v31, %v1430_v52 }
 0x60e   : > { %v3683_v56 = vpop.eup %3682 }
 0x60f   : > { %v1443_v58 = vmul.f32 %v3683_v56, %v1408_v24  ;;  %v1411_v61 = vpop.xlane.xlu2 %1410  ;;  %v1435_v62 = vsel %vm1434_vm3, %v3681_v31, %v1431_v54  ;;  %vm1448_vm5 = vweird.f32 %v3683_v56 }
 0x610   : > { %3684 = vrcp.f32 %v1411_v61  ;;  %v1440_v63 = vsel %vm1437_vm4, %v1439_v57, %v1435_v62  ;;  %vm1449_vm7 = vmor %vm1447_vm6, %vm1448_vm5  ;;  %v1468_v15 = vand.u32 2147483648, %v1411_v61  ;;  %v1466_v22 = vand.u32 2147483647, %v1411_v61 }
 0x611   : > { %v1444_v0 = vsub.f32 1.0, %v1443_v58  ;;  %v1441_v1 = vmul.f32 %v4228_v7, %v1440_v63  ;;  %vm1462_vm11 = vweird.f32 %v1411_v61 }
 0x612   : > { %v1112_v3 = vpop.permute.xlu0 %1111  ;;  %v1469_v25 = vor.u32 1.1754944e-38, %v1468_v15  ;;  %vm1467_vm13 = vcmp.eq.f32.partialorder %v1466_v22, 8.507059e+37 }
 0x613   : > { %v1445_v4 = vmul.f32 %v3683_v56, %v1444_v0  ;;  %3427 = vmatpush.xpose.msk.msrb.mxu1 %vm797_vm0, %v1112_v3  ;;  %3447 = vmatmul.msk.f32.gmra.mxu0 %vm1164_vm10, %v1441_v1 }
 0x615   : > { %v1446_v6 = vadd.f32 %v3683_v56, %v1445_v4 }
 0x616   : > { %v3685_v8 = vpop.eup %3684 }
 0x617   : > { %v1458_v10 = vmul.f32 %v3685_v8, %v1411_v61  ;;  %v1450_v11 = vsel %vm1449_vm7, %v3683_v56, %v1446_v6  ;;  %vm1463_vm9 = vweird.f32 %v3685_v8 }
 0x618   : > { %v1455_v13 = vsel %vm1452_vm8, %v1454_v9, %v1450_v11  ;;  %vm1464_vm12 = vmor %vm1462_vm11, %vm1463_vm9 }
 0x619   : > { %v1459_v14 = vsub.f32 1.0, %v1458_v10  ;;  %v1456_v7 = vmul.f32 %v4232_v12, %v1455_v13 }
 0x61a   : > { %v1110_v17 = vpop.permute.xlu0 %1109 }
 0x61b   : > { %v1460_v18 = vmul.f32 %v3685_v8, %v1459_v14  ;;  %3428 = vmatpush.xpose.msk.msrb.mxu1 %vm797_vm0, %v1110_v17  ;;  %3448 = vmatmul.msk.f32.gmra.mxu0 %vm1164_vm10, %v1456_v7 }
 0x61d   : > { %v1461_v23 = vadd.f32 %v3685_v8, %v1460_v18 }
 0x61f   : > { %v1108_v27 = vpop.permute.xlu1 %1107  ;;  %v1465_v28 = vsel %vm1464_vm12, %v3685_v8, %v1461_v23 }
 0x620   : > { %3429 = vmatpush.xpose.msk.msrb.mxu1 %vm797_vm0, %v1108_v27  ;;  %v1470_v29 = vsel %vm1467_vm13, %v1469_v25, %v1465_v28 }
 0x621   : > { %v1471_v12 = vmul.f32 %v4237_v19, %v1470_v29  ;;  %v3475_v19 = vld [vmem:[%s5070_s25 + $0x38] sm:$0xff] }
 0x623   : > { %3430 = vmatmul.msk.f32.vlgmr.msrb.gmra.mxu1 %vm797_vm0, %v4165_v32  ;;  %3449 = vmatmul.msk.f32.gmra.mxu0 %vm1164_vm10, %v1471_v12  ;;  %v3469_v32 = vld [vmem:[%s5067_s1 + $0x18] sm:$0xff] }
 0x624   : > { %1553 = vmatpush.msra.mxu1 %v1525_v35 }
 0x626   : > { %3470 = vmatpush.xpose.msk.msrb.mxu1 %vm797_vm0, %v3469_v32 }
 0x62b   : > { %3431 = vmatmul.msk.f32.gmra.mxu1 %vm797_vm0, %v4170_v33  ;;  %v3468_v33 = vld [vmem:[%s5067_s1 + $0x10] sm:$0xff] }
 0x62c   : > { %3471 = vmatpush.xpose.msk.msrb.mxu1 %vm797_vm0, %v3468_v33 }
 0x633   : > { %3432 = vmatmul.msk.f32.gmra.mxu1 %vm797_vm0, %v4175_v34 }
 0x63b   : > { %3433 = vmatmul.msk.f32.gmra.mxu1 %vm797_vm0, %v4156_v30 }
 0x688   : > { %v1513_v34 = vpop.f32.mrf.mxu0 }
 0x689   : > { %3450 = vmatmul.msk.f32.vlgmr.msra.gmra.mxu1 %vm797_vm0, %v1513_v34 }
 0x68a   : > { %2165 = vmatpush.msra.mxu1 %v3475_v19 }
 0x68c   : > { %2166 = vmatpush.msra.mxu1 %v3474_v37 }
 0x690   : > { %v1516_v30 = vpop.f32.mrf.mxu0 }
 0x691   : > { %3451 = vmatmul.msk.f32.gmra.mxu1 %vm797_vm0, %v1516_v30 }
 0x698   : > { %v1519_v36 = vpop.f32.mrf.mxu0 }
 0x699   : > { %3452 = vmatmul.msk.f32.gmra.mxu1 %vm797_vm0, %v1519_v36 }
 0x6a0   : > { %v1152_v38 = vpop.f32.mrf.mxu1  ;;  %v1522_v39 = vpop.f32.mrf.mxu0 }
 0x6a1   : > { %v1153_v40 = vadd.f32 %v1152_v38, %v4190_v43  ;;  %3453 = vmatmul.msk.f32.gmra.mxu1 %vm797_vm0, %v1522_v39  ;;  %v3467_v43 = vld [vmem:[%s5069_s29 + $0x18] sm:$0xff] }
 0x6a3   : > { %v1165_v41 = vsel %vm1164_vm10, %v1153_v40, -inf }
 0x6a4   : > { %1166 = vmax.xlane.f32.xlu0 %v1165_v41 }
 0x6a8   : > { %v1155_v31 = vpop.f32.mrf.mxu1 }
 0x6a9   : > { %v1156_v44 = vadd.f32 %v1155_v31, %v4197_v47  ;;  %3472 = vmatmul.msk.f32.vlgmr.msrb.gmra.mxu1 %vm797_vm0, %v3466_v42 }
 0x6ab   : > { %v1168_v26 = vsel %vm1164_vm10, %v1156_v44, -inf }
 0x6ac   : > { %1169 = vmax.xlane.f32.xlu1 %v1168_v26 }
 0x6b0   : > { %v1158_v45 = vpop.f32.mrf.mxu1 }
 0x6b1   : > { %v1159_v24 = vadd.f32 %v1158_v45, %v4204_v51  ;;  %3473 = vmatmul.msk.f32.gmra.mxu1 %vm797_vm0, %v3467_v43 }
 0x6b3   : > { %v1171_v46 = vsel %vm1164_vm10, %v1159_v24, -inf }
 0x6b4   : > { %1172 = vmax.xlane.f32.xlu2 %v1171_v46 }
 0x6b8   : > { %v1161_v48 = vpop.f32.mrf.mxu1 }
 0x6b9   : > { %v1162_v47 = vadd.f32 %v1161_v48, %v4211_v55  ;;  %3486 = vmatmul.msk.f32.vlgmr.msra.gmra.mxu1 %vm839_vm1, %v4134_v16 }
 0x6bb   : > { %v1174_v49 = vsel %vm1164_vm10, %v1162_v47, -inf }
 0x6bc   : > { %1175 = vmax.xlane.f32.xlu2 %v1174_v49 }
 0x6c1   : > { %3487 = vmatmul.msk.f32.gmra.mxu1 %vm839_vm1, %v4138_v20 }
 0x6c5   : > { %3614 = vrot.lane.b32.xlu1 %v4223_v60, %s5033_s2 }
 0x706   : > { %v4308_v51 = vpop.f32.mrf.mxu1 }
 0x70e   : > { %v4310_v50 = vpop.f32.mrf.mxu1 }
 0x716   : > { %v4312_v52 = vpop.f32.mrf.mxu1 }
 0x717   : > { %v1167_v55 = vpop.xlane.xlu0 %1166 }
 0x718   : > { %v1177_v53 = vsub.f32 %v1153_v40, %v1167_v55 }
 0x71a   : > { %v1181_v54 = vmul.f32 1.442695, %v1177_v53 }
 0x71c   : > { %3686 = vpow2.f32 %v1181_v54 }
 0x71e   : > { %v4314_v56 = vpop.f32.mrf.mxu1 }
 0x71f   : > { %v1170_v57 = vpop.xlane.xlu1 %1169 }
 0x720   : > { %v1178_v58 = vsub.f32 %v1156_v44, %v1170_v57 }
 0x722   : > { %v4316_v61 = vpop.eup %3686  ;;  %v1183_v62 = vmul.f32 1.442695, %v1178_v58 }
 0x723   : > { %v1189_v60 = vsel %vm1164_vm10, %v4316_v61, 0.0 }
 0x724   : > { %3688 = vpow2.f32 %v1183_v62  ;;  %1190 = vadd.xlane.f32.xlu2 %v1189_v60 }
 0x726   : > { %v2020_v63 = vpop.f32.mrf.mxu1 }
 0x727   : > { %v2026_v0 = vmul.f32 3.0, %v2020_v63  ;;  %v1173_v1 = vpop.xlane.xlu2 %1172 }
 0x728   : > { %v1179_v2 = vsub.f32 %v1159_v24, %v1173_v1 }
 0x729   : > { %3690 = vtanh.f32 %v2026_v0 }
 0x72a   : > { %v4320_v3 = vpop.eup %3688  ;;  %v1185_v4 = vmul.f32 1.442695, %v1179_v2 }
 0x72b   : > { %v1192_v5 = vsel %vm1164_vm10, %v4320_v3, 0.0 }
 0x72c   : > { %3692 = vpow2.f32 %v1185_v4  ;;  %1193 = vadd.xlane.f32.xlu0 %v1192_v5 }
 0x72e   : > { %v2023_v6 = vpop.f32.mrf.mxu1 }
 0x72f   : > { %v3691_v8 = vpop.eup %3690  ;;  %v2027_v9 = vmul.f32 3.0, %v2023_v6  ;;  %v1176_v10 = vpop.xlane.xlu2 %1175 }
 0x730   : > { %v1180_v11 = vsub.f32 %v1162_v47, %v1176_v10  ;;  %v2030_v13 = vmax.f32 %v3691_v8, 0.0 }
 0x731   : > { %3694 = vtanh.f32 %v2027_v9 }
 0x732   : > { %v4324_v14 = vpop.eup %3692  ;;  %v1187_v7 = vmul.f32 1.442695, %v1180_v11  ;;  %v2032_v15 = vsel %vm839_vm1, %v2030_v13, -inf }
 0x733   : > { %2033 = vmax.xlane.f32.xlu1 %v2032_v15  ;;  %v1195_v17 = vsel %vm1164_vm10, %v4324_v14, 0.0 }
 0x734   : > { %3696 = vpow2.f32 %v1187_v7  ;;  %1196 = vadd.xlane.f32.xlu2 %v1195_v17 }
 0x737   : > { %v3615_v18 = vpop.permute.xlu1 %3614  ;;  %v4329_v23 = vpop.eup %3694 }
 0x738   : > { %v3616_v22 = vunpack.i.l.bf16 %v3615_v18  ;;  %v3617_v27 = vunpack.i.h.bf16 %v3615_v18  ;;  %v2031_v29 = vmax.f32 %v4329_v23, 0.0 }
 0x73a   : > { %v4331_v25 = vpop.eup %3696  ;;  %1297 = vmatpush.msra.mxu2 %v3616_v22  ;;  %v2035_v12 = vsel %vm839_vm1, %v2031_v29, -inf }
 0x73b   : > { %v1198_v28 = vsel %vm1164_vm10, %v4331_v25, 0.0 }
 0x73c   : > { %1298 = vmatpush.msra.mxu2 %v3617_v27  ;;  %1199 = vadd.xlane.f32.xlu2 %v1198_v28 }
 0x740   : > { %3619 = vrot.lane.b32.xlu0 %v4218_v59, %s5033_s2  ;;  %s5085_s2 = smov 112  }
 0x744   : > { %2036 = vmax.xlane.f32.xlu2 %v2035_v12 }
 0x797   : > { %v1191_v35 = vpop.xlane.xlu2 %1190 }
 0x798   : > { %3698 = vrcp.f32 %v1191_v35  ;;  %v1212_v31 = vand.u32 2147483648, %v1191_v35  ;;  %vm1206_vm15 = vweird.f32 %v1191_v35  ;;  %v1210_v26 = vand.u32 2147483647, %v1191_v35 }
 0x79a   : > { %v1213_v47 = vor.u32 1.1754944e-38, %v1212_v31  ;;  %vm1211_vm3 = vcmp.eq.f32.partialorder %v1210_v26, 8.507059e+37 }
 0x79e   : > { %v3699_v32 = vpop.eup %3698 }
 0x79f   : > { %v1194_v33 = vpop.xlane.xlu0 %1193  ;;  %v1202_v34 = vmul.f32 %v3699_v32, %v1191_v35  ;;  %vm1207_vm14 = vweird.f32 %v3699_v32 }
 0x7a0   : > { %3700 = vrcp.f32 %v1194_v33  ;;  %vm1208_vm2 = vmor %vm1206_vm15, %vm1207_vm14  ;;  %v1227_v62 = vand.u32 2147483648, %v1194_v33  ;;  %vm1221_vm5 = vweird.f32 %v1194_v33  ;;  %v1225_v1 = vand.u32 2147483647, %v1194_v33 }
 0x7a1   : > { %v1203_v30 = vsub.f32 1.0, %v1202_v34 }
 0x7a2   : > { %v1228_v9 = vor.u32 1.1754944e-38, %v1227_v62  ;;  %vm1226_vm7 = vcmp.eq.f32.partialorder %v1225_v1, 8.507059e+37 }
 0x7a3   : > { %v1204_v39 = vmul.f32 %v3699_v32, %v1203_v30 }
 0x7a5   : > { %v1205_v41 = vadd.f32 %v3699_v32, %v1204_v39 }
 0x7a6   : > { %v3701_v19 = vpop.eup %3700  ;;  %v2034_v36 = vpop.xlane.xlu1 %2033 }
 0x7a7   : > { %v2038_v37 = vsub.f32 %v2030_v13, %v2034_v36  ;;  %v4339_v38 = vpop.xlane.xlu2 %1196  ;;  %v1217_v40 = vmul.f32 %v3701_v19, %v1194_v33  ;;  %v1209_v45 = vsel %vm1208_vm2, %v3699_v32, %v1205_v41  ;;  %vm1222_vm4 = vweird.f32 %v3701_v19  ;;  %v4369_v36 = vld [vmem:[%s5077_s9] sm:$0xff] }
 0x7a8   : > { %3702 = vrcp.f32 %v4339_v38  ;;  %v1214_v53 = vsel %vm1211_vm3, %v1213_v47, %v1209_v45  ;;  %vm1223_vm6 = vmor %vm1221_vm5, %vm1222_vm4  ;;  %vm1236_vm9 = vweird.f32 %v4339_v38  ;;  %v1240_v17 = vand.u32 2147483647, %v4339_v38 }
 0x7a9   : > { %v2040_v59 = vmul.f32 1.442695, %v2038_v37  ;;  %v1218_v42 = vsub.f32 1.0, %v1217_v40  ;;  %v1215_v0 = vmul.f32 %v4316_v61, %v1214_v53  ;;  %v1242_v61 = vand.u32 2147483648, %v4339_v38 }
 0x7aa   : > { %vm1241_vm12 = vcmp.eq.f32.partialorder %v1240_v17, 8.507059e+37 }
 0x7ab   : > { %3704 = vpow2.f32 %v2040_v59  ;;  %v1219_v24 = vmul.f32 %v3701_v19, %v1218_v42  ;;  %v1243_v23 = vor.u32 1.1754944e-38, %v1242_v61 }
 0x7ad   : > { %v1220_v58 = vadd.f32 %v3701_v19, %v1219_v24 }
 0x7ae   : > { %v3703_v44 = vpop.eup %3702 }
 0x7af   : > { %v4342_v43 = vpop.xlane.xlu2 %1199  ;;  %v1232_v46 = vmul.f32 %v3703_v44, %v4339_v38  ;;  %v1224_v8 = vsel %vm1223_vm6, %v3701_v19, %v1220_v58  ;;  %vm1237_vm8 = vweird.f32 %v3703_v44 }
 0x7b0   : > { %3706 = vrcp.f32 %v4342_v43  ;;  %v1229_v11 = vsel %vm1226_vm7, %v1228_v9, %v1224_v8  ;;  %vm1238_vm11 = vmor %vm1236_vm9, %vm1237_vm8  ;;  %v1257_v35 = vand.u32 2147483648, %v4342_v43  ;;  %vm1251_vm14 = vweird.f32 %v4342_v43 }
 0x7b1   : > { %v4346_v48 = vpop.eup %3704  ;;  %v1233_v57 = vsub.f32 1.0, %v1232_v46  ;;  %v1230_v15 = vmul.f32 %v4320_v3, %v1229_v11  ;;  %v1255_v32 = vand.u32 2147483647, %v4342_v43 }
 0x7b2   : > { %v3620_v49 = vpop.permute.xlu0 %3619  ;;  %v2044_v55 = vsel %vm839_vm1, %v4346_v48, 0.0  ;;  %v1258_v34 = vor.u32 1.1754944e-38, %v1257_v35 }
 0x7b3   : > { %v3621_v54 = vunpack.i.l.bf16 %v3620_v49  ;;  %2045 = vadd.xlane.f32.xlu2 %v2044_v55  ;;  %v3622_v60 = vunpack.i.h.bf16 %v3620_v49  ;;  %v1234_v4 = vmul.f32 %v3703_v44, %v1233_v57  ;;  %vm1256_vm2 = vcmp.eq.f32.partialorder %v1255_v32, 8.507059e+37 }
 0x7b5   : > { %1299 = vmatpush.msra.mxu2 %v3621_v54  ;;  %v1235_v7 = vadd.f32 %v3703_v44, %v1234_v4  ;;  %v3648_v4 = vld [vmem:[%s5080_s10] ss:$0 sm:$0xff] }
 0x7b6   : > { %v3707_v63 = vpop.eup %3706 }
 0x7b7   : > { %1300 = vmatpush.msra.mxu2 %v3622_v60  ;;  %v2037_v2 = vpop.xlane.xlu2 %2036  ;;  %v1247_v5 = vmul.f32 %v3707_v63, %v4342_v43  ;;  %v1239_v22 = vsel %vm1238_vm11, %v3703_v44, %v1235_v7  ;;  %vm1252_vm13 = vweird.f32 %v3707_v63 }
 0x7b8   : > { %v2039_v6 = vsub.f32 %v2031_v29, %v2037_v2  ;;  %3434 = vmatmul.msk.f32.vlgmr.msra.gmra.mxu2 %vm1164_vm10, %v1215_v0  ;;  %v1244_v29 = vsel %vm1241_vm12, %v1243_v23, %v1239_v22  ;;  %vm1253_vm15 = vmor %vm1251_vm14, %vm1252_vm13 }
 0x7b9   : > { %v1248_v13 = vsub.f32 1.0, %v1247_v5  ;;  %v1245_v3 = vmul.f32 %v4324_v14, %v1244_v29  ;;  %1594 = vmatpush.msrb.mxu2 %v4369_v36  ;;  %v4405_v29 = vmul.f32 0.05, %v4134_v16 }
 0x7ba   : > { %v2042_v10 = vmul.f32 1.442695, %v2039_v6 }
 0x7bb   : > { %v1249_v18 = vmul.f32 %v3707_v63, %v1248_v13 }
 0x7bc   : > { %3708 = vpow2.f32 %v2042_v10 }
 0x7bd   : > { %v1250_v12 = vadd.f32 %v3707_v63, %v1249_v18 }
 0x7bf   : > { %v1254_v33 = vsel %vm1253_vm15, %v3707_v63, %v1250_v12 }
 0x7c0   : > { %3435 = vmatmul.msk.f32.gmra.mxu2 %vm1164_vm10, %v1230_v15  ;;  %v1259_v30 = vsel %vm1256_vm2, %v1258_v34, %v1254_v33 }
 0x7c1   : > { %v1260_v19 = vmul.f32 %v4331_v25, %v1259_v30 }
 0x7c2   : > { %v3709_v27 = vpop.eup %3708 }
 0x7c3   : > { %v2047_v28 = vsel %vm839_vm1, %v3709_v27, 0.0 }
 0x7c4   : > { %2048 = vadd.xlane.f32.xlu0 %v2047_v28 }
 0x7c8   : > { %3436 = vmatmul.msk.f32.gmra.mxu2 %vm1164_vm10, %v1245_v3  ;;  %v4413_v3 = vmul.f32 0.05, %v4138_v20 }
 0x7d0   : > { %3437 = vmatmul.msk.f32.gmra.mxu2 %vm1164_vm10, %v1260_v19 }
 0x826   : > { %v2046_v14 = vpop.xlane.xlu2 %2045 }
 0x827   : > { %3710 = vrcp.f32 %v2046_v14  ;;  %vm2055_vm3 = vweird.f32 %v2046_v14  ;;  %v2061_v43 = vand.u32 2147483648, %v2046_v14  ;;  %v2059_v46 = vand.u32 2147483647, %v2046_v14 }
 0x829   : > { %v2062_v54 = vor.u32 1.1754944e-38, %v2061_v43  ;;  %vm2060_vm11 = vcmp.eq.f32.partialorder %v2059_v46, 8.507059e+37 }
 0x82d   : > { %v3711_v37 = vpop.eup %3710 }
 0x82e   : > { %v2051_v38 = vmul.f32 %v3711_v37, %v2046_v14  ;;  %vm2056_vm4 = vweird.f32 %v3711_v37 }
 0x82f   : > { %vm4373_vm7 = vmor %vm2055_vm3, %vm2056_vm4 }
 0x830   : > { %v2052_v40 = vsub.f32 1.0, %v2051_v38 }
 0x832   : > { %v2053_v41 = vmul.f32 %v3711_v37, %v2052_v40 }
 0x834   : > { %v2054_v45 = vadd.f32 %v3711_v37, %v2053_v41 }
 0x836   : > { %v2058_v58 = vsel %vm4373_vm7, %v3711_v37, %v2054_v45 }
 0x837   : > { %v2049_v39 = vpop.xlane.xlu0 %2048  ;;  %v2063_v63 = vsel %vm2060_vm11, %v2062_v54, %v2058_v58  ;;  %v4451_v58 = vld [vmem:[%s5081_s11] sm:$0xff] }
 0x838   : > { %3712 = vrcp.f32 %v2049_v39  ;;  %v2076_v31 = vand.u32 2147483648, %v2049_v39  ;;  %vm2070_vm5 = vweird.f32 %v2049_v39  ;;  %v2074_v26 = vand.u32 2147483647, %v2049_v39 }
 0x839   : > { %v2064_v1 = vmul.f32 %v4346_v48, %v2063_v63 }
 0x83a   : > { %v2077_v55 = vor.u32 1.1754944e-38, %v2076_v31  ;;  %vm2075_vm9 = vcmp.eq.f32.partialorder %v2074_v26, 8.507059e+37 }
 0x83b   : > { %v1302_v59 = vpop.f32.mrf.mxu2 }
 0x83c   : > { %3454 = vmatmul.msk.f32.vlgmr.msrb.gmra.mxu2 %vm797_vm0, %v1302_v59 }
 0x83e   : > { %v3713_v25 = vpop.eup %3712 }
 0x83f   : > { %v2066_v42 = vmul.f32 %v3713_v25, %v2049_v39  ;;  %vm2071_vm6 = vweird.f32 %v3713_v25 }
 0x840   : > { %vm2072_vm8 = vmor %vm2070_vm5, %vm2071_vm6 }
 0x841   : > { %v2067_v44 = vsub.f32 1.0, %v2066_v42 }
 0x843   : > { %v2068_v47 = vmul.f32 %v3713_v25, %v2067_v44  ;;  %v1305_v49 = vpop.f32.mrf.mxu2 }
 0x844   : > { %3455 = vmatmul.msk.f32.gmra.mxu2 %vm797_vm0, %v1305_v49 }
 0x845   : > { %v2069_v53 = vadd.f32 %v3713_v25, %v2068_v47 }
 0x847   : > { %v2073_v57 = vsel %vm2072_vm8, %v3713_v25, %v2069_v53 }
 0x848   : > { %v2078_v62 = vsel %vm2075_vm9, %v2077_v55, %v2073_v57  ;;  %v4445_v57 = vld [vmem:[%s5081_s11 + $0x8] sm:$0xff] }
 0x849   : > { %v2079_v60 = vmul.f32 %v3709_v27, %v2078_v62  ;;  %1757 = vmatpush.msra.mxu3 %v4445_v57 }
 0x84b   : > { %v1308_v0 = vpop.f32.mrf.mxu2  ;;  %3480 = vmatpush.xpose.msk.msra.mxu2 %vm839_vm1, %v2079_v60  ;;  %1758 = vmatpush.msra.mxu3 %v4451_v58 }
 0x84c   : > { %3456 = vmatmul.msk.f32.gmra.mxu2 %vm797_vm0, %v1308_v0 }
 0x84f   : > { %3481 = vmatpush.xpose.msk.msra.mxu2 %vm839_vm1, %v2064_v1 }
 0x853   : > { %3488 = vmatpush.xpose.msk.msrb.mxu2 %vm839_vm1, %v2079_v60  ;;  %v1311_v2 = vpop.f32.mrf.mxu2 }
 0x854   : > { %3457 = vmatmul.msk.f32.gmra.mxu2 %vm797_vm0, %v1311_v2 }
 0x857   : > { %3489 = vmatpush.xpose.msk.msrb.mxu2 %vm839_vm1, %v2064_v1 }
 0x85c   : > { %3482 = vmatmul.msk.f32.vlgmr.msra.gmra.mxu2 %vm839_vm1, %v4134_v16 }
 0x864   : > { %3483 = vmatmul.msk.f32.gmra.mxu2 %vm839_vm1, %v4138_v20 }
 0x8bf   : > { %v1596_v48 = vpop.f32.mrf.mxu2 }
 0x8c0   : > { %v1597_v5 = vadd.f32 %v1596_v48, %v4308_v51 }
 0x8c2   : > { %v1612_v6 = vadd.f32 %v3648_v4, %v1597_v5 }
 0x8c4   : > { %v1616_v8 = vadd.f32 %v1612_v6, %v4134_v16  ;;  %v3885_v16 = vmov 16.0  }
 0x8c5   : > { %3714 = vrcp.f32 %v3885_v16 }
 0x8c6   : > { %v1620_v9 = vsel %vm839_vm1, %v1616_v8, 0.0 }
 0x8c7   : > { %v1599_v10 = vpop.f32.mrf.mxu2  ;;  %1621 = vadd.xlane.f32.xlu2 %v1620_v9 }
 0x8c8   : > { %v1600_v11 = vadd.f32 %v1599_v10, %v4310_v50  ;;  %v792_v10 = vld [vmem:[%s5082_s15] sm:$0x3f] }
 0x8ca   : > { %v1613_v13 = vadd.f32 %v3648_v4, %v1600_v11 }
 0x8cb   : > { %v3715_v33 = vpop.eup %3714 }
 0x8cc   : > { %v1617_v7 = vadd.f32 %v1613_v13, %v4138_v20  ;;  %v1633_v34 = vmul.f32 16.0, %v3715_v33  ;;  %vm1637_vm12 = vweird.f32 %v3715_v33 }
 0x8ce   : > { %v1623_v61 = vsel %vm839_vm1, %v1617_v7, 0.0  ;;  %v1634_v30 = vsub.f32 1.0, %v1633_v34 }
 0x8cf   : > { %v1602_v15 = vpop.f32.mrf.mxu2  ;;  %1624 = vadd.xlane.f32.xlu2 %v1623_v61 }
 0x8d0   : > { %v1603_v17 = vadd.f32 %v1602_v15, %v4312_v52  ;;  %v1635_v19 = vmul.f32 %v3715_v33, %v1634_v30 }
 0x8d2   : > { %v1614_v18 = vadd.f32 %v3648_v4, %v1603_v17  ;;  %v1636_v14 = vadd.f32 %v3715_v33, %v1635_v19  ;;  %v4460_v17 = vperm.slane %v792_v10, 0 }
 0x8d4   : > { %v1626_v51 = vsel %vm839_vm1, %v1614_v18, 0.0  ;;  %v4420_v37 = vsel %vm1637_vm12, %v3715_v33, %v1636_v14 }
 0x8d7   : > { %v1605_v22 = vpop.f32.mrf.mxu2  ;;  %1627 = vadd.xlane.f32.xlu2 %v1626_v51  ;;  %v3476_v51 = vld [vmem:[%s5070_s25 + $0x40] sm:$0xff] }
 0x8d8   : > { %v1606_v23 = vadd.f32 %v1605_v22, %v4314_v56 }
 0x8da   : > { %v1615_v27 = vadd.f32 %v3648_v4, %v1606_v23 }
 0x8dc   : > { %v1629_v28 = vsel %vm839_vm1, %v1615_v27, 0.0 }
 0x8df   : > { %v2112_v50 = vpop.f32.mrf.mxu2  ;;  %1630 = vadd.xlane.f32.xlu2 %v1629_v28  ;;  %v4468_v28 = vperm.slane %v792_v10, 1  ;;  %v4539_v10 = vld [vmem:[%s5084_s12] ss:$0 sm:$0xff] }
 0x8e0   : > { %v2118_v12 = vmul.f32 0.95, %v2112_v50 }
 0x8e2   : > { %v4408_v35 = vadd.f32 %v2118_v12, %v4405_v29 }
 0x8e4   : > { %3490 = vmatmul.msk.f32.vlgmr.msrb.gmra.mxu2 %vm839_vm1, %v4408_v35 }
 0x8e7   : > { %v2115_v52 = vpop.f32.mrf.mxu2 }
 0x8e8   : > { %v2119_v56 = vmul.f32 0.95, %v2115_v52 }
 0x8ea   : > { %v4416_v32 = vadd.f32 %v2119_v56, %v4413_v3 }
 0x8ec   : > { %3491 = vmatmul.msk.f32.gmra.mxu2 %vm839_vm1, %v4416_v32 }
 0x93a   : > { %v1622_v38 = vpop.xlane.xlu2 %1621 }
 0x93b   : > { %v1639_v20 = vmul.f32 %v4420_v37, %v1622_v38 }
 0x93d   : > { %v1643_v39 = vsub.f32 %v1616_v8, %v1639_v20 }
 0x93f   : > { %v1647_v40 = vmul.f32 %v1643_v39, %v1643_v39 }
 0x941   : > { %v1651_v59 = vsel %vm839_vm1, %v1647_v40, 0.0 }
 0x942   : > { %1652 = vadd.xlane.f32.xlu1 %v1651_v59  ;;  %v1625_v25 = vpop.xlane.xlu2 %1624 }
 0x943   : > { %v1640_v41 = vmul.f32 %v4420_v37, %v1625_v25 }
 0x945   : > { %v4425_v42 = vsub.f32 %v1617_v7, %v1640_v41 }
 0x947   : > { %v1648_v31 = vmul.f32 %v4425_v42, %v4425_v42 }
 0x949   : > { %v1654_v44 = vsel %vm839_vm1, %v1648_v31, 0.0 }
 0x94a   : > { %1655 = vadd.xlane.f32.xlu0 %v1654_v44  ;;  %v1628_v26 = vpop.xlane.xlu2 %1627 }
 0x94b   : > { %v1641_v43 = vmul.f32 %v4420_v37, %v1628_v26 }
 0x94d   : > { %v4431_v45 = vsub.f32 %v1614_v18, %v1641_v43  ;;  %v3477_v18 = vld [vmem:[%s5070_s25 + $0x48] sm:$0xff]  ;;  %v3478_v43 = vld [vmem:[%s5070_s25 + $0x50] sm:$0xff] }
 0x94e   : > { %2142 = vmatpush.msrb.mxu3 %v3477_v18 }
 0x94f   : > { %v1649_v24 = vmul.f32 %v4431_v45, %v4431_v45 }
 0x950   : > { %2143 = vmatpush.msrb.mxu3 %v3476_v51 }
 0x951   : > { %v1657_v46 = vsel %vm839_vm1, %v1649_v24, 0.0 }
 0x952   : > { %1658 = vadd.xlane.f32.xlu2 %v1657_v46  ;;  %v1631_v47 = vpop.xlane.xlu2 %1630 }
 0x953   : > { %v1642_v49 = vmul.f32 %v4420_v37, %v1631_v47 }
 0x955   : > { %v4437_v55 = vsub.f32 %v1615_v27, %v1642_v49 }
 0x957   : > { %v1650_v53 = vmul.f32 %v4437_v55, %v4437_v55 }
 0x959   : > { %v1660_v54 = vsel %vm839_vm1, %v1650_v53, 0.0 }
 0x95a   : > { %1661 = vadd.xlane.f32.xlu1 %v1660_v54 }
 0x9b5   : > { %v1653_v62 = vpop.xlane.xlu1 %1652 }
 0x9b6   : > { %v1663_v60 = vmul.f32 %v1653_v62, %v4420_v37 }
 0x9b8   : > { %v1667_v63 = vadd.f32 1e-05, %v1663_v60 }
 0x9ba   : > { %3716 = vrsqrt.f32 %v1667_v63  ;;  %vm1677_vm14 = vweird.f32 %v1667_v63 }
 0x9bd   : > { %v1656_v0 = vpop.xlane.xlu0 %1655 }
 0x9be   : > { %v1664_v1 = vmul.f32 %v1656_v0, %v4420_v37 }
 0x9c0   : > { %v3717_v2 = vpop.eup %3716  ;;  %v1668_v4 = vadd.f32 1e-05, %v1664_v1 }
 0x9c1   : > { %v1672_v48 = vmul.f32 %v3717_v2, %v1667_v63  ;;  %vm1678_vm13 = vweird.f32 %v3717_v2 }
 0x9c2   : > { %3718 = vrsqrt.f32 %v1668_v4  ;;  %vm1679_vm15 = vmor %vm1677_vm14, %vm1678_vm13  ;;  %vm1687_vm3 = vweird.f32 %v1668_v4 }
 0x9c3   : > { %v1673_v5 = vmul.f32 %v3717_v2, %v1672_v48 }
 0x9c5   : > { %v1674_v6 = vmul.f32 0.5, %v1673_v5  ;;  %v1659_v8 = vpop.xlane.xlu2 %1658 }
 0x9c6   : > { %v1665_v9 = vmul.f32 %v1659_v8, %v4420_v37  ;;  %v4509_v8 = vld [vmem:[%s5083_s13 + $0x18] sm:$0xff] }
 0x9c7   : > { %v1675_v11 = vsub.f32 1.5, %v1674_v6  ;;  %1840 = vmatpush.msrb.mxu0 %v4509_v8 }
 0x9c8   : > { %v3719_v13 = vpop.eup %3718  ;;  %v1669_v7 = vadd.f32 1e-05, %v1665_v9  ;;  %v3809_v9 = vld [vmem:[%s5072_s30] sm:$0xff] }
 0x9c9   : > { %v1676_v61 = vmul.f32 %v3717_v2, %v1675_v11  ;;  %v1682_v15 = vmul.f32 %v3719_v13, %v1668_v4  ;;  %vm1688_vm2 = vweird.f32 %v3719_v13 }
 0x9ca   : > { %3720 = vrsqrt.f32 %v1669_v7  ;;  %vm1689_vm4 = vmor %vm1687_vm3, %vm1688_vm2  ;;  %vm1697_vm6 = vweird.f32 %v1669_v7 }
 0x9cb   : > { %v1680_v22 = vsel %vm1679_vm15, %v3717_v2, %v1676_v61  ;;  %v1683_v23 = vmul.f32 %v3719_v13, %v1682_v15  ;;  %v2191_v2 = vpop.f32.mrf.mxu2 }
 0x9cc   : > { %v1711_v27 = vmul.f32 %v1680_v22, %v1643_v39  ;;  %v2197_v4 = vmul.f32 0.95, %v2191_v2 }
 0x9cd   : > { %v1684_v50 = vmul.f32 0.5, %v1683_v23  ;;  %v1662_v12 = vpop.xlane.xlu1 %1661 }
 0x9ce   : > { %v1716_v52 = vmul.f32 %v4460_v17, %v1711_v27  ;;  %v1666_v56 = vmul.f32 %v1662_v12, %v4420_v37  ;;  %v2199_v48 = vadd.f32 %v2197_v4, %v4405_v29  ;;  %v4520_v29 = vld [vmem:[%s5083_s13 + $0x8] sm:$0xff] }
 0x9cf   : > { %v1685_v16 = vsub.f32 1.5, %v1684_v50 }
 0x9d0   : > { %v3721_v33 = vpop.eup %3720  ;;  %v1670_v34 = vadd.f32 1e-05, %v1666_v56  ;;  %v4473_v30 = vadd.f32 %v4468_v28, %v1716_v52 }
 0x9d1   : > { %v1686_v19 = vmul.f32 %v3719_v13, %v1685_v16  ;;  %v1692_v14 = vmul.f32 %v3721_v33, %v1669_v7  ;;  %vm1698_vm5 = vweird.f32 %v3721_v33 }
 0x9d2   : > { %3722 = vrsqrt.f32 %v1670_v34  ;;  %3458 = vmatmul.msk.f32.vlgmr.msra.gmra.mxu3 %vm839_vm1, %v4473_v30  ;;  %vm1699_vm7 = vmor %vm1697_vm6, %vm1698_vm5  ;;  %vm1707_vm9 = vweird.f32 %v1670_v34 }
 0x9d3   : > { %v1690_v38 = vsel %vm1689_vm4, %v3719_v13, %v1686_v19  ;;  %v1693_v20 = vmul.f32 %v3721_v33, %v1692_v14  ;;  %v2194_v5 = vpop.f32.mrf.mxu2 }
 0x9d4   : > { %v1712_v39 = vmul.f32 %v1690_v38, %v4425_v42  ;;  %v3479_v42 = vld [vmem:[%s5070_s25 + $0x58] sm:$0xff] }
 0x9d5   : > { %v1694_v40 = vmul.f32 0.5, %v1693_v20  ;;  %2221 = vmatpush.msra.mxu3 %v3479_v42 }
 0x9d6   : > { %v1717_v59 = vmul.f32 %v4460_v17, %v1712_v39 }
 0x9d7   : > { %v1695_v25 = vsub.f32 1.5, %v1694_v40  ;;  %2222 = vmatpush.msra.mxu3 %v3478_v43 }
 0x9d8   : > { %v3723_v41 = vpop.eup %3722  ;;  %v4480_v31 = vadd.f32 %v4468_v28, %v1717_v59 }
 0x9d9   : > { %v1696_v44 = vmul.f32 %v3721_v33, %v1695_v25  ;;  %v1702_v26 = vmul.f32 %v3723_v41, %v1670_v34  ;;  %vm1708_vm8 = vweird.f32 %v3723_v41 }
 0x9da   : > { %3459 = vmatmul.msk.f32.gmra.mxu3 %vm839_vm1, %v4480_v31  ;;  %vm1709_vm11 = vmor %vm1707_vm9, %vm1708_vm8 }
 0x9db   : > { %v1700_v24 = vsel %vm1699_vm7, %v3721_v33, %v1696_v44  ;;  %v1703_v46 = vmul.f32 %v3723_v41, %v1702_v26 }
 0x9dc   : > { %v1713_v47 = vmul.f32 %v1700_v24, %v4431_v45 }
 0x9dd   : > { %v1704_v49 = vmul.f32 0.5, %v1703_v46 }
 0x9de   : > { %v1718_v53 = vmul.f32 %v4460_v17, %v1713_v47 }
 0x9df   : > { %v1705_v54 = vsub.f32 1.5, %v1704_v49 }
 0x9e0   : > { %v1723_v62 = vadd.f32 %v4468_v28, %v1718_v53 }
 0x9e1   : > { %v1706_v60 = vmul.f32 %v3723_v41, %v1705_v54 }
 0x9e2   : > { %3460 = vmatmul.msk.f32.gmra.mxu3 %vm839_vm1, %v1723_v62 }
 0x9e3   : > { %v1710_v63 = vsel %vm1709_vm11, %v3723_v41, %v1706_v60 }
 0x9e4   : > { %v1714_v0 = vmul.f32 %v1710_v63, %v4437_v55  ;;  %v2198_v55 = vmul.f32 0.95, %v2194_v5  ;;  %v2168_v5 = vpop.f32.mrf.mxu1 }
 0x9e6   : > { %v1719_v1 = vmul.f32 %v4460_v17, %v1714_v0  ;;  %v2200_v6 = vadd.f32 %v2198_v55, %v4413_v3  ;;  %v4526_v3 = vld [vmem:[%s5083_s13] sm:$0xff] }
 0x9e8   : > { %v1724_v45 = vadd.f32 %v4468_v28, %v1719_v1 }
 0x9ea   : > { %3461 = vmatmul.msk.f32.gmra.mxu3 %vm839_vm1, %v1724_v45 }
 0x9f2   : > { %3484 = vmatmul.msk.f32.vlgmr.msrb.gmra.mxu3 %vm839_vm1, %v4408_v35  ;;  %v4515_v35 = vld [vmem:[%s5083_s13 + $0x10] sm:$0xff] }
 0x9f3   : > { %1841 = vmatpush.msrb.mxu0 %v4515_v35 }
 0x9f5   : > { %1842 = vmatpush.msrb.mxu0 %v4520_v29 }
 0x9f7   : > { %1843 = vmatpush.msrb.mxu0 %v4526_v3 }
 0x9fa   : > { %3485 = vmatmul.msk.f32.gmra.mxu3 %vm839_vm1, %v4416_v32  ;;  %v3808_v32 = vld [vmem:[%s5072_s30 + $0x8] sm:$0xff] }
 0x9fb   : > { %2264 = vmatpush.msra.mxu0 %v3808_v32 }
 0x9fd   : > { %2265 = vmatpush.msra.mxu0 %v3809_v9 }
 0xa02   : > { %3492 = vmatmul.msk.f32.vlgmr.msra.gmra.mxu3 %vm839_vm1, %v2199_v48 }
 0xa0a   : > { %3493 = vmatmul.msk.f32.gmra.mxu3 %vm839_vm1, %v2200_v6 }
 0xa55   : > { %v1760_v11 = vpop.f32.mrf.mxu3 }
 0xa56   : > { %v1761_v13 = vadd.f32 %v4539_v10, %v1760_v11  ;;  %v3650_v11 = vld [vmem:[%s5074_s7 + $0x1] ss:$0 sm:$0xff]  ;;  %s3550_s7 = sshll.u32 %s4036_s6, 4 }
 0xa58   : > { %v1776_v7 = vmul.f32 0.044715, %v1761_v13  ;;  %v1772_v14 = vmul.f32 0.5, %v1761_v13 }
 0xa5a   : > { %v1780_v61 = vmul.f32 %v1776_v7, %v1761_v13  ;;  %v2171_v7 = vpop.f32.mrf.mxu1 }
 0xa5c   : > { %v1784_v15 = vmul.f32 %v1780_v61, %v1761_v13 }
 0xa5d   : > { %v1763_v18 = vpop.f32.mrf.mxu3 }
 0xa5e   : > { %v1788_v51 = vadd.f32 %v1784_v15, %v1761_v13  ;;  %v1764_v22 = vadd.f32 %v4539_v10, %v1763_v18 }
 0xa60   : > { %v1792_v23 = vmul.f32 0.7978846, %v1788_v51  ;;  %v1777_v27 = vmul.f32 0.044715, %v1764_v22  ;;  %v1773_v43 = vmul.f32 0.5, %v1764_v22 }
 0xa62   : > { %3724 = vtanh.f32 %v1792_v23  ;;  %v1781_v50 = vmul.f32 %v1777_v27, %v1764_v22 }
 0xa64   : > { %v1785_v12 = vmul.f32 %v1781_v50, %v1764_v22 }
 0xa65   : > { %v1766_v52 = vpop.f32.mrf.mxu3 }
 0xa66   : > { %v1767_v56 = vadd.f32 %v4539_v10, %v1766_v52  ;;  %v1789_v16 = vadd.f32 %v1785_v12, %v1764_v22 }
 0xa68   : > { %v3725_v33 = vpop.eup %3724  ;;  %v1778_v34 = vmul.f32 0.044715, %v1767_v56  ;;  %v1793_v19 = vmul.f32 0.7978846, %v1789_v16  ;;  %v1774_v63 = vmul.f32 0.5, %v1767_v56 }
 0xa69   : > { %v1800_v38 = vadd.f32 1.0, %v3725_v33 }
 0xa6a   : > { %3726 = vtanh.f32 %v1793_v19  ;;  %v1782_v20 = vmul.f32 %v1778_v34, %v1767_v56 }
 0xa6b   : > { %v1804_v39 = vmul.f32 %v1800_v38, %v1772_v14 }
 0xa6c   : > { %v1786_v40 = vmul.f32 %v1782_v20, %v1767_v56 }
 0xa6d   : > { %v1769_v59 = vpop.f32.mrf.mxu3  ;;  %3462 = vmatmul.msk.f32.vlgmr.msrb.gmra.mxu0 %vm1164_vm10, %v1804_v39 }
 0xa6e   : > { %v1770_v25 = vadd.f32 %v4539_v10, %v1769_v59  ;;  %v1790_v41 = vadd.f32 %v1786_v40, %v1767_v56  ;;  %v3810_v56 = vld [vmem:[%s5075_s4] ss:$0 sm:$0xff] }
 0xa70   : > { %v3727_v44 = vpop.eup %3726  ;;  %v1779_v26 = vmul.f32 0.044715, %v1770_v25  ;;  %v1794_v42 = vmul.f32 0.7978846, %v1790_v41  ;;  %v1775_v4 = vmul.f32 0.5, %v1770_v25 }
 0xa71   : > { %v1801_v24 = vadd.f32 1.0, %v3727_v44 }
 0xa72   : > { %3728 = vtanh.f32 %v1794_v42  ;;  %v1783_v46 = vmul.f32 %v1779_v26, %v1770_v25 }
 0xa73   : > { %v1805_v47 = vmul.f32 %v1801_v24, %v1773_v43 }
 0xa74   : > { %v1787_v49 = vmul.f32 %v1783_v46, %v1770_v25  ;;  %v3811_v46 = vld [vmem:[%s5077_s9 + $0x8] sm:$0xff] }
 0xa75   : > { %3463 = vmatmul.msk.f32.gmra.mxu0 %vm1164_vm10, %v1805_v47  ;;  %v2145_v53 = vpop.f32.mrf.mxu3 }
 0xa76   : > { %v1791_v54 = vadd.f32 %v1787_v49, %v1770_v25  ;;  %v2169_v6 = vadd.f32 %v2168_v5, %v2145_v53  ;;  %v3495_v53 = vld [vmem:[%s5076_s8 + $0x20] sm:$0xff] }
 0xa78   : > { %v3729_v62 = vpop.eup %3728  ;;  %v1795_v60 = vmul.f32 0.7978846, %v1791_v54 }
 0xa79   : > { %v1802_v0 = vadd.f32 1.0, %v3729_v62 }
 0xa7a   : > { %3730 = vtanh.f32 %v1795_v60 }
 0xa7b   : > { %v1806_v1 = vmul.f32 %v1802_v0, %v1774_v63  ;;  %v3496_v63 = vld [vmem:[%s5076_s8 + $0x28] sm:$0xff] }
 0xa7d   : > { %3464 = vmatmul.msk.f32.gmra.mxu0 %vm1164_vm10, %v1806_v1  ;;  %v2148_v45 = vpop.f32.mrf.mxu3 }
 0xa7e   : > { %v2172_v61 = vadd.f32 %v2171_v7, %v2148_v45 }
 0xa80   : > { %v3731_v2 = vpop.eup %3730 }
 0xa81   : > { %v1803_v48 = vadd.f32 1.0, %v3731_v2 }
 0xa83   : > { %v1807_v55 = vmul.f32 %v1803_v48, %v1775_v4 }
 0xa85   : > { %3465 = vmatmul.msk.f32.gmra.mxu0 %vm1164_vm10, %v1807_v55  ;;  %v2224_v32 = vpop.f32.mrf.mxu3 }
 0xa86   : > { %v2230_v9 = vadd.f32 %v2224_v32, %v2169_v6 }
 0xa88   : > { %v4552_v13 = vadd.f32 %v3650_v11, %v2230_v9 }
 0xa8d   : > { %v2227_v15 = vpop.f32.mrf.mxu3  ;;  %3499 = vmatmul.msk.f32.vlgmr.msra.gmra.mxu0 %vm839_vm1, %v4552_v13 }
 0xa8e   : > { %v2231_v18 = vadd.f32 %v2227_v15, %v2172_v61 }
 0xa90   : > { %v4556_v51 = vadd.f32 %v3650_v11, %v2231_v18 }
 0xa95   : > { %3500 = vmatmul.msk.f32.gmra.mxu0 %vm839_vm1, %v4556_v51 }
 0xa9d   : > { %2272 = vmatmul.f32.gmra.mxu0 %v3879_v21 }
 0xaa5   : > { %2275 = vmatmul.f32.gmra.mxu0 %v3879_v21 }
 0xaea   : > { %v4562_v22 = vpop.f32.mrf.mxu0 }
 0xaf2   : > { %v4564_v23 = vpop.f32.mrf.mxu0 }
 0xafa   : > { %v1851_v27 = vpop.f32.mrf.mxu0 }
 0xb02   : > { %v1853_v50 = vpop.f32.mrf.mxu0 }
 0xb0a   : > { %v2267_v12 = vpop.f32.mrf.mxu0 }
 0xb0b   : > { %v2268_v16 = vadd.f32 %v3810_v56, %v2267_v12 }
 0xb0d   : > { %v2279_v40 = vmul.f32 0.35355338, %v2268_v16 }
 0xb12   : > { %v2270_v52 = vpop.f32.mrf.mxu0 }
 0xb13   : > { %v2271_v33 = vadd.f32 %v3810_v56, %v2270_v52 }
 0xb15   : > { %v4569_v34 = vpack.i.bf16 %v2268_v16, %v2271_v33  ;;  %v2280_v39 = vmul.f32 0.35355338, %v2271_v33 }
 0xb1a   : > { %v2273_v19 = vpop.f32.mrf.mxu0 }
 0xb1b   : > { %v2274_v14 = vadd.f32 %v3810_v56, %v2273_v19 }
 0xb1d   : > { %2291 = vrot.lane.b32.xlu2 %v2274_v14, %s5085_s2 }
 0xb22   : > { %v2276_v21 = vpop.f32.mrf.mxu0 }
 0xb23   : > { %v2277_v38 = vadd.f32 %v3810_v56, %v2276_v21 }
 0xb25   : > { %2507 = vrot.lane.b32.xlu1 %v2277_v38, %s5086_s24  ;;  %2293 = vrot.lane.b32.xlu0 %v2277_v38, %s5085_s2  ;;  %v4574_v20 = vpack.i.bf16 %v2274_v14, %v2277_v38 }
 0xb26   : > { %2505 = vrot.lane.b32.xlu2 %v2274_v14, %s5086_s24 }
 0xb2d   : > { %2503 = vrot.lane.b32.xlu1 %v2271_v33, %s5086_s24  ;;  %2289 = vrot.lane.b32.xlu0 %v2271_v33, %s5085_s2 }
 0xb2e   : > { %2501 = vrot.lane.b32.xlu2 %v2268_v16, %s5086_s24  ;;  %s5088_s24 = smov 96  }
 0xb35   : > { %2495 = vrot.lane.b32.xlu1 %v2280_v39, %s5087_s27  ;;  %2287 = vrot.lane.b32.xlu0 %v2268_v16, %s5085_s2 }
 0xb3d   : > { %2493 = vrot.lane.b32.xlu0 %v2279_v40, %s5087_s27 }
 0xb77   : > { %v2292_v59 = vpop.permute.xlu2 %2291 }
 0xb80   : > { %v2506_v44 = vpop.permute.xlu2 %2505 }
 0xb88   : > { %v2502_v43 = vpop.permute.xlu2 %2501 }
 0xb97   : > { %v2508_v25 = vpop.permute.xlu1 %2507  ;;  %v2294_v41 = vpop.permute.xlu0 %2293 }
 0xb98   : > { %3501 = vmatpush.xpose.msk.msrb.mxu1 %vm797_vm0, %v2294_v41  ;;  %3513 = vmatpush.xpose.msk.msrb.mxu3 %vm797_vm0, %v2508_v25 }
 0xb9c   : > { %3502 = vmatpush.xpose.msk.msrb.mxu1 %vm797_vm0, %v2292_v59  ;;  %3514 = vmatpush.xpose.msk.msrb.mxu3 %vm797_vm0, %v2506_v44 }
 0xb9f   : > { %v2504_v26 = vpop.permute.xlu1 %2503  ;;  %v2290_v42 = vpop.permute.xlu0 %2289 }
 0xba0   : > { %3503 = vmatpush.xpose.msk.msrb.mxu1 %vm797_vm0, %v2290_v42  ;;  %3515 = vmatpush.xpose.msk.msrb.mxu3 %vm797_vm0, %v2504_v26  ;;  %v4645_v26 = vld [vmem:[%s5076_s8 + $0x38] sm:$0xff] }
 0xba4   : > { %3516 = vmatpush.xpose.msk.msrb.mxu3 %vm797_vm0, %v2502_v43 }
 0xba7   : > { %v2288_v24 = vpop.permute.xlu0 %2287  ;;  %v2496_v49 = vpop.permute.xlu1 %2495 }
 0xba8   : > { %2915 = vmatpush.msra.mxu3 %v4445_v57  ;;  %3504 = vmatpush.xpose.msk.msrb.mxu1 %vm797_vm0, %v2288_v24  ;;  %v4600_v57 = vmul.f32 0.35355338, %v2274_v14 }
 0xbaa   : > { %2916 = vmatpush.msra.mxu3 %v4451_v58  ;;  %v4604_v58 = vmul.f32 0.35355338, %v2277_v38 }
 0xbab   : > { %3505 = vmatmul.msk.f32.vlgmr.msrb.gmra.mxu1 %vm797_vm0, %v2279_v40 }
 0xbac   : > { %2730 = vmatpush.msra.mxu1 %v3811_v46 }
 0xbaf   : > { %v2494_v47 = vpop.permute.xlu0 %2493 }
 0xbb0   : > { %3517 = vmatmul.msk.f32.vlgmr.msrb.gmra.mxu3 %vm797_vm0, %v2494_v47 }
 0xbb3   : > { %3506 = vmatmul.msk.f32.gmra.mxu1 %vm797_vm0, %v2280_v39 }
 0xbb8   : > { %3518 = vmatmul.msk.f32.gmra.mxu3 %vm797_vm0, %v2496_v49 }
 0xbbb   : > { %3507 = vmatmul.msk.f32.gmra.mxu1 %vm797_vm0, %v4600_v57 }
 0xbc3   : > { %3508 = vmatmul.msk.f32.gmra.mxu1 %vm797_vm0, %v4604_v58 }
 0xc28   : > { %v2332_v54 = vpop.f32.mrf.mxu1 }
 0xc29   : > { %v2333_v62 = vadd.f32 %v3495_v53, %v2332_v54 }
 0xc2b   : > { %v2344_v60 = vsel %vm1164_vm10, %v2333_v62, -inf }
 0xc2c   : > { %2345 = vmax.xlane.f32.xlu2 %v2344_v60 }
 0xc30   : > { %v2335_v0 = vpop.f32.mrf.mxu1 }
 0xc31   : > { %v2336_v1 = vadd.f32 %v3496_v63, %v2335_v0 }
 0xc33   : > { %v2542_v45 = vpop.f32.mrf.mxu3  ;;  %v2347_v2 = vsel %vm1164_vm10, %v2336_v1, -inf }
 0xc34   : > { %v2543_v4 = vadd.f32 %v3495_v53, %v2542_v45  ;;  %2348 = vmax.xlane.f32.xlu0 %v2347_v2 }
 0xc36   : > { %v2554_v48 = vsel %vm1164_vm10, %v2543_v4, -inf }
 0xc37   : > { %2555 = vmax.xlane.f32.xlu1 %v2554_v48 }
 0xc38   : > { %v2338_v44 = vpop.f32.mrf.mxu1 }
 0xc3b   : > { %v2545_v5 = vpop.f32.mrf.mxu3 }
 0xc3c   : > { %v2546_v55 = vadd.f32 %v3496_v63, %v2545_v5 }
 0xc3e   : > { %v2557_v6 = vsel %vm1164_vm10, %v2546_v55, -inf }
 0xc3f   : > { %2558 = vmax.xlane.f32.xlu2 %v2557_v6 }
 0xc40   : > { %v2341_v42 = vpop.f32.mrf.mxu1 }
 0xc41   : > { %v4648_v43 = vadd.f32 %v4645_v26, %v2341_v42 }
 0xc43   : > { %v2353_v24 = vsel %vm1164_vm10, %v4648_v43, -inf }
 0xc48   : > { %3624 = vrot.lane.b32.xlu0 %v4574_v20, %s5088_s24 }
 0xc9f   : > { %v2346_v32 = vpop.xlane.xlu2 %2345 }
 0xca0   : > { %v2356_v9 = vsub.f32 %v2333_v62, %v2346_v32 }
 0xca2   : > { %v2360_v11 = vmul.f32 1.442695, %v2356_v9 }
 0xca4   : > { %3732 = vpow2.f32 %v2360_v11 }
 0xca7   : > { %v2349_v7 = vpop.xlane.xlu0 %2348 }
 0xca8   : > { %v2357_v61 = vsub.f32 %v2336_v1, %v2349_v7 }
 0xcaa   : > { %v4620_v15 = vpop.eup %3732  ;;  %v2362_v18 = vmul.f32 1.442695, %v2357_v61  ;;  %v2556_v27 = vpop.xlane.xlu1 %2555 }
 0xcab   : > { %v2566_v50 = vsub.f32 %v2543_v4, %v2556_v27  ;;  %v2368_v12 = vsel %vm1164_vm10, %v4620_v15, 0.0 }
 0xcac   : > { %3734 = vpow2.f32 %v2362_v18  ;;  %2369 = vadd.xlane.f32.xlu0 %v2368_v12 }
 0xcad   : > { %v2570_v52 = vmul.f32 1.442695, %v2566_v50 }
 0xcaf   : > { %3736 = vpow2.f32 %v2570_v52 }
 0xcb2   : > { %v4624_v56 = vpop.eup %3734  ;;  %v2559_v16 = vpop.xlane.xlu2 %2558 }
 0xcb3   : > { %v2567_v33 = vsub.f32 %v2546_v55, %v2559_v16  ;;  %v2371_v19 = vsel %vm1164_vm10, %v4624_v56, 0.0 }
 0xcb4   : > { %2372 = vadd.xlane.f32.xlu2 %v2371_v19 }
 0xcb5   : > { %v4628_v14 = vpop.eup %3736  ;;  %v2572_v21 = vmul.f32 1.442695, %v2567_v33 }
 0xcb6   : > { %v2578_v38 = vsel %vm1164_vm10, %v4628_v14, 0.0 }
 0xcb7   : > { %3738 = vpow2.f32 %v2572_v21  ;;  %2579 = vadd.xlane.f32.xlu1 %v2578_v38 }
 0xcba   : > { %v3625_v39 = vpop.permute.xlu0 %3624 }
 0xcbb   : > { %v3626_v40 = vunpack.i.l.bf16 %v3625_v39  ;;  %v3627_v25 = vunpack.i.h.bf16 %v3625_v39 }
 0xcbd   : > { %v4632_v59 = vpop.eup %3738  ;;  %2476 = vmatpush.msra.mxu2 %v3626_v40 }
 0xcbe   : > { %v2581_v41 = vsel %vm1164_vm10, %v4632_v59, 0.0 }
 0xcbf   : > { %2477 = vmatpush.msra.mxu2 %v3627_v25  ;;  %2582 = vadd.xlane.f32.xlu1 %v2581_v41 }
 0xcc0   : > { %3639 = vrot.lane.b32.xlu0 %v4569_v34, %s5089_s28 }
 0xccc   : > { %3629 = vrot.lane.b32.xlu2 %v4569_v34, %s5088_s24  ;;  %v4655_v34 = vld [vmem:[%s5076_s8 + $0x30] sm:$0xff] }
 0xcd8   : > { %3634 = vrot.lane.b32.xlu1 %v4574_v20, %s5089_s28  ;;  %v4658_v20 = vadd.f32 %v4655_v34, %v2338_v44  ;;  %s784_s28 = scalar_lea.vmem %s5008_s22, %s4093_s0 }
 0xcda   : > { %v2350_v46 = vsel %vm1164_vm10, %v4658_v20, -inf }
 0xcea   : > { %2354 = vmax.xlane.f32.xlu0 %v2353_v24 }
 0xcf5   : > { %2351 = vmax.xlane.f32.xlu2 %v2350_v46 }
 0xcfe   : > { %2497 = vrot.lane.b32.xlu0 %v4600_v57, %s5087_s27 }
 0xd1f   : > { %v2370_v47 = vpop.xlane.xlu0 %2369 }
 0xd20   : > { %3740 = vrcp.f32 %v2370_v47  ;;  %v2391_v60 = vand.u32 2147483648, %v2370_v47  ;;  %v2389_v0 = vand.u32 2147483647, %v2370_v47  ;;  %vm2385_vm13 = vweird.f32 %v2370_v47 }
 0xd22   : > { %v2392_v2 = vor.u32 1.1754944e-38, %v2391_v60  ;;  %vm2390_vm15 = vcmp.eq.f32.partialorder %v2389_v0, 8.507059e+37 }
 0xd26   : > { %v3741_v49 = vpop.eup %3740 }
 0xd27   : > { %v2381_v53 = vmul.f32 %v3741_v49, %v2370_v47  ;;  %v2373_v54 = vpop.xlane.xlu2 %2372  ;;  %vm2386_vm12 = vweird.f32 %v3741_v49 }
 0xd28   : > { %3742 = vrcp.f32 %v2373_v54  ;;  %vm2387_vm14 = vmor %vm2385_vm13, %vm2386_vm12  ;;  %v2406_v9 = vand.u32 2147483648, %v2373_v54  ;;  %v2404_v7 = vand.u32 2147483647, %v2373_v54  ;;  %vm2400_vm3 = vweird.f32 %v2373_v54 }
 0xd29   : > { %v2382_v62 = vsub.f32 1.0, %v2381_v53 }
 0xd2a   : > { %v2580_v4 = vpop.xlane.xlu1 %2579  ;;  %v2407_v50 = vor.u32 1.1754944e-38, %v2406_v9  ;;  %vm2405_vm5 = vcmp.eq.f32.partialorder %v2404_v7, 8.507059e+37 }
 0xd2b   : > { %v2383_v63 = vmul.f32 %v3741_v49, %v2382_v62  ;;  %3744 = vrcp.f32 %v2580_v4  ;;  %v2601_v44 = vand.u32 2147483648, %v2580_v4  ;;  %vm2595_vm7 = vweird.f32 %v2580_v4 }
 0xd2d   : > { %v2384_v1 = vadd.f32 %v3741_v49, %v2383_v63 }
 0xd2e   : > { %v3743_v45 = vpop.eup %3742 }
 0xd2f   : > { %v2388_v48 = vsel %vm2387_vm14, %v3741_v49, %v2384_v1  ;;  %v2396_v57 = vmul.f32 %v3743_v45, %v2373_v54  ;;  %v3630_v5 = vpop.permute.xlu2 %3629  ;;  %vm2401_vm2 = vweird.f32 %v3743_v45 }
 0xd30   : > { %v2393_v55 = vsel %vm2390_vm15, %v2392_v2, %v2388_v48  ;;  %v3631_v6 = vunpack.i.l.bf16 %v3630_v5  ;;  %v3632_v11 = vunpack.i.h.bf16 %v3630_v5  ;;  %vm2402_vm4 = vmor %vm2400_vm3, %vm2401_vm2 }
 0xd31   : > { %v2397_v32 = vsub.f32 1.0, %v2396_v57  ;;  %v2394_v18 = vmul.f32 %v4620_v15, %v2393_v55  ;;  %v3745_v33 = vpop.eup %3744 }
 0xd32   : > { %2478 = vmatpush.msra.mxu2 %v3631_v6  ;;  %v2583_v52 = vpop.xlane.xlu1 %2582  ;;  %v2591_v21 = vmul.f32 %v3745_v33, %v2580_v4  ;;  %vm2596_vm6 = vweird.f32 %v3745_v33  ;;  %v3640_v47 = vpop.permute.xlu0 %3639 }
 0xd33   : > { %v2398_v61 = vmul.f32 %v3743_v45, %v2397_v32  ;;  %3746 = vrcp.f32 %v2583_v52  ;;  %vm2597_vm8 = vmor %vm2595_vm7, %vm2596_vm6  ;;  %v3641_v62 = vunpack.i.l.bf16 %v3640_v47  ;;  %v3642_v63 = vunpack.i.h.bf16 %v3640_v47 }
 0xd34   : > { %2479 = vmatpush.msra.mxu2 %v3632_v11  ;;  %v2592_v15 = vsub.f32 1.0, %v2591_v21  ;;  %v2616_v0 = vand.u32 2147483648, %v2583_v52  ;;  %vm2610_vm12 = vweird.f32 %v2583_v52 }
 0xd35   : > { %3509 = vmatmul.msk.f32.vlgmr.msra.gmra.mxu2 %vm1164_vm10, %v2394_v18  ;;  %v2399_v27 = vadd.f32 %v3743_v45, %v2398_v61 }
 0xd36   : > { %2771 = vmatpush.msrb.mxu2 %v4369_v36  ;;  %v2593_v39 = vmul.f32 %v3745_v33, %v2592_v15  ;;  %v2599_v36 = vand.u32 2147483647, %v2580_v4  ;;  %v2617_v4 = vor.u32 1.1754944e-38, %v2616_v0 }
 0xd37   : > { %v2403_v12 = vsel %vm2402_vm4, %v3743_v45, %v2399_v27  ;;  %v2614_v45 = vand.u32 2147483647, %v2583_v52 }
 0xd38   : > { %v2408_v16 = vsel %vm2405_vm5, %v2407_v50, %v2403_v12  ;;  %v2594_v25 = vadd.f32 %v3745_v33, %v2593_v39  ;;  %vm2600_vm9 = vcmp.eq.f32.partialorder %v2599_v36, 8.507059e+37 }
 0xd39   : > { %v2409_v19 = vmul.f32 %v4624_v56, %v2408_v16  ;;  %v3747_v38 = vpop.eup %3746  ;;  %v2602_v56 = vor.u32 1.1754944e-38, %v2601_v44  ;;  %vm2615_vm14 = vcmp.eq.f32.partialorder %v2614_v45, 8.507059e+37  ;;  %v4698_v45 = vld [vmem:[%s5080_s10] ss:$0 sm:$0xff]  ;;  %s5093_s10 = sld [smem:[#allocation28_spill]] }
 0xd3a   : > { %v2606_v40 = vmul.f32 %v3747_v38, %v2583_v52  ;;  %v2598_v46 = vsel %vm2597_vm8, %v3745_v33, %v2594_v25  ;;  %vm2611_vm11 = vweird.f32 %v3747_v38 }
 0xd3b   : > { %v2603_v54 = vsel %vm2600_vm9, %v2602_v56, %v2598_v46  ;;  %vm2612_vm13 = vmor %vm2610_vm12, %vm2611_vm11 }
 0xd3c   : > { %v2607_v41 = vsub.f32 1.0, %v2606_v40  ;;  %v2604_v1 = vmul.f32 %v4628_v14, %v2603_v54 }
 0xd3d   : > { %3510 = vmatmul.msk.f32.gmra.mxu2 %vm1164_vm10, %v2409_v19 }
 0xd3e   : > { %v2608_v49 = vmul.f32 %v3747_v38, %v2607_v41 }
 0xd3f   : > { %s3835_s6 = scalar_lea.hbm %s5093_s10, 32 }
 0xd40   : > { %v2609_v60 = vadd.f32 %v3747_v38, %v2608_v49 }
 0xd42   : > { %v2613_v2 = vsel %vm2612_vm13, %v3747_v38, %v2609_v60 }
 0xd43   : > { %v2618_v48 = vsel %vm2615_vm14, %v2617_v4, %v2613_v2 }
 0xd44   : > { %v2619_v57 = vmul.f32 %v4632_v59, %v2618_v48 }
 0xd4a   : > { %v3635_v42 = vpop.permute.xlu1 %3634 }
 0xd4b   : > { %v3636_v24 = vunpack.i.l.bf16 %v3635_v42  ;;  %v3637_v53 = vunpack.i.h.bf16 %v3635_v42 }
 0xd4d   : > { %2686 = vmatpush.msrb.mxu0 %v3636_v24 }
 0xd4f   : > { %2687 = vmatpush.msrb.mxu0 %v3637_v53 }
 0xd51   : > { %2688 = vmatpush.msrb.mxu0 %v3641_v62 }
 0xd53   : > { %2689 = vmatpush.msrb.mxu0 %v3642_v63 }
 0xd54   : > { %3521 = vmatmul.msk.f32.vlgmr.msrb.gmra.mxu0 %vm1164_vm10, %v2604_v1 }
 0xd55   : > { %2990 = vmatpush.msra.mxu0 %v4509_v8 }
 0xd57   : > { %2991 = vmatpush.msra.mxu0 %v4515_v35 }
 0xd59   : > { %2992 = vmatpush.msra.mxu0 %v4520_v29 }
 0xd5b   : > { %2993 = vmatpush.msra.mxu0 %v4526_v3 }
 0xd5c   : > { %3522 = vmatmul.msk.f32.gmra.mxu0 %vm1164_vm10, %v2619_v57 }
 0xd5d   : > { %v2355_v14 = vpop.xlane.xlu0 %2354 }
 0xd5e   : > { %v2359_v5 = vsub.f32 %v4648_v43, %v2355_v14 }
 0xd60   : > { %v2366_v55 = vmul.f32 1.442695, %v2359_v5 }
 0xd62   : > { %3748 = vpow2.f32 %v2366_v55 }
 0xd68   : > { %v3749_v6 = vpop.eup %3748  ;;  %v2352_v32 = vpop.xlane.xlu2 %2351 }
 0xd69   : > { %v2358_v8 = vsub.f32 %v4658_v20, %v2352_v32  ;;  %v2377_v9 = vsel %vm1164_vm10, %v3749_v6, 0.0 }
 0xd6a   : > { %2378 = vadd.xlane.f32.xlu2 %v2377_v9 }
 0xd6b   : > { %v2364_v35 = vmul.f32 1.442695, %v2358_v8 }
 0xd6d   : > { %3750 = vpow2.f32 %v2364_v35 }
 0xd70   : > { %v2498_v29 = vpop.permute.xlu0 %2497 }
 0xd71   : > { %3519 = vmatmul.msk.f32.gmra.mxu3 %vm797_vm0, %v2498_v29 }
 0xd73   : > { %v3751_v3 = vpop.eup %3750 }
 0xd74   : > { %v2374_v59 = vsel %vm1164_vm10, %v3751_v3, 0.0 }
 0xd75   : > { %2375 = vadd.xlane.f32.xlu1 %v2374_v59 }
 0xd82   : > { %2499 = vrot.lane.b32.xlu2 %v4604_v58, %s5087_s27  ;;  %s5091_s27 = sld [smem:[#allocation12_spill]] }
 0xd88   : > { %s778_s2 = scalar_lea.vmem %s5091_s27, %s4093_s0  ;;  %s5036_s27 = sand.u32 1, %s3869_s26  }
 0xd89   : > { %s3402_s1 = sshll.u32 %s5036_s27, 4  ;;  %s781_s27 = scalar_lea.vmem %s5007_s21, %s4093_s0 }
 0xd8a   : > { %s4921_s23 = scalar_lea.vmem [#allocation2], %s3402_s1  ;;  %s5094_s1 = sand.u32 1, %s3869_s26  }
 0xd8b   : > { %s3279_s13 = sshll.u32 %s4921_s23, 4  ;;  %s3280_s13 = int_to_ptr.vmem [resolvable:$true] %s3279_s13 }
 0xdb8   : > { %v2481_v53 = vpop.f32.mrf.mxu2 }
 0xdc0   : > { %v2484_v54 = vpop.f32.mrf.mxu2 }
 0xdd1   : > { %v2691_v43 = vpop.f32.mrf.mxu0 }
 0xdd2   : > { %3525 = vmatmul.msk.f32.vlgmr.msra.gmra.mxu1 %vm797_vm0, %v2691_v43 }
 0xdd9   : > { %v2694_v11 = vpop.f32.mrf.mxu0 }
 0xdda   : > { %3526 = vmatmul.msk.f32.gmra.mxu1 %vm797_vm0, %v2694_v11 }
 0xddd   : > { %v2379_v20 = vpop.xlane.xlu2 %2378 }
 0xdde   : > { %3752 = vrcp.f32 %v2379_v20  ;;  %v2436_v36 = vand.u32 2147483648, %v2379_v20  ;;  %vm2430_vm6 = vweird.f32 %v2379_v20  ;;  %v2434_v46 = vand.u32 2147483647, %v2379_v20 }
 0xde0   : > { %v2437_v47 = vor.u32 1.1754944e-38, %v2436_v36  ;;  %vm2435_vm8 = vcmp.eq.f32.partialorder %v2434_v46, 8.507059e+37 }
 0xde4   : > { %v3753_v18 = vpop.eup %3752 }
 0xde5   : > { %v2500_v7 = vpop.permute.xlu2 %2499  ;;  %v2426_v27 = vmul.f32 %v3753_v18, %v2379_v20  ;;  %vm2431_vm5 = vweird.f32 %v3753_v18 }
 0xde6   : > { %3520 = vmatmul.msk.f32.gmra.mxu3 %vm797_vm0, %v2500_v7  ;;  %vm2432_vm7 = vmor %vm2430_vm6, %vm2431_vm5 }
 0xde7   : > { %v2427_v12 = vsub.f32 1.0, %v2426_v27 }
 0xde8   : > { %v2376_v61 = vpop.xlane.xlu1 %2375 }
 0xde9   : > { %3754 = vrcp.f32 %v2376_v61  ;;  %v2421_v58 = vand.u32 2147483648, %v2376_v61  ;;  %v2428_v33 = vmul.f32 %v3753_v18, %v2427_v12  ;;  %v2419_v15 = vand.u32 2147483647, %v2376_v61 }
 0xdea   : > { %vm2415_vm2 = vweird.f32 %v2376_v61 }
 0xdeb   : > { %v2422_v40 = vor.u32 1.1754944e-38, %v2421_v58  ;;  %vm2420_vm4 = vcmp.eq.f32.partialorder %v2419_v15, 8.507059e+37  ;;  %v2429_v44 = vadd.f32 %v3753_v18, %v2428_v33 }
 0xdef   : > { %v3755_v50 = vpop.eup %3754 }
 0xdf0   : > { %v2411_v52 = vmul.f32 %v3755_v50, %v2376_v61  ;;  %vm2416_vm15 = vweird.f32 %v3755_v50 }
 0xdf1   : > { %vm2417_vm3 = vmor %vm2415_vm2, %vm2416_vm15 }
 0xdf2   : > { %v2412_v16 = vsub.f32 1.0, %v2411_v52 }
 0xdf4   : > { %v2413_v19 = vmul.f32 %v3755_v50, %v2412_v16  ;;  %v2548_v21 = vpop.f32.mrf.mxu3 }
 0xdf5   : > { %v2549_v38 = vadd.f32 %v4655_v34, %v2548_v21  ;;  %v2433_v34 = vsel %vm2432_vm7, %v3753_v18, %v2429_v44 }
 0xdf6   : > { %v2414_v39 = vadd.f32 %v3755_v50, %v2413_v19  ;;  %v2438_v49 = vsel %vm2435_vm8, %v2437_v47, %v2433_v34 }
 0xdf7   : > { %v2560_v25 = vsel %vm1164_vm10, %v2549_v38, -inf  ;;  %v2439_v56 = vmul.f32 %v3749_v6, %v2438_v49 }
 0xdf8   : > { %2561 = vmax.xlane.f32.xlu2 %v2560_v25  ;;  %v2418_v41 = vsel %vm2417_vm3, %v3755_v50, %v2414_v39 }
 0xdf9   : > { %v2423_v42 = vsel %vm2420_vm4, %v2422_v40, %v2418_v41 }
 0xdfa   : > { %v2424_v24 = vmul.f32 %v3751_v3, %v2423_v42 }
 0xdfc   : > { %3511 = vmatmul.msk.f32.gmra.mxu2 %vm1164_vm10, %v2424_v24 }
 0xe04   : > { %3512 = vmatmul.msk.f32.gmra.mxu2 %vm1164_vm10, %v2439_v56 }
 0xe0c   : > { %3529 = vmatmul.msk.f32.vlgmr.msrb.gmra.mxu2 %vm797_vm0, %v2481_v53  ;;  %v4721_v53 = vld [vmem:[%s5090_s14] ss:$0 sm:$0xff]  ;;  %s3263_s14 = scalar_lea.sflag [#allocation3], %s5094_s1 }
 0xe14   : > { %3530 = vmatmul.msk.f32.gmra.mxu2 %vm797_vm0, %v2484_v54 }
 0xe4f   : > { %v2732_v63 = vpop.f32.mrf.mxu1 }
 0xe57   : > { %v2735_v57 = vpop.f32.mrf.mxu1 }
 0xe69   : > { %v2551_v27 = vpop.f32.mrf.mxu3 }
 0xe6a   : > { %v2552_v12 = vadd.f32 %v4645_v26, %v2551_v27 }
 0xe6b   : > { %v2562_v11 = vpop.xlane.xlu2 %2561 }
 0xe6c   : > { %v2568_v61 = vsub.f32 %v2549_v38, %v2562_v11  ;;  %v2563_v52 = vsel %vm1164_vm10, %v2552_v12, -inf }
 0xe6e   : > { %v2574_v50 = vmul.f32 1.442695, %v2568_v61 }
 0xe70   : > { %3756 = vpow2.f32 %v2574_v50 }
 0xe76   : > { %v4712_v16 = vpop.eup %3756 }
 0xe77   : > { %v2584_v58 = vsel %vm1164_vm10, %v4712_v16, 0.0 }
 0xe7f   : > { %v2487_v62 = vpop.f32.mrf.mxu2 }
 0xe80   : > { %3531 = vmatmul.msk.f32.gmra.mxu2 %vm797_vm0, %v2487_v62 }
 0xe87   : > { %v2490_v60 = vpop.f32.mrf.mxu2 }
 0xe88   : > { %3532 = vmatmul.msk.f32.gmra.mxu2 %vm797_vm0, %v2490_v60 }
 0xe8f   : > { %v2773_v0 = vpop.f32.mrf.mxu2 }
 0xe90   : > { %v2774_v1 = vadd.f32 %v2773_v0, %v2732_v63 }
 0xe92   : > { %v2785_v2 = vadd.f32 %v4698_v45, %v2774_v1 }
 0xe94   : > { %v2789_v4 = vadd.f32 %v2785_v2, %v4552_v13  ;;  %v1846_v2 = vadd.f32 %v4721_v53, %v4562_v22 }
 0xe96   : > { %v2793_v48 = vsel %vm839_vm1, %v2789_v4, 0.0 }
 0xe97   : > { %v2776_v14 = vpop.f32.mrf.mxu2  ;;  %2794 = vadd.xlane.f32.xlu1 %v2793_v48 }
 0xe98   : > { %v2777_v5 = vadd.f32 %v2776_v14, %v2735_v57 }
 0xe9a   : > { %v2786_v55 = vadd.f32 %v4698_v45, %v2777_v5 }
 0xe9c   : > { %v2790_v6 = vadd.f32 %v2786_v55, %v4556_v51 }
 0xe9e   : > { %v2796_v32 = vsel %vm839_vm1, %v2790_v6, 0.0 }
 0xe9f   : > { %2797 = vadd.xlane.f32.xlu1 %v2796_v32 }
 0xf0a   : > { %v2795_v8 = vpop.xlane.xlu1 %2794 }
 0xf0b   : > { %v2805_v9 = vmul.f32 %v2795_v8, %v4420_v37 }
 0xf0d   : > { %v2809_v35 = vsub.f32 %v2789_v4, %v2805_v9 }
 0xf0f   : > { %v2813_v29 = vmul.f32 %v2809_v35, %v2809_v35 }
 0xf11   : > { %v2817_v3 = vsel %vm839_vm1, %v2813_v29, 0.0 }
 0xf12   : > { %2818 = vadd.xlane.f32.xlu0 %v2817_v3  ;;  %v2798_v59 = vpop.xlane.xlu1 %2797  ;;  %v1849_v3 = vadd.f32 %v4721_v53, %v4564_v23 }
 0xf13   : > { %v2806_v43 = vmul.f32 %v2798_v59, %v4420_v37 }
 0xf15   : > { %v2810_v20 = vsub.f32 %v2790_v6, %v2806_v43  ;;  %v1855_v6 = vadd.f32 %v1846_v2, %v4473_v30 }
 0xf17   : > { %v2814_v7 = vmul.f32 %v2810_v20, %v2810_v20  ;;  %v1857_v29 = vsel %vm839_vm1, %v1855_v6, 0.0 }
 0xf19   : > { %v2820_v18 = vsel %vm839_vm1, %v2814_v7, 0.0  ;;  %v4743_v7 = vadd.f32 %v1849_v3, %v4480_v31 }
 0xf1a   : > { %2821 = vadd.xlane.f32.xlu1 %v2820_v18 }
 0xf1b   : > { %v1860_v23 = vsel %vm839_vm1, %v4743_v7, 0.0 }
 0xf22   : > { %2564 = vmax.xlane.f32.xlu1 %v2563_v52 }
 0xf2a   : > { %2585 = vadd.xlane.f32.xlu1 %v2584_v58 }
 0xf85   : > { %v2819_v33 = vpop.xlane.xlu0 %2818 }
 0xf86   : > { %v2829_v19 = vmul.f32 %v2819_v33, %v4420_v37 }
 0xf88   : > { %v2833_v21 = vadd.f32 1e-05, %v2829_v19 }
 0xf8a   : > { %3758 = vrsqrt.f32 %v2833_v21  ;;  %vm2843_vm11 = vweird.f32 %v2833_v21 }
 0xf8d   : > { %v2822_v15 = vpop.xlane.xlu1 %2821 }
 0xf8e   : > { %v2830_v38 = vmul.f32 %v2822_v15, %v4420_v37 }
 0xf90   : > { %v3759_v39 = vpop.eup %3758  ;;  %v2834_v26 = vadd.f32 1e-05, %v2830_v38 }
 0xf91   : > { %v2838_v40 = vmul.f32 %v3759_v39, %v2833_v21  ;;  %vm2844_vm9 = vweird.f32 %v3759_v39 }
 0xf92   : > { %3760 = vrsqrt.f32 %v2834_v26  ;;  %vm2845_vm12 = vmor %vm2843_vm11, %vm2844_vm9  ;;  %vm2853_vm14 = vweird.f32 %v2834_v26 }
 0xf93   : > { %v2839_v25 = vmul.f32 %v3759_v39, %v2838_v40 }
 0xf95   : > { %v2840_v41 = vmul.f32 0.5, %v2839_v25  ;;  %v2565_v44 = vpop.xlane.xlu1 %2564 }
 0xf96   : > { %v2569_v36 = vsub.f32 %v2552_v12, %v2565_v44 }
 0xf97   : > { %v2841_v42 = vsub.f32 1.5, %v2840_v41 }
 0xf98   : > { %v3761_v24 = vpop.eup %3760  ;;  %v2576_v46 = vmul.f32 1.442695, %v2569_v36 }
 0xf99   : > { %v2842_v34 = vmul.f32 %v3759_v39, %v2841_v42  ;;  %v2848_v47 = vmul.f32 %v3761_v24, %v2834_v26  ;;  %vm2854_vm13 = vweird.f32 %v3761_v24 }
 0xf9a   : > { %3762 = vpow2.f32 %v2576_v46  ;;  %vm2855_vm15 = vmor %vm2853_vm14, %vm2854_vm13 }
 0xf9b   : > { %v2846_v49 = vsel %vm2845_vm12, %v3759_v39, %v2842_v34  ;;  %v2849_v56 = vmul.f32 %v3761_v24, %v2848_v47 }
 0xf9c   : > { %v2877_v54 = vmul.f32 %v2846_v49, %v2809_v35 }
 0xf9d   : > { %v2850_v62 = vmul.f32 0.5, %v2849_v56  ;;  %v2586_v60 = vpop.xlane.xlu1 %2585 }
 0xf9e   : > { %v2881_v63 = vmul.f32 %v2877_v54, %v4460_v17  ;;  %3764 = vrcp.f32 %v2586_v60  ;;  %v2631_v9 = vand.u32 2147483648, %v2586_v60  ;;  %v2629_v43 = vand.u32 2147483647, %v2586_v60 }
 0xf9f   : > { %v2851_v0 = vsub.f32 1.5, %v2850_v62  ;;  %vm2625_vm3 = vweird.f32 %v2586_v60 }
 0xfa0   : > { %v3763_v1 = vpop.eup %3762  ;;  %v4727_v4 = vadd.f32 %v2881_v63, %v4468_v28  ;;  %v2632_v11 = vor.u32 1.1754944e-38, %v2631_v9  ;;  %vm2630_vm5 = vcmp.eq.f32.partialorder %v2629_v43, 8.507059e+37 }
 0xfa1   : > { %v2852_v48 = vmul.f32 %v3761_v24, %v2851_v0  ;;  %v2587_v57 = vsel %vm1164_vm10, %v3763_v1, 0.0 }
 0xfa2   : > { %3533 = vmatmul.msk.f32.vlgmr.msra.gmra.mxu3 %vm839_vm1, %v4727_v4  ;;  %2588 = vadd.xlane.f32.xlu1 %v2587_v57 }
 0xfa3   : > { %v2856_v14 = vsel %vm2855_vm15, %v3761_v24, %v2852_v48 }
 0xfa4   : > { %v3765_v5 = vpop.eup %3764  ;;  %v2878_v55 = vmul.f32 %v2856_v14, %v2810_v20 }
 0xfa5   : > { %v2621_v32 = vmul.f32 %v3765_v5, %v2586_v60  ;;  %vm2626_vm2 = vweird.f32 %v3765_v5 }
 0xfa6   : > { %v2882_v22 = vmul.f32 %v2878_v55, %v4460_v17  ;;  %vm2627_vm4 = vmor %vm2625_vm3, %vm2626_vm2 }
 0xfa7   : > { %v2622_v8 = vsub.f32 1.0, %v2621_v32 }
 0xfa8   : > { %v4735_v35 = vadd.f32 %v2882_v22, %v4468_v28 }
 0xfa9   : > { %v2623_v59 = vmul.f32 %v3765_v5, %v2622_v8 }
 0xfaa   : > { %3534 = vmatmul.msk.f32.gmra.mxu3 %vm839_vm1, %v4735_v35  ;;  %1858 = vadd.xlane.f32.xlu1 %v1857_v29 }
 0xfab   : > { %v2624_v30 = vadd.f32 %v3765_v5, %v2623_v59 }
 0xfad   : > { %v2628_v20 = vsel %vm2627_vm4, %v3765_v5, %v2624_v30 }
 0xfae   : > { %v2633_v61 = vsel %vm2630_vm5, %v2632_v11, %v2628_v20 }
 0xfaf   : > { %v2634_v18 = vmul.f32 %v4712_v16, %v2633_v61 }
 0xfb1   : > { %3523 = vmatmul.msk.f32.gmra.mxu0 %vm1164_vm10, %v2634_v18 }
 0xfb2   : > { %1861 = vadd.xlane.f32.xlu1 %v1860_v23 }
0x1015   : > { %v2589_v27 = vpop.xlane.xlu1 %2588 }
0x1016   : > { %3766 = vrcp.f32 %v2589_v27  ;;  %v2646_v19 = vand.u32 2147483648, %v2589_v27  ;;  %v2644_v16 = vand.u32 2147483647, %v2589_v27  ;;  %vm2640_vm7 = vweird.f32 %v2589_v27 }
0x1018   : > { %v2647_v39 = vor.u32 1.1754944e-38, %v2646_v19  ;;  %vm2645_vm9 = vcmp.eq.f32.partialorder %v2644_v16, 8.507059e+37 }
0x101c   : > { %v3767_v50 = vpop.eup %3766 }
0x101d   : > { %v2636_v12 = vmul.f32 %v3767_v50, %v2589_v27  ;;  %v1859_v52 = vpop.xlane.xlu1 %1858  ;;  %vm2641_vm6 = vweird.f32 %v3767_v50 }
0x101e   : > { %v1863_v58 = vmul.f32 %v1859_v52, %v4420_v37  ;;  %vm2642_vm8 = vmor %vm2640_vm7, %vm2641_vm6 }
0x101f   : > { %v2637_v33 = vsub.f32 1.0, %v2636_v12 }
0x1020   : > { %v4750_v31 = vsub.f32 %v1855_v6, %v1863_v58 }
0x1021   : > { %v2638_v21 = vmul.f32 %v3767_v50, %v2637_v33 }
0x1022   : > { %v1867_v15 = vmul.f32 %v4750_v31, %v4750_v31 }
0x1023   : > { %v2639_v38 = vadd.f32 %v3767_v50, %v2638_v21 }
0x1024   : > { %v1869_v26 = vsel %vm839_vm1, %v1867_v15, 0.0 }
0x1025   : > { %v2918_v40 = vpop.f32.mrf.mxu3  ;;  %1870 = vadd.xlane.f32.xlu2 %v1869_v26  ;;  %v2643_v25 = vsel %vm2642_vm8, %v3767_v50, %v2639_v38  ;;  %v1862_v3 = vpop.xlane.xlu1 %1861  ;;  %v4777_v38 = vld [vmem:[%s5082_s15] sm:$0x3f] }
0x1026   : > { %v2919_v41 = vadd.f32 %v4539_v10, %v2918_v40  ;;  %v2648_v44 = vsel %vm2645_vm9, %v2647_v39, %v2643_v25  ;;  %v1864_v43 = vmul.f32 %v1862_v3, %v4420_v37  ;;  %v4780_v39 = vperm.slane %v4777_v38, 2 }
0x1027   : > { %v2649_v36 = vmul.f32 %v3763_v1, %v2648_v44 }
0x1028   : > { %v2934_v42 = vmul.f32 0.044715, %v2919_v41  ;;  %v2930_v48 = vmul.f32 0.5, %v2919_v41  ;;  %v1866_v20 = vsub.f32 %v4743_v7, %v1864_v43 }
0x1029   : > { %3524 = vmatmul.msk.f32.gmra.mxu0 %vm1164_vm10, %v2649_v36 }
0x102a   : > { %v2938_v24 = vmul.f32 %v2934_v42, %v2919_v41  ;;  %v1868_v18 = vmul.f32 %v1866_v20, %v1866_v20 }
0x102c   : > { %v2942_v46 = vmul.f32 %v2938_v24, %v2919_v41  ;;  %v1872_v23 = vsel %vm839_vm1, %v1868_v18, 0.0 }
0x102d   : > { %v2921_v34 = vpop.f32.mrf.mxu3 }
0x102e   : > { %v2946_v47 = vadd.f32 %v2942_v46, %v2919_v41  ;;  %v2922_v49 = vadd.f32 %v4539_v10, %v2921_v34  ;;  %v2697_v56 = vpop.f32.mrf.mxu0  ;;  %v4785_v41 = vperm.slane %v4777_v38, 3 }
0x102f   : > { %3527 = vmatmul.msk.f32.gmra.mxu1 %vm797_vm0, %v2697_v56 }
0x1030   : > { %v2950_v54 = vmul.f32 0.7978846, %v2946_v47  ;;  %v2935_v62 = vmul.f32 0.044715, %v2922_v49  ;;  %v2931_v55 = vmul.f32 0.5, %v2922_v49 }
0x1032   : > { %3768 = vtanh.f32 %v2950_v54  ;;  %v2939_v60 = vmul.f32 %v2935_v62, %v2922_v49 }
0x1034   : > { %v2943_v63 = vmul.f32 %v2939_v60, %v2922_v49 }
0x1036   : > { %v2947_v0 = vadd.f32 %v2943_v63, %v2922_v49 }
0x1038   : > { %v3769_v2 = vpop.eup %3768  ;;  %v2951_v1 = vmul.f32 0.7978846, %v2947_v0 }
0x1039   : > { %v2958_v57 = vadd.f32 1.0, %v3769_v2 }
0x103a   : > { %3770 = vtanh.f32 %v2951_v1 }
0x103b   : > { %v2962_v14 = vmul.f32 %v2958_v57, %v2930_v48 }
0x103d   : > { %3537 = vmatmul.msk.f32.vlgmr.msra.gmra.mxu0 %vm1164_vm10, %v2962_v14 }
0x1040   : > { %v3771_v5 = vpop.eup %3770 }
0x1041   : > { %v2959_v10 = vadd.f32 1.0, %v3771_v5 }
0x1043   : > { %v2963_v6 = vmul.f32 %v2959_v10, %v2931_v55 }
0x1045   : > { %3538 = vmatmul.msk.f32.gmra.mxu0 %vm1164_vm10, %v2963_v6 }
0x10a6   : > { %v2700_v32 = vpop.f32.mrf.mxu0 }
0x10a7   : > { %3528 = vmatmul.msk.f32.gmra.mxu1 %vm797_vm0, %v2700_v32 }
0x10ba   : > { %v2995_v22 = vpop.f32.mrf.mxu0 }
0x10bb   : > { %v2996_v8 = vadd.f32 %v4721_v53, %v2995_v22 }
0x10bd   : > { %v3005_v9 = vadd.f32 %v2996_v8, %v4727_v4  ;;  %v1871_v4 = vpop.xlane.xlu2 %1870 }
0x10be   : > { %v1875_v27 = vmul.f32 %v1871_v4, %v4420_v37 }
0x10bf   : > { %v3007_v29 = vsel %vm839_vm1, %v3005_v9, 0.0 }
0x10c0   : > { %3008 = vadd.xlane.f32.xlu0 %v3007_v29  ;;  %v1877_v50 = vadd.f32 1e-05, %v1875_v27 }
0x10c2   : > { %v2998_v59 = vpop.f32.mrf.mxu0  ;;  %3772 = vrsqrt.f32 %v1877_v50  ;;  %vm1885_vm11 = vweird.f32 %v1877_v50 }
0x10c3   : > { %v2999_v30 = vadd.f32 %v4721_v53, %v2998_v59 }
0x10c5   : > { %v3006_v11 = vadd.f32 %v2999_v30, %v4735_v35 }
0x10c7   : > { %v3010_v61 = vsel %vm839_vm1, %v3006_v11, 0.0 }
0x10c8   : > { %3011 = vadd.xlane.f32.xlu0 %v3010_v61  ;;  %v3773_v12 = vpop.eup %3772 }
0x10c9   : > { %v1880_v52 = vmul.f32 %v3773_v12, %v1877_v50  ;;  %vm1886_vm0 = vweird.f32 %v3773_v12 }
0x10ca   : > { %vm1887_vm12 = vmor %vm1885_vm11, %vm1886_vm0 }
0x10cb   : > { %v1881_v58 = vmul.f32 %v3773_v12, %v1880_v52 }
0x10cd   : > { %v1882_v53 = vmul.f32 0.5, %v1881_v58 }
0x10cf   : > { %v1883_v33 = vsub.f32 1.5, %v1882_v53 }
0x10d0   : > { %1873 = vadd.xlane.f32.xlu0 %v1872_v23 }
0x10d1   : > { %v1884_v35 = vmul.f32 %v3773_v12, %v1883_v33 }
0x10d3   : > { %v1888_v19 = vsel %vm1887_vm12, %v3773_v12, %v1884_v35 }
0x10d4   : > { %v1899_v15 = vmul.f32 %v1888_v19, %v4750_v31 }
0x10d6   : > { %v1902_v25 = vmul.f32 %v4780_v39, %v1899_v15 }
0x10d8   : > { %v1905_v42 = vadd.f32 %v4785_v41, %v1902_v25 }
0x10da   : > { %v1907_v34 = vsel %vm839_vm1, %v1905_v42, 0.0 }
0x1133   : > { %v3009_v7 = vpop.xlane.xlu0 %3008 }
0x1134   : > { %v3013_v21 = vmul.f32 %v3009_v7, %v4420_v37 }
0x1136   : > { %v3015_v16 = vsub.f32 %v3005_v9, %v3013_v21 }
0x1138   : > { %v3017_v26 = vmul.f32 %v3015_v16, %v3015_v16 }
0x113a   : > { %v3019_v40 = vsel %vm839_vm1, %v3017_v26, 0.0 }
0x113b   : > { %3020 = vadd.xlane.f32.xlu1 %v3019_v40  ;;  %v3012_v44 = vpop.xlane.xlu0 %3011 }
0x113c   : > { %v3014_v31 = vmul.f32 %v3012_v44, %v4420_v37 }
0x113e   : > { %v4788_v36 = vsub.f32 %v3006_v11, %v3014_v31 }
0x1140   : > { %v3018_v24 = vmul.f32 %v4788_v36, %v4788_v36 }
0x1142   : > { %v3022_v46 = vsel %vm839_vm1, %v3018_v24, 0.0 }
0x1143   : > { %3023 = vadd.xlane.f32.xlu2 %v3022_v46  ;;  %1908 = vadd.xlane.f32.xlu1 %v1907_v34  ;;  %v1874_v47 = vpop.xlane.xlu0 %1873 }
0x1144   : > { %v1876_v49 = vmul.f32 %v1874_v47, %v4420_v37 }
0x1146   : > { %v1878_v56 = vadd.f32 1e-05, %v1876_v49 }
0x1148   : > { %3774 = vrsqrt.f32 %v1878_v56  ;;  %vm1895_vm14 = vweird.f32 %v1878_v56 }
0x114e   : > { %v3775_v54 = vpop.eup %3774 }
0x114f   : > { %v1890_v62 = vmul.f32 %v3775_v54, %v1878_v56  ;;  %vm1896_vm13 = vweird.f32 %v3775_v54  ;;  %v3886_v56 = vmov 0  }
0x1150   : > { %vm1897_vm15 = vmor %vm1895_vm14, %vm1896_vm13  ;;  %3643 = vset.pattern.permute.xlu2 %v3886_v56  ;;  %3645 = vset.pattern.permute.xlu0 %v3886_v56 }
0x1151   : > { %v1891_v60 = vmul.f32 %v3775_v54, %v1890_v62  ;;  %v3652_v62 = vld [vmem:[%s778_s2] ss:$0 sm:$0xff] }
0x1153   : > { %v1892_v63 = vmul.f32 0.5, %v1891_v60  ;;  %v2779_v60 = vpop.f32.mrf.mxu2 }
0x1155   : > { %v1893_v0 = vsub.f32 1.5, %v1892_v63  ;;  %v2738_v63 = vpop.f32.mrf.mxu1 }
0x1157   : > { %v1894_v2 = vmul.f32 %v3775_v54, %v1893_v0  ;;  %v3887_v0 = vmov 1  }
0x1158   : > { %3644 = vset.pattern.permute.xlu1 %v3887_v0 }
0x1159   : > { %v1898_v1 = vsel %vm1897_vm15, %v3775_v54, %v1894_v2 }
0x115a   : > { %v1900_v48 = vmul.f32 %v1898_v1, %v1866_v20  ;;  %v2780_v1 = vadd.f32 %v2779_v60, %v2738_v63 }
0x115c   : > { %v1903_v57 = vmul.f32 %v4780_v39, %v1900_v48 }
0x115e   : > { %v1906_v14 = vadd.f32 %v4785_v41, %v1903_v57  ;;  %v4837_v57 = vadd.f32 %v4698_v45, %v2780_v1 }
0x1160   : > { %v1910_v5 = vsel %vm839_vm1, %v1906_v14, 0.0 }
0x1161   : > { %1911 = vadd.xlane.f32.xlu2 %v1910_v5  ;;  %v2782_v5 = vpop.f32.mrf.mxu2 }
0x11ae   : > { %v3021_v55 = vpop.xlane.xlu1 %3020 }
0x11af   : > { %v3025_v10 = vmul.f32 %v3021_v55, %v4420_v37 }
0x11b1   : > { %v3027_v6 = vadd.f32 1e-05, %v3025_v10  ;;  %v2799_v10 = vsel %vm839_vm1, %v4837_v57, 0.0 }
0x11b3   : > { %3776 = vrsqrt.f32 %v3027_v6  ;;  %vm3035_vm3 = vweird.f32 %v3027_v6 }
0x11b6   : > { %v3024_v32 = vpop.xlane.xlu2 %3023  ;;  %v1909_v18 = vpop.xlane.xlu1 %1908 }
0x11b7   : > { %v3026_v22 = vmul.f32 %v3024_v32, %v4420_v37  ;;  %v1913_v50 = vmul.f32 %v1909_v18, %v4420_v37 }
0x11b9   : > { %v3777_v8 = vpop.eup %3776  ;;  %v3028_v9 = vadd.f32 1e-05, %v3026_v22  ;;  %v4804_v33 = vsub.f32 %v1905_v42, %v1913_v50 }
0x11ba   : > { %v3030_v29 = vmul.f32 %v3777_v8, %v3027_v6  ;;  %vm3036_vm2 = vweird.f32 %v3777_v8 }
0x11bb   : > { %3778 = vrsqrt.f32 %v3028_v9  ;;  %vm3037_vm4 = vmor %vm3035_vm3, %vm3036_vm2  ;;  %vm3045_vm6 = vweird.f32 %v3028_v9 }
0x11bc   : > { %v3031_v3 = vmul.f32 %v3777_v8, %v3030_v29 }
0x11be   : > { %v3032_v59 = vmul.f32 0.5, %v3031_v3 }
0x11c0   : > { %v3033_v43 = vsub.f32 1.5, %v3032_v59 }
0x11c1   : > { %v3779_v30 = vpop.eup %3778 }
0x11c2   : > { %v3034_v11 = vmul.f32 %v3777_v8, %v3033_v43  ;;  %v3040_v20 = vmul.f32 %v3779_v30, %v3028_v9  ;;  %vm3046_vm5 = vweird.f32 %v3779_v30 }
0x11c3   : > { %vm3047_vm7 = vmor %vm3045_vm6, %vm3046_vm5 }
0x11c4   : > { %v3041_v61 = vmul.f32 %v3779_v30, %v3040_v20  ;;  %v3038_v23 = vsel %vm3037_vm4, %v3777_v8, %v3034_v11 }
0x11c5   : > { %v3049_v4 = vmul.f32 %v3038_v23, %v3015_v16  ;;  %v1917_v16 = vmul.f32 %v4804_v33, %v4804_v33 }
0x11c6   : > { %v3042_v27 = vmul.f32 0.5, %v3041_v61 }
0x11c7   : > { %v3051_v12 = vmul.f32 %v3049_v4, %v4780_v39  ;;  %v1919_v40 = vsel %vm839_vm1, %v1917_v16, 0.0 }
0x11c8   : > { %v3043_v52 = vsub.f32 1.5, %v3042_v27 }
0x11c9   : > { %v3053_v58 = vadd.f32 %v3051_v12, %v4785_v41 }
0x11ca   : > { %v3044_v53 = vmul.f32 %v3779_v30, %v3043_v52 }
0x11cb   : > { %v3055_v35 = vsel %vm839_vm1, %v3053_v58, 0.0 }
0x11cc   : > { %3056 = vadd.xlane.f32.xlu0 %v3055_v35  ;;  %v3048_v7 = vsel %vm3047_vm7, %v3779_v30, %v3044_v53  ;;  %v1951_v53 = vperm.slane %v4777_v38, 4 }
0x11cd   : > { %v3050_v19 = vmul.f32 %v3048_v7, %v4788_v36 }
0x11cf   : > { %v3052_v21 = vmul.f32 %v3050_v19, %v4780_v39 }
0x11d1   : > { %v3054_v15 = vadd.f32 %v3052_v21, %v4785_v41  ;;  %v1954_v21 = vperm.slane %v4777_v38, 5 }
0x11d3   : > { %v3058_v26 = vsel %vm839_vm1, %v3054_v15, 0.0 }
0x11d4   : > { %3059 = vadd.xlane.f32.xlu1 %v3058_v26  ;;  %v1912_v25 = vpop.xlane.xlu2 %1911  ;;  %1920 = vadd.xlane.f32.xlu0 %v1919_v40 }
0x11d5   : > { %v1914_v44 = vmul.f32 %v1912_v25, %v4420_v37 }
0x11d7   : > { %v4815_v31 = vsub.f32 %v1906_v14, %v1914_v44  ;;  %v2741_v14 = vpop.f32.mrf.mxu1 }
0x11d8   : > { %v2783_v55 = vadd.f32 %v2782_v5, %v2741_v14 }
0x11d9   : > { %v1918_v36 = vmul.f32 %v4815_v31, %v4815_v31 }
0x11da   : > { %v4842_v6 = vadd.f32 %v4698_v45, %v2783_v55 }
0x11db   : > { %v1922_v39 = vsel %vm839_vm1, %v1918_v36, 0.0 }
0x11dc   : > { %1923 = vadd.xlane.f32.xlu1 %v1922_v39  ;;  %v2802_v32 = vsel %vm839_vm1, %v4842_v6, 0.0 }
0x11f5   : > { %3122 = vperm.xlu1 %3644, %v3652_v62  }
0x123f   : > { %v3057_v41 = vpop.xlane.xlu0 %3056 }
0x1240   : > { %v3061_v42 = vmul.f32 %v3057_v41, %v4420_v37 }
0x1242   : > { %v4825_v24 = vsub.f32 %v3053_v58, %v3061_v42 }
0x1244   : > { %v3065_v46 = vmul.f32 %v4825_v24, %v4825_v24 }
0x1246   : > { %v3067_v34 = vsel %vm839_vm1, %v3065_v46, 0.0 }
0x1247   : > { %3068 = vadd.xlane.f32.xlu2 %v3067_v34  ;;  %v3060_v47 = vpop.xlane.xlu1 %3059  ;;  %v1921_v22 = vpop.xlane.xlu0 %1920 }
0x1248   : > { %v3062_v49 = vmul.f32 %v3060_v47, %v4420_v37  ;;  %v1925_v8 = vmul.f32 %v1921_v22, %v4420_v37 }
0x124a   : > { %v4831_v54 = vsub.f32 %v3054_v15, %v3062_v49  ;;  %v1927_v9 = vadd.f32 1e-05, %v1925_v8 }
0x124c   : > { %v3066_v2 = vmul.f32 %v4831_v54, %v4831_v54  ;;  %3780 = vrsqrt.f32 %v1927_v9  ;;  %vm1935_vm9 = vweird.f32 %v1927_v9 }
0x124e   : > { %v3070_v48 = vsel %vm839_vm1, %v3066_v2, 0.0 }
0x124f   : > { %3071 = vadd.xlane.f32.xlu0 %v3070_v48  ;;  %v1924_v29 = vpop.xlane.xlu1 %1923 }
0x1250   : > { %v1926_v3 = vmul.f32 %v1924_v29, %v4420_v37 }
0x1252   : > { %v1928_v59 = vadd.f32 1e-05, %v1926_v3  ;;  %v3781_v43 = vpop.eup %3780 }
0x1253   : > { %v1930_v30 = vmul.f32 %v3781_v43, %v1927_v9  ;;  %vm1936_vm8 = vweird.f32 %v3781_v43 }
0x1254   : > { %3782 = vrsqrt.f32 %v1928_v59  ;;  %vm1937_vm0 = vmor %vm1935_vm9, %vm1936_vm8  ;;  %vm1945_vm12 = vweird.f32 %v1928_v59 }
0x1255   : > { %v1931_v11 = vmul.f32 %v3781_v43, %v1930_v30 }
0x1257   : > { %2800 = vadd.xlane.f32.xlu0 %v2799_v10  ;;  %v1932_v20 = vmul.f32 0.5, %v1931_v11 }
0x1259   : > { %v1933_v18 = vsub.f32 1.5, %v1932_v20 }
0x125a   : > { %v3783_v45 = vpop.eup %3782 }
0x125b   : > { %v1940_v61 = vmul.f32 %v3783_v45, %v1928_v59  ;;  %v1934_v4 = vmul.f32 %v3781_v43, %v1933_v18  ;;  %vm1946_vm11 = vweird.f32 %v3783_v45 }
0x125c   : > { %vm1947_vm13 = vmor %vm1945_vm12, %vm1946_vm11 }
0x125d   : > { %v1941_v23 = vmul.f32 %v3783_v45, %v1940_v61  ;;  %v1938_v50 = vsel %vm1937_vm0, %v3781_v43, %v1934_v4 }
0x125e   : > { %v1949_v35 = vmul.f32 %v1938_v50, %v4804_v33 }
0x125f   : > { %2803 = vadd.xlane.f32.xlu0 %v2802_v32  ;;  %1978 = vperm.xlu2 %3643, %v3652_v62   ;;  %v1942_v27 = vmul.f32 0.5, %v1941_v23 }
0x1260   : > { %v1952_v16 = vmul.f32 %v1951_v53, %v1949_v35 }
0x1261   : > { %v1943_v12 = vsub.f32 1.5, %v1942_v27 }
0x1262   : > { %v1955_v44 = vadd.f32 %v1954_v21, %v1952_v16 }
0x1263   : > { %v1944_v19 = vmul.f32 %v3783_v45, %v1943_v12 }
0x1264   : > { %v1959_v46 = vmul.f32 0.044715, %v1955_v44 }
0x1265   : > { %v1948_v15 = vsel %vm1947_vm13, %v3783_v45, %v1944_v19 }
0x1266   : > { %v1950_v36 = vmul.f32 %v1948_v15, %v4815_v31  ;;  %v1961_v60 = vmul.f32 %v1959_v46, %v1955_v44  ;;  %v1957_v15 = vmul.f32 0.5, %v1955_v44 }
0x1268   : > { %v1953_v42 = vmul.f32 %v1951_v53, %v1950_v36  ;;  %v1963_v55 = vmul.f32 %v1961_v60, %v1955_v44 }
0x126a   : > { %v4855_v62 = vadd.f32 %v1954_v21, %v1953_v42  ;;  %v1965_v29 = vadd.f32 %v1963_v55, %v1955_v44 }
0x126c   : > { %v1960_v5 = vmul.f32 0.044715, %v4855_v62  ;;  %v1967_v30 = vmul.f32 0.7978846, %v1965_v29 }
0x126e   : > { %v1962_v9 = vmul.f32 %v1960_v5, %v4855_v62 }
0x12ba   : > { %v3069_v52 = vpop.xlane.xlu2 %3068 }
0x12bb   : > { %v3073_v58 = vmul.f32 %v3069_v52, %v4420_v37 }
0x12bd   : > { %v3075_v7 = vadd.f32 1e-05, %v3073_v58 }
0x12bf   : > { %3784 = vrsqrt.f32 %v3075_v7  ;;  %vm3083_vm15 = vweird.f32 %v3075_v7 }
0x12c2   : > { %v3072_v26 = vpop.xlane.xlu0 %3071 }
0x12c3   : > { %v3074_v40 = vmul.f32 %v3072_v26, %v4420_v37 }
0x12c5   : > { %v3785_v25 = vpop.eup %3784  ;;  %v3076_v39 = vadd.f32 1e-05, %v3074_v40  ;;  %v1979_v40 = vpop.permute.xlu2 %1978 }
0x12c6   : > { %v3078_v41 = vmul.f32 %v3785_v25, %v3075_v7  ;;  %vm3084_vm14 = vweird.f32 %v3785_v25 }
0x12c7   : > { %3786 = vrsqrt.f32 %v3076_v39  ;;  %vm3085_vm2 = vmor %vm3083_vm15, %vm3084_vm14  ;;  %vm3093_vm4 = vweird.f32 %v3076_v39 }
0x12c8   : > { %v3079_v33 = vmul.f32 %v3785_v25, %v3078_v41  ;;  %3788 = vtanh.f32 %v1967_v30 }
0x12ca   : > { %v3080_v34 = vmul.f32 0.5, %v3079_v33  ;;  %v2801_v47 = vpop.xlane.xlu0 %2800 }
0x12cb   : > { %v2807_v38 = vmul.f32 %v2801_v47, %v4420_v37 }
0x12cc   : > { %v3081_v49 = vsub.f32 1.5, %v3080_v34 }
0x12cd   : > { %v3787_v56 = vpop.eup %3786  ;;  %v4858_v63 = vsub.f32 %v4837_v57, %v2807_v38 }
0x12ce   : > { %v3082_v31 = vmul.f32 %v3785_v25, %v3081_v49  ;;  %v3088_v0 = vmul.f32 %v3787_v56, %v3076_v39  ;;  %vm3094_vm3 = vweird.f32 %v3787_v56  ;;  %v3789_v58 = vpop.eup %3788  ;;  %v1958_v49 = vmul.f32 0.5, %v4855_v62 }
0x12cf   : > { %v2815_v2 = vmul.f32 %v4858_v63, %v4858_v63  ;;  %vm3095_vm5 = vmor %vm3093_vm4, %vm3094_vm3  ;;  %v1971_v19 = vadd.f32 1.0, %v3789_v58 }
0x12d0   : > { %v3086_v1 = vsel %vm3085_vm2, %v3785_v25, %v3082_v31  ;;  %v3089_v48 = vmul.f32 %v3787_v56, %v3088_v0  ;;  %v3123_v25 = vpop.permute.xlu1 %3122 }
0x12d1   : > { %v3097_v14 = vmul.f32 %v3086_v1, %v4825_v24  ;;  %v2823_v10 = vsel %vm839_vm1, %v2815_v2, 0.0  ;;  %v1964_v24 = vmul.f32 %v1962_v9, %v4855_v62 }
0x12d2   : > { %v3090_v32 = vmul.f32 0.5, %v3089_v48  ;;  %2824 = vadd.xlane.f32.xlu1 %v2823_v10  ;;  %v2804_v41 = vpop.xlane.xlu0 %2803 }
0x12d3   : > { %v3099_v57 = vmul.f32 %v3097_v14, %v1951_v53  ;;  %v1966_v18 = vadd.f32 %v1964_v24, %v4855_v62  ;;  %v2808_v34 = vmul.f32 %v2804_v41, %v4420_v37 }
0x12d4   : > { %v3091_v22 = vsub.f32 1.5, %v3090_v32 }
0x12d5   : > { %v3101_v8 = vadd.f32 %v3099_v57, %v1954_v21  ;;  %v1968_v12 = vmul.f32 0.7978846, %v1966_v18  ;;  %v2812_v0 = vsub.f32 %v4842_v6, %v2808_v34 }
0x12d6   : > { %v3092_v3 = vmul.f32 %v3787_v56, %v3091_v22 }
0x12d7   : > { %v3105_v59 = vmul.f32 0.044715, %v3101_v8  ;;  %v2816_v55 = vmul.f32 %v2812_v0, %v2812_v0 }
0x12d8   : > { %v3096_v43 = vsel %vm3095_vm5, %v3787_v56, %v3092_v3 }
0x12d9   : > { %v3098_v11 = vmul.f32 %v3096_v43, %v4831_v54  ;;  %v3107_v45 = vmul.f32 %v3105_v59, %v3101_v8  ;;  %v2826_v62 = vsel %vm839_vm1, %v2816_v55, 0.0 }
0x12db   : > { %v3100_v20 = vmul.f32 %v3098_v11, %v1951_v53  ;;  %v3109_v61 = vmul.f32 %v3107_v45, %v3101_v8  ;;  %v3103_v53 = vmul.f32 0.5, %v3101_v8 }
0x12dd   : > { %v3102_v23 = vadd.f32 %v3100_v20, %v1954_v21  ;;  %v3111_v4 = vadd.f32 %v3109_v61, %v3101_v8  ;;  %v1973_v21 = vmul.f32 %v1971_v19, %v1957_v15 }
0x12df   : > { %v3106_v27 = vmul.f32 0.044715, %v3102_v23  ;;  %v3113_v50 = vmul.f32 0.7978846, %v3111_v4  ;;  %v1981_v33 = vmul.f32 %v1979_v40, %v1973_v21  ;;  %v3104_v56 = vmul.f32 0.5, %v3102_v23  ;;  %v3186_v21 = vld [vmem:[%s5003_s17 + $0x8] sm:$0xff] }
0x12e0   : > { %3211 = vmatpush.msrb.mxu1 %v3186_v21 }
0x12e1   : > { %v3108_v52 = vmul.f32 %v3106_v27, %v3102_v23  ;;  %3790 = vtanh.f32 %v3113_v50 }
0x12e2   : > { %3792 = vtanh.f32 %v1968_v12 }
0x12e3   : > { %v3110_v35 = vmul.f32 %v3108_v52, %v3102_v23 }
0x12e5   : > { %v3112_v7 = vadd.f32 %v3110_v35, %v3102_v23 }
0x12e7   : > { %v3791_v16 = vpop.eup %3790  ;;  %v3114_v54 = vmul.f32 0.7978846, %v3112_v7 }
0x12e8   : > { %v3117_v26 = vadd.f32 1.0, %v3791_v16  ;;  %v3793_v39 = vpop.eup %3792 }
0x12e9   : > { %3794 = vtanh.f32 %v3114_v54  ;;  %v1972_v46 = vadd.f32 1.0, %v3793_v39 }
0x12ea   : > { %v3119_v36 = vmul.f32 %v3117_v26, %v3103_v53 }
0x12eb   : > { %v1974_v31 = vmul.f32 %v1972_v46, %v1958_v49 }
0x12ec   : > { %v3125_v42 = vmul.f32 %v3123_v25, %v3119_v36  ;;  %v3185_v36 = vld [vmem:[%s5003_s17] sm:$0xff] }
0x12ed   : > { %v1982_v48 = vmul.f32 %v1979_v40, %v1974_v31  ;;  %3212 = vmatpush.msrb.mxu1 %v3185_v36 }
0x12ee   : > { %v3127_v47 = vadd.f32 %v3125_v42, %v1981_v33 }
0x12ef   : > { %v3795_v38 = vpop.eup %3794 }
0x12f0   : > { %v3118_v44 = vadd.f32 1.0, %v3795_v38  ;;  %v3129_v60 = vadd.f32 %v3127_v47, %v4552_v13 }
0x12f2   : > { %v3120_v2 = vmul.f32 %v3118_v44, %v3104_v56  ;;  %v3133_v1 = vsel %vm839_vm1, %v3129_v60, 0.0 }
0x12f3   : > { %3134 = vadd.xlane.f32.xlu0 %v3133_v1 }
0x12f4   : > { %v3126_v14 = vmul.f32 %v3123_v25, %v3120_v2 }
0x12f6   : > { %v3128_v5 = vadd.f32 %v3126_v14, %v1982_v48 }
0x12f8   : > { %v3130_v10 = vadd.f32 %v3128_v5, %v4556_v51 }
0x12fa   : > { %v3136_v32 = vsel %vm839_vm1, %v3130_v10, 0.0 }
0x12fb   : > { %3137 = vadd.xlane.f32.xlu2 %v3136_v32  ;;  %2827 = vadd.xlane.f32.xlu0 %v2826_v62 }
0x1345   : > { %v2825_v13 = vpop.xlane.xlu1 %2824 }
0x1346   : > { %v2831_v57 = vmul.f32 %v2825_v13, %v4420_v37 }
0x1348   : > { %v2835_v6 = vadd.f32 1e-05, %v2831_v57  ;;  %v3654_v57 = vld [vmem:[%s5092_s16 + $0x1] ss:$0 sm:$0xff] }
0x134a   : > { %3796 = vrsqrt.f32 %v2835_v6  ;;  %vm2863_vm7 = vweird.f32 %v2835_v6 }
0x1350   : > { %v3797_v22 = vpop.eup %3796 }
0x1351   : > { %v2858_v8 = vmul.f32 %v3797_v22, %v2835_v6  ;;  %vm2864_vm6 = vweird.f32 %v3797_v22 }
0x1352   : > { %vm2865_vm8 = vmor %vm2863_vm7, %vm2864_vm6 }
0x1353   : > { %v2859_v9 = vmul.f32 %v3797_v22, %v2858_v8 }
0x1355   : > { %v2860_v29 = vmul.f32 0.5, %v2859_v9 }
0x1357   : > { %v2861_v3 = vsub.f32 1.5, %v2860_v29 }
0x1359   : > { %v2862_v59 = vmul.f32 %v3797_v22, %v2861_v3 }
0x135b   : > { %v2866_v51 = vsel %vm2865_vm8, %v3797_v22, %v2862_v59 }
0x135c   : > { %v2879_v43 = vmul.f32 %v2866_v51, %v4858_v63 }
0x135e   : > { %v2883_v24 = vmul.f32 %v2879_v43, %v4460_v17 }
0x1360   : > { %v2887_v30 = vadd.f32 %v2883_v24, %v4468_v28 }
0x1362   : > { %3535 = vmatmul.msk.f32.gmra.mxu3 %vm839_vm1, %v2887_v30 }
0x1366   : > { %v3135_v11 = vpop.xlane.xlu0 %3134 }
0x1367   : > { %v3139_v45 = vmul.f32 %v3135_v11, %v4420_v37 }
0x1369   : > { %v4883_v20 = vsub.f32 %v3129_v60, %v3139_v45 }
0x136b   : > { %v3143_v61 = vmul.f32 %v4883_v20, %v4883_v20 }
0x136d   : > { %v3145_v18 = vsel %vm839_vm1, %v3143_v61, 0.0 }
0x136e   : > { %v3138_v23 = vpop.xlane.xlu2 %3137  ;;  %3146 = vadd.xlane.f32.xlu0 %v3145_v18  ;;  %v2828_v4 = vpop.xlane.xlu0 %2827 }
0x136f   : > { %v3140_v63 = vmul.f32 %v3138_v23, %v4420_v37  ;;  %v2832_v27 = vmul.f32 %v2828_v4, %v4420_v37 }
0x1371   : > { %v4890_v50 = vsub.f32 %v3130_v10, %v3140_v63  ;;  %v2836_v12 = vadd.f32 1e-05, %v2832_v27 }
0x1373   : > { %3798 = vrsqrt.f32 %v2836_v12  ;;  %v3144_v52 = vmul.f32 %v4890_v50, %v4890_v50  ;;  %vm2873_vm0 = vweird.f32 %v2836_v12 }
0x1375   : > { %v3148_v58 = vsel %vm839_vm1, %v3144_v52, 0.0 }
0x1376   : > { %3149 = vadd.xlane.f32.xlu0 %v3148_v58 }
0x1379   : > { %v3799_v35 = vpop.eup %3798 }
0x137a   : > { %v2868_v7 = vmul.f32 %v3799_v35, %v2836_v12  ;;  %vm2874_vm9 = vweird.f32 %v3799_v35 }
0x137b   : > { %vm2875_vm11 = vmor %vm2873_vm0, %vm2874_vm9 }
0x137c   : > { %v2869_v19 = vmul.f32 %v3799_v35, %v2868_v7 }
0x137e   : > { %v2870_v16 = vmul.f32 0.5, %v2869_v19  ;;  %v3655_v19 = vld [vmem:[%s5004_s18] ss:$0 sm:$0xff] }
0x1380   : > { %v2871_v54 = vsub.f32 1.5, %v2870_v16 }
0x1382   : > { %v2872_v15 = vmul.f32 %v3799_v35, %v2871_v54 }
0x1384   : > { %v2876_v53 = vsel %vm2875_vm11, %v3799_v35, %v2872_v15  ;;  %v3221_v35 = vld [vmem:[%s5006_s20] sm:$0xff] }
0x1385   : > { %v2880_v26 = vmul.f32 %v2876_v53, %v2812_v0  ;;  %v3220_v53 = vld [vmem:[%s5005_s19] sm:$0xff] }
0x1387   : > { %v2884_v40 = vmul.f32 %v2880_v26, %v4460_v17  ;;  %v3814_v17 = vld [vmem:[%s5084_s12] ss:$0 sm:$0xff]  ;;  %s3278_s12 = scalar_lea.hbm %s5093_s10, %s3550_s7 }
0x1388   : > { %s3281_s11 = sshll.u32 %s3278_s12, 4  ;;  %s3282_s11 = int_to_ptr.hbm [resolvable:$true] %s3281_s11 }
0x1389   : > { %v2888_v25 = vadd.f32 %v2884_v40, %v4468_v28  ;;  %s3829_s15 = sshra.s32 %s3282_s11, 4  ;;  %s3830_s15 = int_to_ptr.hbm [resolvable:$true] %s3829_s15 }
0x138a   : > { %3224 = vperm.xlu0 %3645, %v3221_v35   ;;  %p3836_p0 = scmp.lt.s32.totalorder %s3830_s15, %s5093_s10 }
0x138b   : > { %3536 = vmatmul.msk.f32.gmra.mxu3 %vm839_vm1, %v2888_v25 }
0x13e1   : > { %v3147_v39 = vpop.xlane.xlu0 %3146 }
0x13e2   : > { %v3151_v41 = vmul.f32 %v3147_v39, %v4420_v37 }
0x13e4   : > { %v3153_v33 = vadd.f32 1e-05, %v3151_v41 }
0x13e5   : > { %v2924_v42 = vpop.f32.mrf.mxu3 }
0x13e6   : > { %3800 = vrsqrt.f32 %v3153_v33  ;;  %v2925_v28 = vadd.f32 %v3814_v17, %v2924_v42  ;;  %vm3161_vm13 = vweird.f32 %v3153_v33 }
0x13e8   : > { %v2936_v46 = vmul.f32 0.044715, %v2925_v28  ;;  %v2932_v22 = vmul.f32 0.5, %v2925_v28 }
0x13e9   : > { %v3150_v34 = vpop.xlane.xlu0 %3149 }
0x13ea   : > { %v3152_v47 = vmul.f32 %v3150_v34, %v4420_v37  ;;  %v2940_v38 = vmul.f32 %v2936_v46, %v2925_v28  ;;  %v3653_v37 = vld [vmem:[%s5092_s16] ss:$0 sm:$0xff]  ;;  %s3831_s16 = scalar_lea.hbm %s3830_s15, 16 }
0x13eb   : > { %p3832_p11 = scmp.ne.s32.totalorder %s3830_s15, %s3831_s16  ;;  %p3837_p1 = scmp.lt.s32.totalorder %s3835_s6, %s3831_s16 }
0x13ec   : > { %v3801_v49 = vpop.eup %3800  ;;  %v3154_v56 = vadd.f32 1e-05, %v3152_v47  ;;  %v2944_v44 = vmul.f32 %v2940_v38, %v2925_v28 }
0x13ed   : > { %v3156_v60 = vmul.f32 %v3801_v49, %v3153_v33  ;;  %vm3162_vm12 = vweird.f32 %v3801_v49  ;;  %p3833_p12 = pnand %p3832_p11, %p4053_p5  ;;  %p3838_p2 = por %p3837_p1, %p3836_p0 }
0x13ee   : > { %3802 = vrsqrt.f32 %v3154_v56  ;;  %v2948_v31 = vadd.f32 %v2944_v44, %v2925_v28  ;;  %vm3163_vm14 = vmor %vm3161_vm13, %vm3162_vm12  ;;  %vm3171_vm2 = vweird.f32 %v3154_v56 }
0x13ef   : > { %v3157_v0 = vmul.f32 %v3801_v49, %v3156_v60  ;;  %p3834_p13 = pneg %p3833_p12 }
0x13f0   : > { %v2952_v2 = vmul.f32 0.7978846, %v2948_v31 }
0x13f1   : > { %v3158_v1 = vmul.f32 0.5, %v3157_v0  ;;  %p3839_p3 = pnand %p3838_p2, %p3834_p13 }
0x13f2   : > { %3804 = vtanh.f32 %v2952_v2 }
0x13f3   : > { %v3159_v48 = vsub.f32 1.5, %v3158_v1 }
0x13f4   : > { %v3803_v14 = vpop.eup %3802 }
0x13f5   : > { %v3160_v5 = vmul.f32 %v3801_v49, %v3159_v48  ;;  %v3166_v55 = vmul.f32 %v3803_v14, %v3154_v56  ;;  %vm3172_vm15 = vweird.f32 %v3803_v14 }
0x13f6   : > { %vm3173_vm3 = vmor %vm3171_vm2, %vm3172_vm15 }
0x13f7   : > { %v3164_v10 = vsel %vm3163_vm14, %v3801_v49, %v3160_v5  ;;  %v3167_v32 = vmul.f32 %v3803_v14, %v3166_v55 }
0x13f8   : > { %v3805_v62 = vpop.eup %3804  ;;  %v3175_v13 = vmul.f32 %v3164_v10, %v4883_v20 }
0x13f9   : > { %v3168_v6 = vmul.f32 0.5, %v3167_v32  ;;  %v2960_v8 = vadd.f32 1.0, %v3805_v62 }
0x13fa   : > { %v3178_v9 = vmul.f32 %v3653_v37, %v3175_v13 }
0x13fb   : > { %v3169_v29 = vsub.f32 1.5, %v3168_v6  ;;  %v2964_v3 = vmul.f32 %v2960_v8, %v2932_v22 }
0x13fc   : > { %v3181_v59 = vadd.f32 %v3654_v57, %v3178_v9 }
0x13fd   : > { %v3170_v51 = vmul.f32 %v3803_v14, %v3169_v29  ;;  %3539 = vmatmul.msk.f32.gmra.mxu0 %vm1164_vm10, %v2964_v3 }
0x13fe   : > { %3541 = vmatmul.msk.f32.vlgmr.msrb.gmra.mxu1 %vm839_vm1, %v3181_v59  ;;  %3183 = vst.msk [vmem:[%s4921_s23] sm:$0xff] %vm839_vm1, %v3181_v59 }
0x13ff   : > { %v3174_v43 = vsel %vm3173_vm3, %v3803_v14, %v3170_v51 }
0x1400   : > { %v3176_v24 = vmul.f32 %v3174_v43, %v4890_v50 }
0x1402   : > { %v3179_v30 = vmul.f32 %v3653_v37, %v3176_v24 }
0x1404   : > { %v3182_v11 = vadd.f32 %v3654_v57, %v3179_v30 }
0x1406   : > { %3184 = vst.msk [vmem:[%s4921_s23 + $0x8] sm:$0xff] %vm839_vm1, %v3182_v11  ;;  %3542 = vmatmul.msk.f32.gmra.mxu1 %vm839_vm1, %v3182_v11 }
0x140e   : > { %v2927_v45 = vpop.f32.mrf.mxu3 }
0x140f   : > { %v2928_v20 = vadd.f32 %v3814_v17, %v2927_v45 }
0x1411   : > { %v2937_v61 = vmul.f32 0.044715, %v2928_v20  ;;  %v2933_v12 = vmul.f32 0.5, %v2928_v20 }
0x1413   : > { %v2941_v18 = vmul.f32 %v2937_v61, %v2928_v20 }
0x1415   : > { %v2945_v23 = vmul.f32 %v2941_v18, %v2928_v20 }
0x1417   : > { %v2949_v4 = vadd.f32 %v2945_v23, %v2928_v20 }
0x1419   : > { %v2953_v63 = vmul.f32 0.7978846, %v2949_v4 }
0x141b   : > { %3806 = vtanh.f32 %v2953_v63 }
0x1421   : > { %v3807_v27 = vpop.eup %3806 }
0x1422   : > { %v2961_v52 = vadd.f32 1.0, %v3807_v27 }
0x1424   : > { %v2965_v50 = vmul.f32 %v2961_v52, %v2933_v12 }
0x1426   : > { %3540 = vmatmul.msk.f32.gmra.mxu0 %vm1164_vm10, %v2965_v50 }
0x147a   : > { %v3001_v58 = vpop.f32.mrf.mxu0 }
0x147b   : > { %v3214_v7 = vpop.f32.mrf.mxu1 }
0x147c   : > { %v3215_v15 = vadd.f32 %v3655_v19, %v3214_v7 }
0x1483   : > { %v3217_v16 = vpop.f32.mrf.mxu1 }
0x1484   : > { %v3218_v54 = vadd.f32 %v3655_v19, %v3217_v16 }
0x1486   : > { %3244 = vmatpush.msra.mxu2 %v3218_v54 }
0x1488   : > { %3245 = vmatpush.msra.mxu2 %v3215_v15 }
0x1489   : > { %3543 = vmatmul.msk.f32.vlgmr.msra.gmra.mxu2 %vm839_vm1, %v3220_v53 }
0x148a   : > { %3842 = shalt.err (!%p3839_p3)
}
0x148b   : > { %s3888_s12 = smov 128   ;;  %s3889_s7 = smov 8   ;;  %v3225_v40 = vpop.permute.xlu0 %3224  ;;  %v3656_v25 = vld [vmem:[%s781_s27] ss:$0 sm:$0xff]  ;;  %vm3260_vm1 = vcmask 31744  }
0x148c   : > { %3553 = dma.vmem_to_hbm [thread:$0]  (%p4053_p5), %s3280_s13, 256, %s3282_s11, %s3263_s14, %s3888_s12, %s3888_s12, %s3889_s7  }
0x148d   : > { %s3405_s8 = sshll.u32 %s4093_s0, 3  ;;  %v3657_v36 = vld [vmem:[%s784_s28] ss:$0 sm:$0xff]  ;;  %s5095_s16 = sld [smem:[#allocation29_spill]] }
0x1493   : > { %s788_s24 = scalar_lea.vmem %s5095_s16, %s3405_s8 }
0x14a3   : > { %v3003_v26 = vpop.f32.mrf.mxu0 }
0x150c   : > { %v3247_v21 = vpop.f32.mrf.mxu2 }
0x150d   : > { %v3248_v39 = vadd.f32 %v3247_v21, %v3225_v40 }
0x150f   : > { %v3254_v41 = vmul.f32 %v3656_v25, %v3248_v39 }
0x1511   : > { %v3259_v33 = vadd.f32 %v3657_v36, %v3254_v41 }
0x1513   : > { %3261 = vst.msk [vmem:[%s788_s24] sm:$0xff] %vm3260_vm1, %v3259_v33 }
0x1514 PF: > { %s5096_s1 = sld [smem:[#allocation7_spill]] }
0x1515   : > { %s5097_s4 = sld [smem:[#allocation5_spill]] }
0x151a   : > { %p3559_p4 = scmp.ge.s32.totalorder %s5096_s1, 2 }
0x151b   : > { %s3299_s13 = sand.u32 1, %s5097_s4  }
0x151c   : > { %p3556_p5 = pnand %p3559_p4, %p4057_p6  ;;  %s3300_s14 = scalar_lea.sflag [#allocation3], %s3299_s13 }
0x151e   : > { %p3557_p7 = pneg %p3556_p5 }
0x1520   : > { %3860 = dma.done.wait (%p3557_p7), %s3300_s14, 256  }
0x1521   : > { %3862 = vsyncadd (%p3557_p7), %s3300_s14, 4294967040  ;;  %s5099_s28 = sld [smem:[#allocation8_spill]]  ;;  %s5102_s5 = smov %s3869_s26 }
0x1522   : > { %s5100_s0 = sld [smem:[#allocation6_spill]] }
0x1523   : > { %s5101_s27 = sld [smem:[#allocation9_spill]] }
0x1527   : > { %p35_p8 = scmp.ge.s32.totalorder %s5099_s28, 4  }
0x1528   : > { %s5103_s26 = smov %s5100_s0 }
0x1529   :  { %37 = sbr.rel (!%p35_p8) target bundleno = 23 (0x17), region = 173 }
0x152e   :  { %3313 = vsyncpa [#allocation3], 1 }
0x152f   :  { %3315 = vsyncpa [#allocation3 + $0x1], 1 }

</bundles_post_ra>
